<compile_context>
chip_gen: v6e
topology: v6e:2x2x1
jax: 0.10.0
libtpu: 0.0.40
codegen_flags: <defaults>
</compile_context>

<pallas_src>
import functools
import math

import jax
import jax.numpy as jnp
from jax.experimental import pallas as pl
from jax.experimental.pallas import tpu as pltpu


# ----------------------------- tiling helpers ------------------------------

def _pick_tile(dim, cap, align):
    """Largest tile <= cap that divides dim and is a multiple of align
    (or the full dim if dim <= cap)."""
    if dim <= cap:
        return dim
    t = (cap // align) * align
    while t >= align:
        if dim % t == 0:
            return t
        t -= align
    return dim  # fallback: full dim


# ------------------------- tiled matmul (MXU) -------------------------------

def _matmul_kernel(x_ref, w_ref, o_ref, acc_ref):
    @pl.when(pl.program_id(2) == 0)
    def _():
        acc_ref[...] = jnp.zeros_like(acc_ref)

    acc_ref[...] += jnp.dot(
        x_ref[...], w_ref[...], preferred_element_type=jnp.float32)

    @pl.when(pl.program_id(2) == pl.num_programs(2) - 1)
    def _():
        o_ref[...] = acc_ref[...].astype(o_ref.dtype)


def linear(x, w, out_dtype=None):
    """x: [M, K] @ w: [K, N] -> [M, N].  Tiled, f32-accumulating MXU matmul."""
    M, K = x.shape
    K2, N = w.shape
    assert K == K2
    out_dtype = out_dtype or x.dtype
    tm = _pick_tile(M, 256, 8)
    tn = _pick_tile(N, 512, 128)
    tk = _pick_tile(K, 512, 128)
    grid = (M // tm, N // tn, K // tk)
    return pl.pallas_call(
        _matmul_kernel,
        out_shape=jax.ShapeDtypeStruct((M, N), out_dtype),
        grid=grid,
        in_specs=[
            pl.BlockSpec((tm, tk), lambda i, j, k: (i, k)),
            pl.BlockSpec((tk, tn), lambda i, j, k: (k, j)),
        ],
        out_specs=pl.BlockSpec((tm, tn), lambda i, j, k: (i, j)),
        scratch_shapes=[pltpu.VMEM((tm, tn), jnp.float32)],
        compiler_params=pltpu.CompilerParams(
            dimension_semantics=("parallel", "parallel", "arbitrary")),
    )(x, w)


# ----------------- fused gate_up matmul + SiLU-and-mul ----------------------

def _gate_up_silu_kernel(x_ref, wg_ref, wu_ref, o_ref, accg_ref, accu_ref):
    @pl.when(pl.program_id(2) == 0)
    def _():
        accg_ref[...] = jnp.zeros_like(accg_ref)
        accu_ref[...] = jnp.zeros_like(accu_ref)

    x = x_ref[...]
    accg_ref[...] += jnp.dot(x, wg_ref[...], preferred_element_type=jnp.float32)
    accu_ref[...] += jnp.dot(x, wu_ref[...], preferred_element_type=jnp.float32)

    @pl.when(pl.program_id(2) == pl.num_programs(2) - 1)
    def _():
        g = accg_ref[...]
        o_ref[...] = (g * jax.lax.logistic(g) * accu_ref[...]).astype(o_ref.dtype)


def gate_up_silu(x, w_gate, w_up):
    """silu(x @ w_gate) * (x @ w_up), fused epilogue.  x:[T,H] -> [T,I]."""
    M, K = x.shape
    N = w_gate.shape[1]
    tm = _pick_tile(M, 256, 8)
    tn = _pick_tile(N, 512, 128)
    tk = _pick_tile(K, 512, 128)
    grid = (M // tm, N // tn, K // tk)
    return pl.pallas_call(
        _gate_up_silu_kernel,
        out_shape=jax.ShapeDtypeStruct((M, N), x.dtype),
        grid=grid,
        in_specs=[
            pl.BlockSpec((tm, tk), lambda i, j, k: (i, k)),
            pl.BlockSpec((tk, tn), lambda i, j, k: (k, j)),
            pl.BlockSpec((tk, tn), lambda i, j, k: (k, j)),
        ],
        out_specs=pl.BlockSpec((tm, tn), lambda i, j, k: (i, j)),
        scratch_shapes=[pltpu.VMEM((tm, tn), jnp.float32),
                        pltpu.VMEM((tm, tn), jnp.float32)],
        compiler_params=pltpu.CompilerParams(
            dimension_semantics=("parallel", "parallel", "arbitrary")),
    )(x, w_gate, w_up)


# ------------------------------- RMSNorm ------------------------------------

def _rmsnorm_kernel(x_ref, w_ref, o_ref, *, eps):
    x = x_ref[...].astype(jnp.float32)
    var = jnp.mean(x * x, axis=-1, keepdims=True)
    o_ref[...] = (x * jax.lax.rsqrt(var + eps)
                  * w_ref[...].astype(jnp.float32)).astype(o_ref.dtype)


def rmsnorm(x, w, eps):
    """RMSNorm over hidden axis, tiled over tokens. x: [T,H], w: [H]."""
    T, H = x.shape
    tm = _pick_tile(T, 256, 8)
    w2 = w.reshape(1, H)
    return pl.pallas_call(
        functools.partial(_rmsnorm_kernel, eps=eps),
        out_shape=jax.ShapeDtypeStruct((T, H), x.dtype),
        grid=(T // tm,),
        in_specs=[
            pl.BlockSpec((tm, H), lambda i: (i, 0)),
            pl.BlockSpec((1, H), lambda i: (0, 0)),
        ],
        out_specs=pl.BlockSpec((tm, H), lambda i: (i, 0)),
        compiler_params=pltpu.CompilerParams(
            dimension_semantics=("parallel",)),
    )(x, w2)


def _rmsnorm_residual_kernel(x_ref, res_ref, w_ref, o_ref, new_res_ref, *, eps):
    xr = x_ref[...].astype(jnp.float32) + res_ref[...].astype(jnp.float32)
    new_res_ref[...] = xr.astype(new_res_ref.dtype)
    var = jnp.mean(xr * xr, axis=-1, keepdims=True)
    o_ref[...] = (xr * jax.lax.rsqrt(var + eps)
                  * w_ref[...].astype(jnp.float32)).astype(o_ref.dtype)


def rmsnorm_residual(x, residual, w, eps):
    """Fused add-residual RMSNorm: returns (norm(x+res), x+res), tiled over T."""
    T, H = x.shape
    tm = _pick_tile(T, 256, 8)
    w2 = w.reshape(1, H)
    return pl.pallas_call(
        functools.partial(_rmsnorm_residual_kernel, eps=eps),
        out_shape=(
            jax.ShapeDtypeStruct((T, H), x.dtype),
            jax.ShapeDtypeStruct((T, H), x.dtype),
        ),
        grid=(T // tm,),
        in_specs=[
            pl.BlockSpec((tm, H), lambda i: (i, 0)),
            pl.BlockSpec((tm, H), lambda i: (i, 0)),
            pl.BlockSpec((1, H), lambda i: (0, 0)),
        ],
        out_specs=(
            pl.BlockSpec((tm, H), lambda i: (i, 0)),
            pl.BlockSpec((tm, H), lambda i: (i, 0)),
        ),
        compiler_params=pltpu.CompilerParams(
            dimension_semantics=("parallel",)),
    )(x, residual, w2)


# --------- fused W_pack matmul + neox RoPE + q-scaling (head-major out) ------

def _qkv_rope_kernel(x_ref, w_ref, cos_ref, sin_ref, o_ref, acc_ref,
                     *, n_heads, scale, half):
    j = pl.program_id(1)  # packed qkv-head index in [0, 3*n_heads)

    @pl.when(pl.program_id(2) == 0)
    def _():
        acc_ref[...] = jnp.zeros_like(acc_ref)

    acc_ref[...] += jnp.dot(x_ref[...], w_ref[...],
                            preferred_element_type=jnp.float32)

    @pl.when(pl.program_id(2) == pl.num_programs(2) - 1)
    def _():
        r = acc_ref[...]                                     # [tm, D] f32
        # neox rotate-half via one XLU lane roll; sin table is pre-signed.
        rot = r * cos_ref[...] + pltpu.roll(r, half, axis=1) * sin_ref[...]
        is_q = j < n_heads
        is_v = j >= 2 * n_heads
        out = jnp.where(is_v, r, rot * jnp.where(is_q, scale, 1.0))
        o_ref[0] = out.astype(o_ref.dtype)


def qkv_proj_rope(x, w_pack, cos_full, sin_full, n_heads, head_dim, scale):
    """x:[T,H] @ w_pack:[H,3H] -> [3*nH, T, D] head-major.
    RoPE applied to q/k heads, q pre-scaled by head_dim**-0.5, all in the
    matmul epilogue; v heads pass through untouched."""
    T, H = x.shape
    D = head_dim
    tm = _pick_tile(T, 256, 8)
    tk = _pick_tile(H, 512, 128)
    grid = (T // tm, 3 * n_heads, H // tk)
    return pl.pallas_call(
        functools.partial(_qkv_rope_kernel, n_heads=n_heads, scale=scale,
                          half=D // 2),
        out_shape=jax.ShapeDtypeStruct((3 * n_heads, T, D), x.dtype),
        grid=grid,
        in_specs=[
            pl.BlockSpec((tm, tk), lambda i, j, k: (i, k)),
            pl.BlockSpec((tk, D), lambda i, j, k: (k, j)),
            pl.BlockSpec((tm, D), lambda i, j, k: (i, 0)),
            pl.BlockSpec((tm, D), lambda i, j, k: (i, 0)),
        ],
        out_specs=pl.BlockSpec((1, tm, D), lambda i, j, k: (j, i, 0)),
        scratch_shapes=[pltpu.VMEM((tm, D), jnp.float32)],
        compiler_params=pltpu.CompilerParams(
            dimension_semantics=("parallel", "parallel", "arbitrary")),
    )(x, w_pack, cos_full, sin_full)


# --------------------- causal flash attention (online softmax) ---------------

def _flash_attn_kernel(q_ref, k_ref, v_ref, o_ref, m_ref, l_ref, acc_ref,
                       *, tq, tkv):
    qi = pl.program_id(1)
    ki = pl.program_id(2)

    @pl.when(ki == 0)
    def _():
        m_ref[...] = jnp.full_like(m_ref, -jnp.inf)
        l_ref[...] = jnp.zeros_like(l_ref)
        acc_ref[...] = jnp.zeros_like(acc_ref)

    q_start = qi * tq
    kv_start = ki * tkv

    # Skip kv blocks fully above the causal diagonal.
    @pl.when(kv_start <= q_start + tq - 1)
    def _():
        q = q_ref[0]
        k = k_ref[0]
        v = v_ref[0]
        s = jax.lax.dot_general(q, k, (((1,), (1,)), ((), ())),
                                preferred_element_type=jnp.float32)   # [tq,tkv]
        row = jax.lax.broadcasted_iota(jnp.int32, (tq, tkv), 0) + q_start
        col = jax.lax.broadcasted_iota(jnp.int32, (tq, tkv), 1) + kv_start
        s = jnp.where(col <= row, s, -1e30)
        m_prev = m_ref[...]
        m_new = jnp.maximum(m_prev, jnp.max(s, axis=-1, keepdims=True))
        alpha = jnp.exp(m_prev - m_new)
        p = jnp.exp(s - m_new)
        l_ref[...] = alpha * l_ref[...] + jnp.sum(p, axis=-1, keepdims=True)
        acc_ref[...] = alpha * acc_ref[...] + jnp.dot(
            p.astype(v.dtype), v, preferred_element_type=jnp.float32)
        m_ref[...] = m_new

    @pl.when(ki == pl.num_programs(2) - 1)
    def _():
        inv_l = pl.reciprocal(l_ref[...], approx=True)
        o_ref[...] = (acc_ref[...] * inv_l).astype(o_ref.dtype)


def flash_attention(qkv_heads, n_heads, seq_len, head_dim):
    """qkv_heads: [3*nH, T, D] (q/k already RoPE'd, q pre-scaled).
    Output written directly in [T, nH*D] layout (no post-attention relayout)."""
    T, D, nH = seq_len, head_dim, n_heads
    tq = _pick_tile(T, 128, 8)
    tkv = tq  # keep q/kv tiles aligned for the causal mask
    grid = (nH, T // tq, T // tkv)

    q_spec = pl.BlockSpec((1, tq, D), lambda h, qi, ki: (h, qi, 0))
    k_spec = pl.BlockSpec((1, tkv, D), lambda h, qi, ki: (nH + h, ki, 0))
    v_spec = pl.BlockSpec((1, tkv, D), lambda h, qi, ki: (2 * nH + h, ki, 0))

    return pl.pallas_call(
        functools.partial(_flash_attn_kernel, tq=tq, tkv=tkv),
        out_shape=jax.ShapeDtypeStruct((T, nH * D), qkv_heads.dtype),
        grid=grid,
        in_specs=[q_spec, k_spec, v_spec],
        out_specs=pl.BlockSpec((tq, D), lambda h, qi, ki: (qi, h)),
        scratch_shapes=[
            pltpu.VMEM((tq, 1), jnp.float32),    # running max m
            pltpu.VMEM((tq, 1), jnp.float32),    # running sum l
            pltpu.VMEM((tq, D), jnp.float32),    # output accumulator
        ],
        compiler_params=pltpu.CompilerParams(
            dimension_semantics=("parallel", "parallel", "arbitrary")),
    )(qkv_heads, qkv_heads, qkv_heads)


# ------------------------------ glue (JAX) ----------------------------------

def _get_alibi_slopes(total_num_heads):
    # kept for fidelity with the reference module (only used in ALIBI mode)
    closest_power_of_2 = 2 ** math.floor(math.log2(total_num_heads))
    base = 2 ** (-2 ** (-(math.log2(closest_power_of_2) - 3)))
    slopes = [base ** p for p in range(1, 1 + closest_power_of_2)]
    if closest_power_of_2 != total_num_heads:
        extra_base = 2 ** (-2 ** (-(math.log2(2 * closest_power_of_2) - 3)))
        num_remaining = min(closest_power_of_2, total_num_heads - closest_power_of_2)
        slopes += [extra_base ** p for p in range(1, 1 + 2 * num_remaining, 2)]
    return jnp.asarray(slopes, dtype=jnp.float32)


class BaiChuanConfig:
    vocab_size = 512
    hidden_size = 256
    num_attention_heads = 2      # head_dim = 128, matching real BaiChuan
    intermediate_size = 512
    num_hidden_layers = 2
    rms_norm_eps = 1e-6
    rope_theta = 10000.0
    max_position_embeddings = 8192
    tie_word_embeddings = True


def init_params(cfg, key):
    H, I, V = cfg.hidden_size, cfg.intermediate_size, cfg.vocab_size
    keys = jax.random.split(key, 2 + 5 * cfg.num_hidden_layers)
    scale = 0.02
    wdt = jnp.bfloat16
    embed = (scale * jax.random.normal(keys[0], (V, H), jnp.float32)).astype(wdt)
    params = {
        "embed": embed,
        # tied lm_head, pre-transposed ONCE at init (outside jit)
        "lm_head": jnp.asarray(embed.T),
        "final_norm": jnp.ones((H,), jnp.float32),
        "layers": [],
    }
    for li in range(cfg.num_hidden_layers):
        k0, k1, k2, k3, k4 = keys[2 + 5 * li: 7 + 5 * li]
        params["layers"].append({
            "ln1": jnp.ones((H,), jnp.float32),
            "ln2": jnp.ones((H,), jnp.float32),
            # weights stored [in, out] (transposed torch nn.Linear layout), bf16
            "w_pack": (scale * jax.random.normal(k0, (H, 3 * H), jnp.float32)).astype(wdt),
            "o_proj": (scale * jax.random.normal(k1, (H, H), jnp.float32)).astype(wdt),
            "w_gate": (scale * jax.random.normal(k2, (H, I), jnp.float32)).astype(wdt),
            "w_up": (scale * jax.random.normal(k3, (H, I), jnp.float32)).astype(wdt),
            "down": (scale * jax.random.normal(k4, (I, H), jnp.float32)).astype(wdt),
        })
    return params


def baichuan_forward(params, input_ids, positions, cfg):
    """BaiChuanBaseForCausalLM forward (RoPE variant): tokens -> last-token logits."""
    T = input_ids.shape[0]
    H = cfg.hidden_size
    nH = cfg.num_attention_heads
    D = H // nH
    half = D // 2
    scaling = D ** -0.5

    # RoPE tables, duplicated / pre-signed to full head_dim so the fused QKV
    # kernel needs only one lane roll + two multiplies.
    inv_freq = 1.0 / (cfg.rope_theta ** (
        jnp.arange(0, half, dtype=jnp.float32) * 2.0 / D))
    freqs = positions.astype(jnp.float32)[:, None] * inv_freq[None, :]   # [T, half]
    cos = jnp.cos(freqs)
    sin = jnp.sin(freqs)
    cos_full = jnp.concatenate([cos, cos], axis=-1)                      # [T, D]
    sin_full = jnp.concatenate([-sin, sin], axis=-1)                     # [T, D]

    # Embedding lookup: O(T*H) gather instead of a [T,V] one-hot matmul.
    hidden = jnp.take(params["embed"], input_ids, axis=0)                # [T, H]

    residual = None
    for layer in params["layers"]:
        # input layernorm
        if residual is None:
            residual = hidden
            hidden = rmsnorm(hidden, layer["ln1"], cfg.rms_norm_eps)
        else:
            hidden, residual = rmsnorm_residual(hidden, residual, layer["ln1"],
                                                cfg.rms_norm_eps)

        # W_pack + RoPE + q-scaling fused; output head-major [3nH, T, D]
        qkv_heads = qkv_proj_rope(hidden, layer["w_pack"], cos_full, sin_full,
                                  nH, D, scaling)
        attn = flash_attention(qkv_heads, nH, T, D)                      # [T, H]
        hidden = linear(attn, layer["o_proj"])                           # [T, H]

        # post-attention layernorm + MLP (gate_up matmul fused with SiLU*up)
        hidden, residual = rmsnorm_residual(hidden, residual, layer["ln2"],
                                            cfg.rms_norm_eps)
        act = gate_up_silu(hidden, layer["w_gate"], layer["w_up"])       # [T, I]
        hidden = linear(act, layer["down"])                              # [T, H]

    hidden, _ = rmsnorm_residual(hidden, residual, params["final_norm"],
                                 cfg.rms_norm_eps)

    # LogitsProcessor with tied embeddings: only the last position is sampled,
    # so compute logits just for it (f32 accumulation + f32 output).
    last_hidden = hidden[T - 1:T, :]                                     # [1, H]
    logits = linear(last_hidden, params["lm_head"], out_dtype=jnp.float32)
    return logits                                                        # [1, V]


# TODO(synk): ALIBI position-embedding variant (Baichuan-13B), RadixAttention's
# paged KV cache / batched ForwardBatch handling, and tensor-parallel sharding
# are not modeled; this implements the single-sequence RoPE prefill path.

if __name__ == "__main__":
    cfg = BaiChuanConfig()
    key = jax.random.PRNGKey(0)
    pkey, ikey = jax.random.split(key)
    params = init_params(cfg, pkey)

    T = 16
    input_ids = jax.random.randint(ikey, (T,), 0, cfg.vocab_size, dtype=jnp.int32)
    positions = jnp.arange(T, dtype=jnp.int32)

    logits = jax.jit(
        lambda p, ids, pos: baichuan_forward(p, ids, pos, cfg)
    )(params, input_ids, positions)
    jax.block_until_ready(logits)

    assert logits.shape == (1, cfg.vocab_size)
    assert bool(jnp.all(jnp.isfinite(logits)))
    print("KERNEL_OK")
</pallas_src>

<mosaic_0001>
module attributes {stable_mosaic.version = 11 : i64} {
  func.func @_flash_attn_kernel(%arg0: i32, %arg1: i32, %arg2: i32, %arg3: memref<1x16x128xbf16, #tpu.memory_space<vmem>>, %arg4: memref<1x16x128xbf16, #tpu.memory_space<vmem>>, %arg5: memref<1x16x128xbf16, #tpu.memory_space<vmem>>, %arg6: memref<16x128xbf16, #tpu.memory_space<vmem>>, %arg7: memref<16x1xf32, #tpu.memory_space<vmem>>, %arg8: memref<16x1xf32, #tpu.memory_space<vmem>>, %arg9: memref<16x128xf32, #tpu.memory_space<vmem>>) attributes {dimension_semantics = [#tpu.dimension_semantics<parallel>, #tpu.dimension_semantics<parallel>, #tpu.dimension_semantics<arbitrary>], iteration_bounds = array<i64: 2, 1, 1>, scalar_prefetch = 0 : i64, scratch_operands = 3 : i64, tpu.core_type = #tpu.core_type<tc>, window_params = [{transform_indices = @transform_0, window_bounds = array<i64: 1, 16, 128>}, {transform_indices = @transform_1, window_bounds = array<i64: 1, 16, 128>}, {transform_indices = @transform_2, window_bounds = array<i64: 1, 16, 128>}, {transform_indices = @transform_3, window_bounds = array<i64: 16, 128>}]} {
    %c0_i32 = arith.constant 0 : i32
    %0 = arith.cmpi eq, %arg2, %c0_i32 : i32
    %1 = arith.extui %0 : i1 to i32
    %c0_i32_0 = arith.constant 0 : i32
    %2 = arith.cmpi ne, %1, %c0_i32_0 : i32
    scf.if %2 {
      %cst = arith.constant 0xFF800000 : f32
      %13 = vector.broadcast %cst : f32 to vector<16x1xf32>
      %c0 = arith.constant 0 : index
      %c0_6 = arith.constant 0 : index
      %14 = vector.load %arg7[%c0, %c0_6] : memref<16x1xf32, #tpu.memory_space<vmem>>, vector<16x1xf32>
      tpu.vector_store %arg7[%c0, %c0_6], %13 {strides = array<i32>} : memref<16x1xf32, #tpu.memory_space<vmem>>, vector<16x1xf32>,
      %cst_7 = arith.constant 0.000000e+00 : f32
      %15 = vector.broadcast %cst_7 : f32 to vector<16x1xf32>
      %c0_8 = arith.constant 0 : index
      %c0_9 = arith.constant 0 : index
      %16 = vector.load %arg8[%c0_8, %c0_9] : memref<16x1xf32, #tpu.memory_space<vmem>>, vector<16x1xf32>
      tpu.vector_store %arg8[%c0_8, %c0_9], %15 {strides = array<i32>} : memref<16x1xf32, #tpu.memory_space<vmem>>, vector<16x1xf32>,
      %cst_10 = arith.constant 0.000000e+00 : f32
      %17 = vector.broadcast %cst_10 : f32 to vector<16x128xf32>
      %c0_11 = arith.constant 0 : index
      %c0_12 = arith.constant 0 : index
      %18 = vector.load %arg9[%c0_11, %c0_12] : memref<16x128xf32, #tpu.memory_space<vmem>>, vector<16x128xf32>
      tpu.vector_store %arg9[%c0_11, %c0_12], %17 {strides = array<i32>} : memref<16x128xf32, #tpu.memory_space<vmem>>, vector<16x128xf32>,
    } else {
    }
    %c16_i32 = arith.constant 16 : i32
    %3 = arith.muli %arg1, %c16_i32 : i32
    %c16_i32_1 = arith.constant 16 : i32
    %4 = arith.muli %arg2, %c16_i32_1 : i32
    %c16_i32_2 = arith.constant 16 : i32
    %5 = arith.addi %3, %c16_i32_2 : i32
    %c1_i32 = arith.constant 1 : i32
    %6 = arith.subi %5, %c1_i32 : i32
    %7 = arith.cmpi sle, %4, %6 : i32
    %8 = arith.extui %7 : i1 to i32
    %c0_i32_3 = arith.constant 0 : i32
    %9 = arith.cmpi ne, %8, %c0_i32_3 : i32
    scf.if %9 {
      %c0 = arith.constant 0 : index
      %c0_6 = arith.constant 0 : index
      %c0_7 = arith.constant 0 : index
      %13 = vector.load %arg3[%c0, %c0_6, %c0_7] : memref<1x16x128xbf16, #tpu.memory_space<vmem>>, vector<1x16x128xbf16>
      %14 = vector.shape_cast %13 : vector<1x16x128xbf16> to vector<16x128xbf16>
      %c0_8 = arith.constant 0 : index
      %c0_9 = arith.constant 0 : index
      %c0_10 = arith.constant 0 : index
      %15 = vector.load %arg4[%c0_8, %c0_9, %c0_10] : memref<1x16x128xbf16, #tpu.memory_space<vmem>>, vector<1x16x128xbf16>
      %16 = vector.shape_cast %15 : vector<1x16x128xbf16> to vector<16x128xbf16>
      %c0_11 = arith.constant 0 : index
      %c0_12 = arith.constant 0 : index
      %c0_13 = arith.constant 0 : index
      %17 = vector.load %arg5[%c0_11, %c0_12, %c0_13] : memref<1x16x128xbf16, #tpu.memory_space<vmem>>, vector<1x16x128xbf16>
      %18 = vector.shape_cast %17 : vector<1x16x128xbf16> to vector<16x128xbf16>
      %cst = arith.constant dense<0.000000e+00> : vector<16x16xf32>
      %19 = tpu.matmul %14, %16, %cst {dimension_numbers = #tpu.dot_dimension_numbers<[1], [1], [0], [0], [0, 0, 1, 0], [], []>} : vector<16x128xbf16>, vector<16x128xbf16>, vector<16x16xf32> -> vector<16x16xf32>
      %20 = tpu.iota {dimensions = array<i32: 0>} : vector<16x16xi32>
      %21 = vector.broadcast %3 : i32 to vector<16x16xi32>
      %22 = arith.addi %20, %21 : vector<16x16xi32>
      %23 = tpu.iota {dimensions = array<i32: 1>} : vector<16x16xi32>
      %24 = vector.broadcast %4 : i32 to vector<16x16xi32>
      %25 = arith.addi %23, %24 : vector<16x16xi32>
      %26 = arith.cmpi sle, %25, %22 : vector<16x16xi32>
      %cst_14 = arith.constant -1.000000e+30 : f32
      %27 = vector.broadcast %cst_14 : f32 to vector<16x16xf32>
      %28 = arith.select %26, %19, %27 : vector<16x16xi1>, vector<16x16xf32>
      %c0_15 = arith.constant 0 : index
      %c0_16 = arith.constant 0 : index
      %29 = vector.load %arg7[%c0_15, %c0_16] : memref<16x1xf32, #tpu.memory_space<vmem>>, vector<16x1xf32>
      %cst_17 = arith.constant dense<0xFF800000> : vector<16xf32>
      %30 = vector.multi_reduction <maximumf>, %28, %cst_17 [1] : vector<16x16xf32> to vector<16xf32>
      %31 = vector.shape_cast %30 : vector<16xf32> to vector<16x1xf32>
      %32 = arith.maximumf %29, %31 : vector<16x1xf32>
      %33 = arith.subf %29, %32 : vector<16x1xf32>
      %34 = math.exp %33 : vector<16x1xf32>
      %35 = vector.broadcast %32 : vector<16x1xf32> to vector<16x16xf32>
      %36 = arith.subf %28, %35 : vector<16x16xf32>
      %37 = math.exp %36 : vector<16x16xf32>
      %c0_18 = arith.constant 0 : index
      %c0_19 = arith.constant 0 : index
      %38 = vector.load %arg8[%c0_18, %c0_19] : memref<16x1xf32, #tpu.memory_space<vmem>>, vector<16x1xf32>
      %39 = arith.mulf %34, %38 : vector<16x1xf32>
      %cst_20 = arith.constant dense<0.000000e+00> : vector<16xf32>
      %40 = vector.multi_reduction <add>, %37, %cst_20 [1] : vector<16x16xf32> to vector<16xf32>
      %41 = vector.shape_cast %40 : vector<16xf32> to vector<16x1xf32>
      %42 = arith.addf %39, %41 : vector<16x1xf32>
      %c0_21 = arith.constant 0 : index
      %c0_22 = arith.constant 0 : index
      %43 = vector.load %arg8[%c0_21, %c0_22] : memref<16x1xf32, #tpu.memory_space<vmem>>, vector<16x1xf32>
      tpu.vector_store %arg8[%c0_21, %c0_22], %42 {strides = array<i32>} : memref<16x1xf32, #tpu.memory_space<vmem>>, vector<16x1xf32>,
      %c0_23 = arith.constant 0 : index
      %c0_24 = arith.constant 0 : index
      %44 = vector.load %arg9[%c0_23, %c0_24] : memref<16x128xf32, #tpu.memory_space<vmem>>, vector<16x128xf32>
      %45 = vector.broadcast %34 : vector<16x1xf32> to vector<16x128xf32>
      %46 = arith.mulf %45, %44 : vector<16x128xf32>
      %47 = arith.truncf %37 : vector<16x16xf32> to vector<16x16xbf16>
      %cst_25 = arith.constant dense<0.000000e+00> : vector<16x128xf32>
      %48 = tpu.matmul %47, %18, %cst_25 {dimension_numbers = #tpu.dot_dimension_numbers<[1], [0], [0], [1], [0, 0, 1, 1], [], []>} : vector<16x16xbf16>, vector<16x128xbf16>, vector<16x128xf32> -> vector<16x128xf32>
      %49 = arith.addf %46, %48 : vector<16x128xf32>
      %c0_26 = arith.constant 0 : index
      %c0_27 = arith.constant 0 : index
      %50 = vector.load %arg9[%c0_26, %c0_27] : memref<16x128xf32, #tpu.memory_space<vmem>>, vector<16x128xf32>
      tpu.vector_store %arg9[%c0_26, %c0_27], %49 {strides = array<i32>} : memref<16x128xf32, #tpu.memory_space<vmem>>, vector<16x128xf32>,
      %c0_28 = arith.constant 0 : index
      %c0_29 = arith.constant 0 : index
      %51 = vector.load %arg7[%c0_28, %c0_29] : memref<16x1xf32, #tpu.memory_space<vmem>>, vector<16x1xf32>
      tpu.vector_store %arg7[%c0_28, %c0_29], %32 {strides = array<i32>} : memref<16x1xf32, #tpu.memory_space<vmem>>, vector<16x1xf32>,
    } else {
    }
    %c0_i32_4 = arith.constant 0 : i32
    %10 = arith.cmpi eq, %arg2, %c0_i32_4 : i32
    %11 = arith.extui %10 : i1 to i32
    %c0_i32_5 = arith.constant 0 : i32
    %12 = arith.cmpi ne, %11, %c0_i32_5 : i32
    scf.if %12 {
      %c0 = arith.constant 0 : index
      %c0_6 = arith.constant 0 : index
      %13 = vector.load %arg8[%c0, %c0_6] : memref<16x1xf32, #tpu.memory_space<vmem>>, vector<16x1xf32>
      %14 = tpu.reciprocal %13 {approx = true} : vector<16x1xf32> -> vector<16x1xf32>
      %c0_7 = arith.constant 0 : index
      %c0_8 = arith.constant 0 : index
      %15 = vector.load %arg9[%c0_7, %c0_8] : memref<16x128xf32, #tpu.memory_space<vmem>>, vector<16x128xf32>
      %16 = vector.broadcast %14 : vector<16x1xf32> to vector<16x128xf32>
      %17 = arith.mulf %15, %16 : vector<16x128xf32>
      %18 = arith.truncf %17 : vector<16x128xf32> to vector<16x128xbf16>
      %c0_9 = arith.constant 0 : index
      %c0_10 = arith.constant 0 : index
      %19 = vector.load %arg6[%c0_9, %c0_10] : memref<16x128xbf16, #tpu.memory_space<vmem>>, vector<16x128xbf16>
      tpu.vector_store %arg6[%c0_9, %c0_10], %18 {strides = array<i32>} : memref<16x128xbf16, #tpu.memory_space<vmem>>, vector<16x128xbf16>,
    } else {
    }
    return
  }
  func.func @transform_0(%arg0: i32, %arg1: i32, %arg2: i32) -> (i32, i32, i32) {
    %c0_i32 = arith.constant 0 : i32
    %c0_i32_0 = arith.constant 0 : i32
    return %arg0, %arg1, %c0_i32 : i32, i32, i32
  }
  func.func @transform_1(%arg0: i32, %arg1: i32, %arg2: i32) -> (i32, i32, i32) {
    %c2_i32 = arith.constant 2 : i32
    %0 = arith.addi %c2_i32, %arg0 : i32
    %c0_i32 = arith.constant 0 : i32
    %c0_i32_0 = arith.constant 0 : i32
    return %0, %arg2, %c0_i32 : i32, i32, i32
  }
  func.func @transform_2(%arg0: i32, %arg1: i32, %arg2: i32) -> (i32, i32, i32) {
    %c4_i32 = arith.constant 4 : i32
    %0 = arith.addi %c4_i32, %arg0 : i32
    %c0_i32 = arith.constant 0 : i32
    %c0_i32_0 = arith.constant 0 : i32
    return %0, %arg2, %c0_i32 : i32, i32, i32
  }
  func.func @transform_3(%arg0: i32, %arg1: i32, %arg2: i32) -> (i32, i32) {
    %c0_i32 = arith.constant 0 : i32
    return %arg1, %arg0 : i32, i32
  }
}

module attributes {stable_mosaic.version = 11 : i64} {
  func.func @_rmsnorm_kernel(%arg0: i32, %arg1: memref<16x256xbf16, #tpu.memory_space<vmem>>, %arg2: memref<1x256xf32, #tpu.memory_space<vmem>>, %arg3: memref<16x256xbf16, #tpu.memory_space<vmem>>) attributes {dimension_semantics = [#tpu.dimension_semantics<parallel>], iteration_bounds = array<i64: 1>, scalar_prefetch = 0 : i64, scratch_operands = 0 : i64, tpu.core_type = #tpu.core_type<tc>, window_params = [{transform_indices = @transform_0, window_bounds = array<i64: 16, 256>}, {pipeline_mode = #tpu.pipeline_mode<synchronous>, transform_indices = @transform_1, window_bounds = array<i64: 1, 256>}, {transform_indices = @transform_2, window_bounds = array<i64: 16, 256>}]} {
    %c0 = arith.constant 0 : index
    %c0_0 = arith.constant 0 : index
    %0 = vector.load %arg1[%c0, %c0_0] : memref<16x256xbf16, #tpu.memory_space<vmem>>, vector<16x256xbf16>
    %1 = arith.extf %0 : vector<16x256xbf16> to vector<16x256xf32>
    %2 = arith.mulf %1, %1 : vector<16x256xf32>
    %cst = arith.constant dense<0.000000e+00> : vector<16xf32>
    %3 = vector.multi_reduction <add>, %2, %cst [1] : vector<16x256xf32> to vector<16xf32>
    %4 = vector.shape_cast %3 : vector<16xf32> to vector<16x1xf32>
    %cst_1 = arith.constant 2.560000e+02 : f32
    %5 = vector.broadcast %cst_1 : f32 to vector<16x1xf32>
    %6 = arith.divf %4, %5 : vector<16x1xf32>
    %cst_2 = arith.constant 9.99999997E-7 : f32
    %7 = vector.broadcast %cst_2 : f32 to vector<16x1xf32>
    %8 = arith.addf %6, %7 : vector<16x1xf32>
    %9 = math.rsqrt %8 : vector<16x1xf32>
    %10 = vector.broadcast %9 : vector<16x1xf32> to vector<16x256xf32>
    %11 = arith.mulf %1, %10 : vector<16x256xf32>
    %c0_3 = arith.constant 0 : index
    %c0_4 = arith.constant 0 : index
    %12 = vector.load %arg2[%c0_3, %c0_4] : memref<1x256xf32, #tpu.memory_space<vmem>>, vector<1x256xf32>
    %13 = vector.broadcast %12 : vector<1x256xf32> to vector<16x256xf32>
    %14 = arith.mulf %11, %13 : vector<16x256xf32>
    %15 = arith.truncf %14 : vector<16x256xf32> to vector<16x256xbf16>
    %c0_5 = arith.constant 0 : index
    %c0_6 = arith.constant 0 : index
    %16 = vector.load %arg3[%c0_5, %c0_6] : memref<16x256xbf16, #tpu.memory_space<vmem>>, vector<16x256xbf16>
    tpu.vector_store %arg3[%c0_5, %c0_6], %15 {strides = array<i32>} : memref<16x256xbf16, #tpu.memory_space<vmem>>, vector<16x256xbf16>,
    return
  }
  func.func @transform_0(%arg0: i32) -> (i32, i32) {
    %c0_i32 = arith.constant 0 : i32
    %c0_i32_0 = arith.constant 0 : i32
    return %arg0, %c0_i32 : i32, i32
  }
  func.func @transform_1(%arg0: i32) -> (i32, i32) {
    %c0_i32 = arith.constant 0 : i32
    %c0_i32_0 = arith.constant 0 : i32
    %c0_i32_1 = arith.constant 0 : i32
    return %c0_i32, %c0_i32_0 : i32, i32
  }
  func.func @transform_2(%arg0: i32) -> (i32, i32) {
    %c0_i32 = arith.constant 0 : i32
    %c0_i32_0 = arith.constant 0 : i32
    return %arg0, %c0_i32 : i32, i32
  }
}

module attributes {stable_mosaic.version = 11 : i64} {
  func.func @_qkv_rope_kernel(%arg0: i32, %arg1: i32, %arg2: i32, %arg3: memref<16x256xbf16, #tpu.memory_space<vmem>>, %arg4: memref<256x128xbf16, #tpu.memory_space<vmem>>, %arg5: memref<16x128xf32, #tpu.memory_space<vmem>>, %arg6: memref<16x128xf32, #tpu.memory_space<vmem>>, %arg7: memref<1x16x128xbf16, #tpu.memory_space<vmem>>, %arg8: memref<16x128xf32, #tpu.memory_space<vmem>>) attributes {dimension_semantics = [#tpu.dimension_semantics<parallel>, #tpu.dimension_semantics<parallel>, #tpu.dimension_semantics<arbitrary>], iteration_bounds = array<i64: 1, 6, 1>, scalar_prefetch = 0 : i64, scratch_operands = 1 : i64, tpu.core_type = #tpu.core_type<tc>, window_params = [{transform_indices = @transform_0, window_bounds = array<i64: 16, 256>}, {transform_indices = @transform_1, window_bounds = array<i64: 256, 128>}, {transform_indices = @transform_2, window_bounds = array<i64: 16, 128>}, {transform_indices = @transform_3, window_bounds = array<i64: 16, 128>}, {transform_indices = @transform_4, window_bounds = array<i64: 1, 16, 128>}]} {
    %c0_i32 = arith.constant 0 : i32
    %0 = arith.cmpi eq, %arg2, %c0_i32 : i32
    %1 = arith.extui %0 : i1 to i32
    %c0_i32_0 = arith.constant 0 : i32
    %2 = arith.cmpi ne, %1, %c0_i32_0 : i32
    scf.if %2 {
      %cst_10 = arith.constant 0.000000e+00 : f32
      %12 = vector.broadcast %cst_10 : f32 to vector<16x128xf32>
      %c0_11 = arith.constant 0 : index
      %c0_12 = arith.constant 0 : index
      %13 = vector.load %arg8[%c0_11, %c0_12] : memref<16x128xf32, #tpu.memory_space<vmem>>, vector<16x128xf32>
      tpu.vector_store %arg8[%c0_11, %c0_12], %12 {strides = array<i32>} : memref<16x128xf32, #tpu.memory_space<vmem>>, vector<16x128xf32>,
    } else {
    }
    %c0 = arith.constant 0 : index
    %c0_1 = arith.constant 0 : index
    %3 = vector.load %arg8[%c0, %c0_1] : memref<16x128xf32, #tpu.memory_space<vmem>>, vector<16x128xf32>
    %c0_2 = arith.constant 0 : index
    %c0_3 = arith.constant 0 : index
    %4 = vector.load %arg3[%c0_2, %c0_3] : memref<16x256xbf16, #tpu.memory_space<vmem>>, vector<16x256xbf16>
    %c0_4 = arith.constant 0 : index
    %c0_5 = arith.constant 0 : index
    %5 = vector.load %arg4[%c0_4, %c0_5] : memref<256x128xbf16, #tpu.memory_space<vmem>>, vector<256x128xbf16>
    %cst = arith.constant dense<0.000000e+00> : vector<16x128xf32>
    %6 = tpu.matmul %4, %5, %cst {dimension_numbers = #tpu.dot_dimension_numbers<[1], [0], [0], [1], [0, 0, 1, 1], [], []>} : vector<16x256xbf16>, vector<256x128xbf16>, vector<16x128xf32> -> vector<16x128xf32>
    %7 = arith.addf %3, %6 : vector<16x128xf32>
    %c0_6 = arith.constant 0 : index
    %c0_7 = arith.constant 0 : index
    %8 = vector.load %arg8[%c0_6, %c0_7] : memref<16x128xf32, #tpu.memory_space<vmem>>, vector<16x128xf32>
    tpu.vector_store %arg8[%c0_6, %c0_7], %7 {strides = array<i32>} : memref<16x128xf32, #tpu.memory_space<vmem>>, vector<16x128xf32>,
    %c0_i32_8 = arith.constant 0 : i32
    %9 = arith.cmpi eq, %arg2, %c0_i32_8 : i32
    %10 = arith.extui %9 : i1 to i32
    %c0_i32_9 = arith.constant 0 : i32
    %11 = arith.cmpi ne, %10, %c0_i32_9 : i32
    scf.if %11 {
      %c0_10 = arith.constant 0 : index
      %c0_11 = arith.constant 0 : index
      %12 = vector.load %arg8[%c0_10, %c0_11] : memref<16x128xf32, #tpu.memory_space<vmem>>, vector<16x128xf32>
      %c0_12 = arith.constant 0 : index
      %c0_13 = arith.constant 0 : index
      %13 = vector.load %arg5[%c0_12, %c0_13] : memref<16x128xf32, #tpu.memory_space<vmem>>, vector<16x128xf32>
      %14 = arith.mulf %12, %13 : vector<16x128xf32>
      %c64_i32 = arith.constant 64 : i32
      %15 = tpu.dynamic_rotate %12 by %c64_i32 dim 1 : vector<16x128xf32>, i32 -> vector<16x128xf32>
      %c0_14 = arith.constant 0 : index
      %c0_15 = arith.constant 0 : index
      %16 = vector.load %arg6[%c0_14, %c0_15] : memref<16x128xf32, #tpu.memory_space<vmem>>, vector<16x128xf32>
      %17 = arith.mulf %15, %16 : vector<16x128xf32>
      %18 = arith.addf %14, %17 : vector<16x128xf32>
      %c2_i32 = arith.constant 2 : i32
      %19 = arith.cmpi slt, %arg1, %c2_i32 : i32
      %c4_i32 = arith.constant 4 : i32
      %20 = arith.cmpi sge, %arg1, %c4_i32 : i32
      %cst_16 = arith.constant 0.0883883461 : f32
      %cst_17 = arith.constant 1.000000e+00 : f32
      %21 = arith.select %19, %cst_16, %cst_17 : f32
      %22 = vector.broadcast %21 : f32 to vector<16x128xf32>
      %23 = arith.mulf %18, %22 : vector<16x128xf32>
      %24 = arith.select %20, %12, %23 : vector<16x128xf32>
      %25 = arith.truncf %24 : vector<16x128xf32> to vector<16x128xbf16>
      %c0_18 = arith.constant 0 : index
      %c0_19 = arith.constant 0 : index
      %c0_20 = arith.constant 0 : index
      %26 = vector.load %arg7[%c0_18, %c0_19, %c0_20] : memref<1x16x128xbf16, #tpu.memory_space<vmem>>, vector<1x16x128xbf16>
      %27 = vector.shape_cast %26 : vector<1x16x128xbf16> to vector<16x128xbf16>
      %28 = vector.shape_cast %25 : vector<16x128xbf16> to vector<1x16x128xbf16>
      tpu.vector_store %arg7[%c0_18, %c0_19, %c0_20], %28 {strides = array<i32>} : memref<1x16x128xbf16, #tpu.memory_space<vmem>>, vector<1x16x128xbf16>,
    } else {
    }
    return
  }
  func.func @transform_0(%arg0: i32, %arg1: i32, %arg2: i32) -> (i32, i32) {
    %c0_i32 = arith.constant 0 : i32
    return %arg0, %arg2 : i32, i32
  }
  func.func @transform_1(%arg0: i32, %arg1: i32, %arg2: i32) -> (i32, i32) {
    %c0_i32 = arith.constant 0 : i32
    return %arg2, %arg1 : i32, i32
  }
  func.func @transform_2(%arg0: i32, %arg1: i32, %arg2: i32) -> (i32, i32) {
    %c0_i32 = arith.constant 0 : i32
    %c0_i32_0 = arith.constant 0 : i32
    return %arg0, %c0_i32 : i32, i32
  }
  func.func @transform_3(%arg0: i32, %arg1: i32, %arg2: i32) -> (i32, i32) {
    %c0_i32 = arith.constant 0 : i32
    %c0_i32_0 = arith.constant 0 : i32
    return %arg0, %c0_i32 : i32, i32
  }
  func.func @transform_4(%arg0: i32, %arg1: i32, %arg2: i32) -> (i32, i32, i32) {
    %c0_i32 = arith.constant 0 : i32
    %c0_i32_0 = arith.constant 0 : i32
    return %arg1, %arg0, %c0_i32 : i32, i32, i32
  }
}

module attributes {stable_mosaic.version = 11 : i64} {
  func.func @_matmul_kernel(%arg0: i32, %arg1: i32, %arg2: i32, %arg3: memref<16x256xbf16, #tpu.memory_space<vmem>>, %arg4: memref<256x256xbf16, #tpu.memory_space<vmem>>, %arg5: memref<16x256xbf16, #tpu.memory_space<vmem>>, %arg6: memref<16x256xf32, #tpu.memory_space<vmem>>) attributes {dimension_semantics = [#tpu.dimension_semantics<parallel>, #tpu.dimension_semantics<parallel>, #tpu.dimension_semantics<arbitrary>], iteration_bounds = array<i64: 1, 1, 1>, scalar_prefetch = 0 : i64, scratch_operands = 1 : i64, tpu.core_type = #tpu.core_type<tc>, window_params = [{transform_indices = @transform_0, window_bounds = array<i64: 16, 256>}, {transform_indices = @transform_1, window_bounds = array<i64: 256, 256>}, {transform_indices = @transform_2, window_bounds = array<i64: 16, 256>}]} {
    %c0_i32 = arith.constant 0 : i32
    %0 = arith.cmpi eq, %arg2, %c0_i32 : i32
    %1 = arith.extui %0 : i1 to i32
    %c0_i32_0 = arith.constant 0 : i32
    %2 = arith.cmpi ne, %1, %c0_i32_0 : i32
    scf.if %2 {
      %cst_10 = arith.constant 0.000000e+00 : f32
      %12 = vector.broadcast %cst_10 : f32 to vector<16x256xf32>
      %c0_11 = arith.constant 0 : index
      %c0_12 = arith.constant 0 : index
      %13 = vector.load %arg6[%c0_11, %c0_12] : memref<16x256xf32, #tpu.memory_space<vmem>>, vector<16x256xf32>
      tpu.vector_store %arg6[%c0_11, %c0_12], %12 {strides = array<i32>} : memref<16x256xf32, #tpu.memory_space<vmem>>, vector<16x256xf32>,
    } else {
    }
    %c0 = arith.constant 0 : index
    %c0_1 = arith.constant 0 : index
    %3 = vector.load %arg6[%c0, %c0_1] : memref<16x256xf32, #tpu.memory_space<vmem>>, vector<16x256xf32>
    %c0_2 = arith.constant 0 : index
    %c0_3 = arith.constant 0 : index
    %4 = vector.load %arg3[%c0_2, %c0_3] : memref<16x256xbf16, #tpu.memory_space<vmem>>, vector<16x256xbf16>
    %c0_4 = arith.constant 0 : index
    %c0_5 = arith.constant 0 : index
    %5 = vector.load %arg4[%c0_4, %c0_5] : memref<256x256xbf16, #tpu.memory_space<vmem>>, vector<256x256xbf16>
    %cst = arith.constant dense<0.000000e+00> : vector<16x256xf32>
    %6 = tpu.matmul %4, %5, %cst {dimension_numbers = #tpu.dot_dimension_numbers<[1], [0], [0], [1], [0, 0, 1, 1], [], []>} : vector<16x256xbf16>, vector<256x256xbf16>, vector<16x256xf32> -> vector<16x256xf32>
    %7 = arith.addf %3, %6 : vector<16x256xf32>
    %c0_6 = arith.constant 0 : index
    %c0_7 = arith.constant 0 : index
    %8 = vector.load %arg6[%c0_6, %c0_7] : memref<16x256xf32, #tpu.memory_space<vmem>>, vector<16x256xf32>
    tpu.vector_store %arg6[%c0_6, %c0_7], %7 {strides = array<i32>} : memref<16x256xf32, #tpu.memory_space<vmem>>, vector<16x256xf32>,
    %c0_i32_8 = arith.constant 0 : i32
    %9 = arith.cmpi eq, %arg2, %c0_i32_8 : i32
    %10 = arith.extui %9 : i1 to i32
    %c0_i32_9 = arith.constant 0 : i32
    %11 = arith.cmpi ne, %10, %c0_i32_9 : i32
    scf.if %11 {
      %c0_10 = arith.constant 0 : index
      %c0_11 = arith.constant 0 : index
      %12 = vector.load %arg6[%c0_10, %c0_11] : memref<16x256xf32, #tpu.memory_space<vmem>>, vector<16x256xf32>
      %13 = arith.truncf %12 : vector<16x256xf32> to vector<16x256xbf16>
      %c0_12 = arith.constant 0 : index
      %c0_13 = arith.constant 0 : index
      %14 = vector.load %arg5[%c0_12, %c0_13] : memref<16x256xbf16, #tpu.memory_space<vmem>>, vector<16x256xbf16>
      tpu.vector_store %arg5[%c0_12, %c0_13], %13 {strides = array<i32>} : memref<16x256xbf16, #tpu.memory_space<vmem>>, vector<16x256xbf16>,
    } else {
    }
    return
  }
  func.func @transform_0(%arg0: i32, %arg1: i32, %arg2: i32) -> (i32, i32) {
    %c0_i32 = arith.constant 0 : i32
    return %arg0, %arg2 : i32, i32
  }
  func.func @transform_1(%arg0: i32, %arg1: i32, %arg2: i32) -> (i32, i32) {
    %c0_i32 = arith.constant 0 : i32
    return %arg2, %arg1 : i32, i32
  }
  func.func @transform_2(%arg0: i32, %arg1: i32, %arg2: i32) -> (i32, i32) {
    %c0_i32 = arith.constant 0 : i32
    return %arg0, %arg1 : i32, i32
  }
}

module attributes {stable_mosaic.version = 11 : i64} {
  func.func @_rmsnorm_residual_kernel(%arg0: i32, %arg1: memref<16x256xbf16, #tpu.memory_space<vmem>>, %arg2: memref<16x256xbf16, #tpu.memory_space<vmem>>, %arg3: memref<1x256xf32, #tpu.memory_space<vmem>>, %arg4: memref<16x256xbf16, #tpu.memory_space<vmem>>, %arg5: memref<16x256xbf16, #tpu.memory_space<vmem>>) attributes {dimension_semantics = [#tpu.dimension_semantics<parallel>], iteration_bounds = array<i64: 1>, scalar_prefetch = 0 : i64, scratch_operands = 0 : i64, tpu.core_type = #tpu.core_type<tc>, window_params = [{transform_indices = @transform_0, window_bounds = array<i64: 16, 256>}, {transform_indices = @transform_1, window_bounds = array<i64: 16, 256>}, {pipeline_mode = #tpu.pipeline_mode<synchronous>, transform_indices = @transform_2, window_bounds = array<i64: 1, 256>}, {transform_indices = @transform_3, window_bounds = array<i64: 16, 256>}, {transform_indices = @transform_4, window_bounds = array<i64: 16, 256>}]} {
    %c0 = arith.constant 0 : index
    %c0_0 = arith.constant 0 : index
    %0 = vector.load %arg1[%c0, %c0_0] : memref<16x256xbf16, #tpu.memory_space<vmem>>, vector<16x256xbf16>
    %1 = arith.extf %0 : vector<16x256xbf16> to vector<16x256xf32>
    %c0_1 = arith.constant 0 : index
    %c0_2 = arith.constant 0 : index
    %2 = vector.load %arg2[%c0_1, %c0_2] : memref<16x256xbf16, #tpu.memory_space<vmem>>, vector<16x256xbf16>
    %3 = arith.extf %2 : vector<16x256xbf16> to vector<16x256xf32>
    %4 = arith.addf %1, %3 : vector<16x256xf32>
    %5 = arith.truncf %4 : vector<16x256xf32> to vector<16x256xbf16>
    %c0_3 = arith.constant 0 : index
    %c0_4 = arith.constant 0 : index
    %6 = vector.load %arg5[%c0_3, %c0_4] : memref<16x256xbf16, #tpu.memory_space<vmem>>, vector<16x256xbf16>
    tpu.vector_store %arg5[%c0_3, %c0_4], %5 {strides = array<i32>} : memref<16x256xbf16, #tpu.memory_space<vmem>>, vector<16x256xbf16>,
    %7 = arith.mulf %4, %4 : vector<16x256xf32>
    %cst = arith.constant dense<0.000000e+00> : vector<16xf32>
    %8 = vector.multi_reduction <add>, %7, %cst [1] : vector<16x256xf32> to vector<16xf32>
    %9 = vector.shape_cast %8 : vector<16xf32> to vector<16x1xf32>
    %cst_5 = arith.constant 2.560000e+02 : f32
    %10 = vector.broadcast %cst_5 : f32 to vector<16x1xf32>
    %11 = arith.divf %9, %10 : vector<16x1xf32>
    %cst_6 = arith.constant 9.99999997E-7 : f32
    %12 = vector.broadcast %cst_6 : f32 to vector<16x1xf32>
    %13 = arith.addf %11, %12 : vector<16x1xf32>
    %14 = math.rsqrt %13 : vector<16x1xf32>
    %15 = vector.broadcast %14 : vector<16x1xf32> to vector<16x256xf32>
    %16 = arith.mulf %4, %15 : vector<16x256xf32>
    %c0_7 = arith.constant 0 : index
    %c0_8 = arith.constant 0 : index
    %17 = vector.load %arg3[%c0_7, %c0_8] : memref<1x256xf32, #tpu.memory_space<vmem>>, vector<1x256xf32>
    %18 = vector.broadcast %17 : vector<1x256xf32> to vector<16x256xf32>
    %19 = arith.mulf %16, %18 : vector<16x256xf32>
    %20 = arith.truncf %19 : vector<16x256xf32> to vector<16x256xbf16>
    %c0_9 = arith.constant 0 : index
    %c0_10 = arith.constant 0 : index
    %21 = vector.load %arg4[%c0_9, %c0_10] : memref<16x256xbf16, #tpu.memory_space<vmem>>, vector<16x256xbf16>
    tpu.vector_store %arg4[%c0_9, %c0_10], %20 {strides = array<i32>} : memref<16x256xbf16, #tpu.memory_space<vmem>>, vector<16x256xbf16>,
    return
  }
  func.func @transform_0(%arg0: i32) -> (i32, i32) {
    %c0_i32 = arith.constant 0 : i32
    %c0_i32_0 = arith.constant 0 : i32
    return %arg0, %c0_i32 : i32, i32
  }
  func.func @transform_1(%arg0: i32) -> (i32, i32) {
    %c0_i32 = arith.constant 0 : i32
    %c0_i32_0 = arith.constant 0 : i32
    return %arg0, %c0_i32 : i32, i32
  }
  func.func @transform_2(%arg0: i32) -> (i32, i32) {
    %c0_i32 = arith.constant 0 : i32
    %c0_i32_0 = arith.constant 0 : i32
    %c0_i32_1 = arith.constant 0 : i32
    return %c0_i32, %c0_i32_0 : i32, i32
  }
  func.func @transform_3(%arg0: i32) -> (i32, i32) {
    %c0_i32 = arith.constant 0 : i32
    %c0_i32_0 = arith.constant 0 : i32
    return %arg0, %c0_i32 : i32, i32
  }
  func.func @transform_4(%arg0: i32) -> (i32, i32) {
    %c0_i32 = arith.constant 0 : i32
    %c0_i32_0 = arith.constant 0 : i32
    return %arg0, %c0_i32 : i32, i32
  }
}

module attributes {stable_mosaic.version = 11 : i64} {
  func.func @_gate_up_silu_kernel(%arg0: i32, %arg1: i32, %arg2: i32, %arg3: memref<16x256xbf16, #tpu.memory_space<vmem>>, %arg4: memref<256x512xbf16, #tpu.memory_space<vmem>>, %arg5: memref<256x512xbf16, #tpu.memory_space<vmem>>, %arg6: memref<16x512xbf16, #tpu.memory_space<vmem>>, %arg7: memref<16x512xf32, #tpu.memory_space<vmem>>, %arg8: memref<16x512xf32, #tpu.memory_space<vmem>>) attributes {dimension_semantics = [#tpu.dimension_semantics<parallel>, #tpu.dimension_semantics<parallel>, #tpu.dimension_semantics<arbitrary>], iteration_bounds = array<i64: 1, 1, 1>, scalar_prefetch = 0 : i64, scratch_operands = 2 : i64, tpu.core_type = #tpu.core_type<tc>, window_params = [{transform_indices = @transform_0, window_bounds = array<i64: 16, 256>}, {transform_indices = @transform_1, window_bounds = array<i64: 256, 512>}, {transform_indices = @transform_2, window_bounds = array<i64: 256, 512>}, {transform_indices = @transform_3, window_bounds = array<i64: 16, 512>}]} {
    %c0_i32 = arith.constant 0 : i32
    %0 = arith.cmpi eq, %arg2, %c0_i32 : i32
    %1 = arith.extui %0 : i1 to i32
    %c0_i32_0 = arith.constant 0 : i32
    %2 = arith.cmpi ne, %1, %c0_i32_0 : i32
    scf.if %2 {
      %cst_17 = arith.constant 0.000000e+00 : f32
      %17 = vector.broadcast %cst_17 : f32 to vector<16x512xf32>
      %c0_18 = arith.constant 0 : index
      %c0_19 = arith.constant 0 : index
      %18 = vector.load %arg7[%c0_18, %c0_19] : memref<16x512xf32, #tpu.memory_space<vmem>>, vector<16x512xf32>
      tpu.vector_store %arg7[%c0_18, %c0_19], %17 {strides = array<i32>} : memref<16x512xf32, #tpu.memory_space<vmem>>, vector<16x512xf32>,
      %cst_20 = arith.constant 0.000000e+00 : f32
      %19 = vector.broadcast %cst_20 : f32 to vector<16x512xf32>
      %c0_21 = arith.constant 0 : index
      %c0_22 = arith.constant 0 : index
      %20 = vector.load %arg8[%c0_21, %c0_22] : memref<16x512xf32, #tpu.memory_space<vmem>>, vector<16x512xf32>
      tpu.vector_store %arg8[%c0_21, %c0_22], %19 {strides = array<i32>} : memref<16x512xf32, #tpu.memory_space<vmem>>, vector<16x512xf32>,
    } else {
    }
    %c0 = arith.constant 0 : index
    %c0_1 = arith.constant 0 : index
    %3 = vector.load %arg3[%c0, %c0_1] : memref<16x256xbf16, #tpu.memory_space<vmem>>, vector<16x256xbf16>
    %c0_2 = arith.constant 0 : index
    %c0_3 = arith.constant 0 : index
    %4 = vector.load %arg7[%c0_2, %c0_3] : memref<16x512xf32, #tpu.memory_space<vmem>>, vector<16x512xf32>
    %c0_4 = arith.constant 0 : index
    %c0_5 = arith.constant 0 : index
    %5 = vector.load %arg4[%c0_4, %c0_5] : memref<256x512xbf16, #tpu.memory_space<vmem>>, vector<256x512xbf16>
    %cst = arith.constant dense<0.000000e+00> : vector<16x512xf32>
    %6 = tpu.matmul %3, %5, %cst {dimension_numbers = #tpu.dot_dimension_numbers<[1], [0], [0], [1], [0, 0, 1, 1], [], []>} : vector<16x256xbf16>, vector<256x512xbf16>, vector<16x512xf32> -> vector<16x512xf32>
    %7 = arith.addf %4, %6 : vector<16x512xf32>
    %c0_6 = arith.constant 0 : index
    %c0_7 = arith.constant 0 : index
    %8 = vector.load %arg7[%c0_6, %c0_7] : memref<16x512xf32, #tpu.memory_space<vmem>>, vector<16x512xf32>
    tpu.vector_store %arg7[%c0_6, %c0_7], %7 {strides = array<i32>} : memref<16x512xf32, #tpu.memory_space<vmem>>, vector<16x512xf32>,
    %c0_8 = arith.constant 0 : index
    %c0_9 = arith.constant 0 : index
    %9 = vector.load %arg8[%c0_8, %c0_9] : memref<16x512xf32, #tpu.memory_space<vmem>>, vector<16x512xf32>
    %c0_10 = arith.constant 0 : index
    %c0_11 = arith.constant 0 : index
    %10 = vector.load %arg5[%c0_10, %c0_11] : memref<256x512xbf16, #tpu.memory_space<vmem>>, vector<256x512xbf16>
    %cst_12 = arith.constant dense<0.000000e+00> : vector<16x512xf32>
    %11 = tpu.matmul %3, %10, %cst_12 {dimension_numbers = #tpu.dot_dimension_numbers<[1], [0], [0], [1], [0, 0, 1, 1], [], []>} : vector<16x256xbf16>, vector<256x512xbf16>, vector<16x512xf32> -> vector<16x512xf32>
    %12 = arith.addf %9, %11 : vector<16x512xf32>
    %c0_13 = arith.constant 0 : index
    %c0_14 = arith.constant 0 : index
    %13 = vector.load %arg8[%c0_13, %c0_14] : memref<16x512xf32, #tpu.memory_space<vmem>>, vector<16x512xf32>
    tpu.vector_store %arg8[%c0_13, %c0_14], %12 {strides = array<i32>} : memref<16x512xf32, #tpu.memory_space<vmem>>, vector<16x512xf32>,
    %c0_i32_15 = arith.constant 0 : i32
    %14 = arith.cmpi eq, %arg2, %c0_i32_15 : i32
    %15 = arith.extui %14 : i1 to i32
    %c0_i32_16 = arith.constant 0 : i32
    %16 = arith.cmpi ne, %15, %c0_i32_16 : i32
    scf.if %16 {
      %c0_17 = arith.constant 0 : index
      %c0_18 = arith.constant 0 : index
      %17 = vector.load %arg7[%c0_17, %c0_18] : memref<16x512xf32, #tpu.memory_space<vmem>>, vector<16x512xf32>
      %18 = arith.negf %17 : vector<16x512xf32>
      %19 = math.exp %18 : vector<16x512xf32>
      %cst_19 = arith.constant 1.000000e+00 : f32
      %20 = vector.broadcast %cst_19 : f32 to vector<16x512xf32>
      %21 = arith.addf %20, %19 : vector<16x512xf32>
      %22 = arith.divf %20, %21 : vector<16x512xf32>
      %23 = arith.mulf %17, %22 : vector<16x512xf32>
      %c0_20 = arith.constant 0 : index
      %c0_21 = arith.constant 0 : index
      %24 = vector.load %arg8[%c0_20, %c0_21] : memref<16x512xf32, #tpu.memory_space<vmem>>, vector<16x512xf32>
      %25 = arith.mulf %23, %24 : vector<16x512xf32>
      %26 = arith.truncf %25 : vector<16x512xf32> to vector<16x512xbf16>
      %c0_22 = arith.constant 0 : index
      %c0_23 = arith.constant 0 : index
      %27 = vector.load %arg6[%c0_22, %c0_23] : memref<16x512xbf16, #tpu.memory_space<vmem>>, vector<16x512xbf16>
      tpu.vector_store %arg6[%c0_22, %c0_23], %26 {strides = array<i32>} : memref<16x512xbf16, #tpu.memory_space<vmem>>, vector<16x512xbf16>,
    } else {
    }
    return
  }
  func.func @transform_0(%arg0: i32, %arg1: i32, %arg2: i32) -> (i32, i32) {
    %c0_i32 = arith.constant 0 : i32
    return %arg0, %arg2 : i32, i32
  }
  func.func @transform_1(%arg0: i32, %arg1: i32, %arg2: i32) -> (i32, i32) {
    %c0_i32 = arith.constant 0 : i32
    return %arg2, %arg1 : i32, i32
  }
  func.func @transform_2(%arg0: i32, %arg1: i32, %arg2: i32) -> (i32, i32) {
    %c0_i32 = arith.constant 0 : i32
    return %arg2, %arg1 : i32, i32
  }
  func.func @transform_3(%arg0: i32, %arg1: i32, %arg2: i32) -> (i32, i32) {
    %c0_i32 = arith.constant 0 : i32
    return %arg0, %arg1 : i32, i32
  }
}

module attributes {stable_mosaic.version = 11 : i64} {
  func.func @_matmul_kernel(%arg0: i32, %arg1: i32, %arg2: i32, %arg3: memref<16x512xbf16, #tpu.memory_space<vmem>>, %arg4: memref<512x256xbf16, #tpu.memory_space<vmem>>, %arg5: memref<16x256xbf16, #tpu.memory_space<vmem>>, %arg6: memref<16x256xf32, #tpu.memory_space<vmem>>) attributes {dimension_semantics = [#tpu.dimension_semantics<parallel>, #tpu.dimension_semantics<parallel>, #tpu.dimension_semantics<arbitrary>], iteration_bounds = array<i64: 1, 1, 1>, scalar_prefetch = 0 : i64, scratch_operands = 1 : i64, tpu.core_type = #tpu.core_type<tc>, window_params = [{transform_indices = @transform_0, window_bounds = array<i64: 16, 512>}, {transform_indices = @transform_1, window_bounds = array<i64: 512, 256>}, {transform_indices = @transform_2, window_bounds = array<i64: 16, 256>}]} {
    %c0_i32 = arith.constant 0 : i32
    %0 = arith.cmpi eq, %arg2, %c0_i32 : i32
    %1 = arith.extui %0 : i1 to i32
    %c0_i32_0 = arith.constant 0 : i32
    %2 = arith.cmpi ne, %1, %c0_i32_0 : i32
    scf.if %2 {
      %cst_10 = arith.constant 0.000000e+00 : f32
      %12 = vector.broadcast %cst_10 : f32 to vector<16x256xf32>
      %c0_11 = arith.constant 0 : index
      %c0_12 = arith.constant 0 : index
      %13 = vector.load %arg6[%c0_11, %c0_12] : memref<16x256xf32, #tpu.memory_space<vmem>>, vector<16x256xf32>
      tpu.vector_store %arg6[%c0_11, %c0_12], %12 {strides = array<i32>} : memref<16x256xf32, #tpu.memory_space<vmem>>, vector<16x256xf32>,
    } else {
    }
    %c0 = arith.constant 0 : index
    %c0_1 = arith.constant 0 : index
    %3 = vector.load %arg6[%c0, %c0_1] : memref<16x256xf32, #tpu.memory_space<vmem>>, vector<16x256xf32>
    %c0_2 = arith.constant 0 : index
    %c0_3 = arith.constant 0 : index
    %4 = vector.load %arg3[%c0_2, %c0_3] : memref<16x512xbf16, #tpu.memory_space<vmem>>, vector<16x512xbf16>
    %c0_4 = arith.constant 0 : index
    %c0_5 = arith.constant 0 : index
    %5 = vector.load %arg4[%c0_4, %c0_5] : memref<512x256xbf16, #tpu.memory_space<vmem>>, vector<512x256xbf16>
    %cst = arith.constant dense<0.000000e+00> : vector<16x256xf32>
    %6 = tpu.matmul %4, %5, %cst {dimension_numbers = #tpu.dot_dimension_numbers<[1], [0], [0], [1], [0, 0, 1, 1], [], []>} : vector<16x512xbf16>, vector<512x256xbf16>, vector<16x256xf32> -> vector<16x256xf32>
    %7 = arith.addf %3, %6 : vector<16x256xf32>
    %c0_6 = arith.constant 0 : index
    %c0_7 = arith.constant 0 : index
    %8 = vector.load %arg6[%c0_6, %c0_7] : memref<16x256xf32, #tpu.memory_space<vmem>>, vector<16x256xf32>
    tpu.vector_store %arg6[%c0_6, %c0_7], %7 {strides = array<i32>} : memref<16x256xf32, #tpu.memory_space<vmem>>, vector<16x256xf32>,
    %c0_i32_8 = arith.constant 0 : i32
    %9 = arith.cmpi eq, %arg2, %c0_i32_8 : i32
    %10 = arith.extui %9 : i1 to i32
    %c0_i32_9 = arith.constant 0 : i32
    %11 = arith.cmpi ne, %10, %c0_i32_9 : i32
    scf.if %11 {
      %c0_10 = arith.constant 0 : index
      %c0_11 = arith.constant 0 : index
      %12 = vector.load %arg6[%c0_10, %c0_11] : memref<16x256xf32, #tpu.memory_space<vmem>>, vector<16x256xf32>
      %13 = arith.truncf %12 : vector<16x256xf32> to vector<16x256xbf16>
      %c0_12 = arith.constant 0 : index
      %c0_13 = arith.constant 0 : index
      %14 = vector.load %arg5[%c0_12, %c0_13] : memref<16x256xbf16, #tpu.memory_space<vmem>>, vector<16x256xbf16>
      tpu.vector_store %arg5[%c0_12, %c0_13], %13 {strides = array<i32>} : memref<16x256xbf16, #tpu.memory_space<vmem>>, vector<16x256xbf16>,
    } else {
    }
    return
  }
  func.func @transform_0(%arg0: i32, %arg1: i32, %arg2: i32) -> (i32, i32) {
    %c0_i32 = arith.constant 0 : i32
    return %arg0, %arg2 : i32, i32
  }
  func.func @transform_1(%arg0: i32, %arg1: i32, %arg2: i32) -> (i32, i32) {
    %c0_i32 = arith.constant 0 : i32
    return %arg2, %arg1 : i32, i32
  }
  func.func @transform_2(%arg0: i32, %arg1: i32, %arg2: i32) -> (i32, i32) {
    %c0_i32 = arith.constant 0 : i32
    return %arg0, %arg1 : i32, i32
  }
}

module attributes {stable_mosaic.version = 11 : i64} {
  func.func @_qkv_rope_kernel(%arg0: i32, %arg1: i32, %arg2: i32, %arg3: memref<16x256xbf16, #tpu.memory_space<vmem>>, %arg4: memref<256x128xbf16, #tpu.memory_space<vmem>>, %arg5: memref<16x128xf32, #tpu.memory_space<vmem>>, %arg6: memref<16x128xf32, #tpu.memory_space<vmem>>, %arg7: memref<1x16x128xbf16, #tpu.memory_space<vmem>>, %arg8: memref<16x128xf32, #tpu.memory_space<vmem>>) attributes {dimension_semantics = [#tpu.dimension_semantics<parallel>, #tpu.dimension_semantics<parallel>, #tpu.dimension_semantics<arbitrary>], iteration_bounds = array<i64: 1, 6, 1>, scalar_prefetch = 0 : i64, scratch_operands = 1 : i64, tpu.core_type = #tpu.core_type<tc>, window_params = [{transform_indices = @transform_0, window_bounds = array<i64: 16, 256>}, {transform_indices = @transform_1, window_bounds = array<i64: 256, 128>}, {transform_indices = @transform_2, window_bounds = array<i64: 16, 128>}, {transform_indices = @transform_3, window_bounds = array<i64: 16, 128>}, {transform_indices = @transform_4, window_bounds = array<i64: 1, 16, 128>}]} {
    %c0_i32 = arith.constant 0 : i32
    %0 = arith.cmpi eq, %arg2, %c0_i32 : i32
    %1 = arith.extui %0 : i1 to i32
    %c0_i32_0 = arith.constant 0 : i32
    %2 = arith.cmpi ne, %1, %c0_i32_0 : i32
    scf.if %2 {
      %cst_10 = arith.constant 0.000000e+00 : f32
      %12 = vector.broadcast %cst_10 : f32 to vector<16x128xf32>
      %c0_11 = arith.constant 0 : index
      %c0_12 = arith.constant 0 : index
      %13 = vector.load %arg8[%c0_11, %c0_12] : memref<16x128xf32, #tpu.memory_space<vmem>>, vector<16x128xf32>
      tpu.vector_store %arg8[%c0_11, %c0_12], %12 {strides = array<i32>} : memref<16x128xf32, #tpu.memory_space<vmem>>, vector<16x128xf32>,
    } else {
    }
    %c0 = arith.constant 0 : index
    %c0_1 = arith.constant 0 : index
    %3 = vector.load %arg8[%c0, %c0_1] : memref<16x128xf32, #tpu.memory_space<vmem>>, vector<16x128xf32>
    %c0_2 = arith.constant 0 : index
    %c0_3 = arith.constant 0 : index
    %4 = vector.load %arg3[%c0_2, %c0_3] : memref<16x256xbf16, #tpu.memory_space<vmem>>, vector<16x256xbf16>
    %c0_4 = arith.constant 0 : index
    %c0_5 = arith.constant 0 : index
    %5 = vector.load %arg4[%c0_4, %c0_5] : memref<256x128xbf16, #tpu.memory_space<vmem>>, vector<256x128xbf16>
    %cst = arith.constant dense<0.000000e+00> : vector<16x128xf32>
    %6 = tpu.matmul %4, %5, %cst {dimension_numbers = #tpu.dot_dimension_numbers<[1], [0], [0], [1], [0, 0, 1, 1], [], []>} : vector<16x256xbf16>, vector<256x128xbf16>, vector<16x128xf32> -> vector<16x128xf32>
    %7 = arith.addf %3, %6 : vector<16x128xf32>
    %c0_6 = arith.constant 0 : index
    %c0_7 = arith.constant 0 : index
    %8 = vector.load %arg8[%c0_6, %c0_7] : memref<16x128xf32, #tpu.memory_space<vmem>>, vector<16x128xf32>
    tpu.vector_store %arg8[%c0_6, %c0_7], %7 {strides = array<i32>} : memref<16x128xf32, #tpu.memory_space<vmem>>, vector<16x128xf32>,
    %c0_i32_8 = arith.constant 0 : i32
    %9 = arith.cmpi eq, %arg2, %c0_i32_8 : i32
    %10 = arith.extui %9 : i1 to i32
    %c0_i32_9 = arith.constant 0 : i32
    %11 = arith.cmpi ne, %10, %c0_i32_9 : i32
    scf.if %11 {
      %c0_10 = arith.constant 0 : index
      %c0_11 = arith.constant 0 : index
      %12 = vector.load %arg8[%c0_10, %c0_11] : memref<16x128xf32, #tpu.memory_space<vmem>>, vector<16x128xf32>
      %c0_12 = arith.constant 0 : index
      %c0_13 = arith.constant 0 : index
      %13 = vector.load %arg5[%c0_12, %c0_13] : memref<16x128xf32, #tpu.memory_space<vmem>>, vector<16x128xf32>
      %14 = arith.mulf %12, %13 : vector<16x128xf32>
      %c64_i32 = arith.constant 64 : i32
      %15 = tpu.dynamic_rotate %12 by %c64_i32 dim 1 : vector<16x128xf32>, i32 -> vector<16x128xf32>
      %c0_14 = arith.constant 0 : index
      %c0_15 = arith.constant 0 : index
      %16 = vector.load %arg6[%c0_14, %c0_15] : memref<16x128xf32, #tpu.memory_space<vmem>>, vector<16x128xf32>
      %17 = arith.mulf %15, %16 : vector<16x128xf32>
      %18 = arith.addf %14, %17 : vector<16x128xf32>
      %c2_i32 = arith.constant 2 : i32
      %19 = arith.cmpi slt, %arg1, %c2_i32 : i32
      %c4_i32 = arith.constant 4 : i32
      %20 = arith.cmpi sge, %arg1, %c4_i32 : i32
      %cst_16 = arith.constant 0.0883883461 : f32
      %cst_17 = arith.constant 1.000000e+00 : f32
      %21 = arith.select %19, %cst_16, %cst_17 : f32
      %22 = vector.broadcast %21 : f32 to vector<16x128xf32>
      %23 = arith.mulf %18, %22 : vector<16x128xf32>
      %24 = arith.select %20, %12, %23 : vector<16x128xf32>
      %25 = arith.truncf %24 : vector<16x128xf32> to vector<16x128xbf16>
      %c0_18 = arith.constant 0 : index
      %c0_19 = arith.constant 0 : index
      %c0_20 = arith.constant 0 : index
      %26 = vector.load %arg7[%c0_18, %c0_19, %c0_20] : memref<1x16x128xbf16, #tpu.memory_space<vmem>>, vector<1x16x128xbf16>
      %27 = vector.shape_cast %26 : vector<1x16x128xbf16> to vector<16x128xbf16>
      %28 = vector.shape_cast %25 : vector<16x128xbf16> to vector<1x16x128xbf16>
      tpu.vector_store %arg7[%c0_18, %c0_19, %c0_20], %28 {strides = array<i32>} : memref<1x16x128xbf16, #tpu.memory_space<vmem>>, vector<1x16x128xbf16>,
    } else {
    }
    return
  }
  func.func @transform_0(%arg0: i32, %arg1: i32, %arg2: i32) -> (i32, i32) {
    %c0_i32 = arith.constant 0 : i32
    return %arg0, %arg2 : i32, i32
  }
  func.func @transform_1(%arg0: i32, %arg1: i32, %arg2: i32) -> (i32, i32) {
    %c0_i32 = arith.constant 0 : i32
    return %arg2, %arg1 : i32, i32
  }
  func.func @transform_2(%arg0: i32, %arg1: i32, %arg2: i32) -> (i32, i32) {
    %c0_i32 = arith.constant 0 : i32
    %c0_i32_0 = arith.constant 0 : i32
    return %arg0, %c0_i32 : i32, i32
  }
  func.func @transform_3(%arg0: i32, %arg1: i32, %arg2: i32) -> (i32, i32) {
    %c0_i32 = arith.constant 0 : i32
    %c0_i32_0 = arith.constant 0 : i32
    return %arg0, %c0_i32 : i32, i32
  }
  func.func @transform_4(%arg0: i32, %arg1: i32, %arg2: i32) -> (i32, i32, i32) {
    %c0_i32 = arith.constant 0 : i32
    %c0_i32_0 = arith.constant 0 : i32
    return %arg1, %arg0, %c0_i32 : i32, i32, i32
  }
}

module attributes {stable_mosaic.version = 11 : i64} {
  func.func @_rmsnorm_residual_kernel(%arg0: i32, %arg1: memref<16x256xbf16, #tpu.memory_space<vmem>>, %arg2: memref<16x256xbf16, #tpu.memory_space<vmem>>, %arg3: memref<1x256xf32, #tpu.memory_space<vmem>>, %arg4: memref<16x256xbf16, #tpu.memory_space<vmem>>, %arg5: memref<16x256xbf16, #tpu.memory_space<vmem>>) attributes {dimension_semantics = [#tpu.dimension_semantics<parallel>], iteration_bounds = array<i64: 1>, scalar_prefetch = 0 : i64, scratch_operands = 0 : i64, tpu.core_type = #tpu.core_type<tc>, window_params = [{transform_indices = @transform_0, window_bounds = array<i64: 16, 256>}, {transform_indices = @transform_1, window_bounds = array<i64: 16, 256>}, {pipeline_mode = #tpu.pipeline_mode<synchronous>, transform_indices = @transform_2, window_bounds = array<i64: 1, 256>}, {transform_indices = @transform_3, window_bounds = array<i64: 16, 256>}, {transform_indices = @transform_4, window_bounds = array<i64: 16, 256>}]} {
    %c0 = arith.constant 0 : index
    %c0_0 = arith.constant 0 : index
    %0 = vector.load %arg1[%c0, %c0_0] : memref<16x256xbf16, #tpu.memory_space<vmem>>, vector<16x256xbf16>
    %1 = arith.extf %0 : vector<16x256xbf16> to vector<16x256xf32>
    %c0_1 = arith.constant 0 : index
    %c0_2 = arith.constant 0 : index
    %2 = vector.load %arg2[%c0_1, %c0_2] : memref<16x256xbf16, #tpu.memory_space<vmem>>, vector<16x256xbf16>
    %3 = arith.extf %2 : vector<16x256xbf16> to vector<16x256xf32>
    %4 = arith.addf %1, %3 : vector<16x256xf32>
    %5 = arith.truncf %4 : vector<16x256xf32> to vector<16x256xbf16>
    %c0_3 = arith.constant 0 : index
    %c0_4 = arith.constant 0 : index
    %6 = vector.load %arg5[%c0_3, %c0_4] : memref<16x256xbf16, #tpu.memory_space<vmem>>, vector<16x256xbf16>
    tpu.vector_store %arg5[%c0_3, %c0_4], %5 {strides = array<i32>} : memref<16x256xbf16, #tpu.memory_space<vmem>>, vector<16x256xbf16>,
    %7 = arith.mulf %4, %4 : vector<16x256xf32>
    %cst = arith.constant dense<0.000000e+00> : vector<16xf32>
    %8 = vector.multi_reduction <add>, %7, %cst [1] : vector<16x256xf32> to vector<16xf32>
    %9 = vector.shape_cast %8 : vector<16xf32> to vector<16x1xf32>
    %cst_5 = arith.constant 2.560000e+02 : f32
    %10 = vector.broadcast %cst_5 : f32 to vector<16x1xf32>
    %11 = arith.divf %9, %10 : vector<16x1xf32>
    %cst_6 = arith.constant 9.99999997E-7 : f32
    %12 = vector.broadcast %cst_6 : f32 to vector<16x1xf32>
    %13 = arith.addf %11, %12 : vector<16x1xf32>
    %14 = math.rsqrt %13 : vector<16x1xf32>
    %15 = vector.broadcast %14 : vector<16x1xf32> to vector<16x256xf32>
    %16 = arith.mulf %4, %15 : vector<16x256xf32>
    %c0_7 = arith.constant 0 : index
    %c0_8 = arith.constant 0 : index
    %17 = vector.load %arg3[%c0_7, %c0_8] : memref<1x256xf32, #tpu.memory_space<vmem>>, vector<1x256xf32>
    %18 = vector.broadcast %17 : vector<1x256xf32> to vector<16x256xf32>
    %19 = arith.mulf %16, %18 : vector<16x256xf32>
    %20 = arith.truncf %19 : vector<16x256xf32> to vector<16x256xbf16>
    %c0_9 = arith.constant 0 : index
    %c0_10 = arith.constant 0 : index
    %21 = vector.load %arg4[%c0_9, %c0_10] : memref<16x256xbf16, #tpu.memory_space<vmem>>, vector<16x256xbf16>
    tpu.vector_store %arg4[%c0_9, %c0_10], %20 {strides = array<i32>} : memref<16x256xbf16, #tpu.memory_space<vmem>>, vector<16x256xbf16>,
    return
  }
  func.func @transform_0(%arg0: i32) -> (i32, i32) {
    %c0_i32 = arith.constant 0 : i32
    %c0_i32_0 = arith.constant 0 : i32
    return %arg0, %c0_i32 : i32, i32
  }
  func.func @transform_1(%arg0: i32) -> (i32, i32) {
    %c0_i32 = arith.constant 0 : i32
    %c0_i32_0 = arith.constant 0 : i32
    return %arg0, %c0_i32 : i32, i32
  }
  func.func @transform_2(%arg0: i32) -> (i32, i32) {
    %c0_i32 = arith.constant 0 : i32
    %c0_i32_0 = arith.constant 0 : i32
    %c0_i32_1 = arith.constant 0 : i32
    return %c0_i32, %c0_i32_0 : i32, i32
  }
  func.func @transform_3(%arg0: i32) -> (i32, i32) {
    %c0_i32 = arith.constant 0 : i32
    %c0_i32_0 = arith.constant 0 : i32
    return %arg0, %c0_i32 : i32, i32
  }
  func.func @transform_4(%arg0: i32) -> (i32, i32) {
    %c0_i32 = arith.constant 0 : i32
    %c0_i32_0 = arith.constant 0 : i32
    return %arg0, %c0_i32 : i32, i32
  }
}

module attributes {stable_mosaic.version = 11 : i64} {
  func.func @_matmul_kernel(%arg0: i32, %arg1: i32, %arg2: i32, %arg3: memref<1x256xbf16, #tpu.memory_space<vmem>>, %arg4: memref<256x512xbf16, #tpu.memory_space<vmem>>, %arg5: memref<1x512xf32, #tpu.memory_space<vmem>>, %arg6: memref<1x512xf32, #tpu.memory_space<vmem>>) attributes {dimension_semantics = [#tpu.dimension_semantics<parallel>, #tpu.dimension_semantics<parallel>, #tpu.dimension_semantics<arbitrary>], iteration_bounds = array<i64: 1, 1, 1>, scalar_prefetch = 0 : i64, scratch_operands = 1 : i64, tpu.core_type = #tpu.core_type<tc>, window_params = [{transform_indices = @transform_0, window_bounds = array<i64: 1, 256>}, {transform_indices = @transform_1, window_bounds = array<i64: 256, 512>}, {transform_indices = @transform_2, window_bounds = array<i64: 1, 512>}]} {
    %c0_i32 = arith.constant 0 : i32
    %0 = arith.cmpi eq, %arg2, %c0_i32 : i32
    %1 = arith.extui %0 : i1 to i32
    %c0_i32_0 = arith.constant 0 : i32
    %2 = arith.cmpi ne, %1, %c0_i32_0 : i32
    scf.if %2 {
      %cst_10 = arith.constant 0.000000e+00 : f32
      %12 = vector.broadcast %cst_10 : f32 to vector<1x512xf32>
      %c0_11 = arith.constant 0 : index
      %c0_12 = arith.constant 0 : index
      %13 = vector.load %arg6[%c0_11, %c0_12] : memref<1x512xf32, #tpu.memory_space<vmem>>, vector<1x512xf32>
      tpu.vector_store %arg6[%c0_11, %c0_12], %12 {strides = array<i32>} : memref<1x512xf32, #tpu.memory_space<vmem>>, vector<1x512xf32>,
    } else {
    }
    %c0 = arith.constant 0 : index
    %c0_1 = arith.constant 0 : index
    %3 = vector.load %arg6[%c0, %c0_1] : memref<1x512xf32, #tpu.memory_space<vmem>>, vector<1x512xf32>
    %c0_2 = arith.constant 0 : index
    %c0_3 = arith.constant 0 : index
    %4 = vector.load %arg3[%c0_2, %c0_3] : memref<1x256xbf16, #tpu.memory_space<vmem>>, vector<1x256xbf16>
    %c0_4 = arith.constant 0 : index
    %c0_5 = arith.constant 0 : index
    %5 = vector.load %arg4[%c0_4, %c0_5] : memref<256x512xbf16, #tpu.memory_space<vmem>>, vector<256x512xbf16>
    %cst = arith.constant dense<0.000000e+00> : vector<1x512xf32>
    %6 = tpu.matmul %4, %5, %cst {dimension_numbers = #tpu.dot_dimension_numbers<[1], [0], [0], [1], [0, 0, 1, 1], [], []>} : vector<1x256xbf16>, vector<256x512xbf16>, vector<1x512xf32> -> vector<1x512xf32>
    %7 = arith.addf %3, %6 : vector<1x512xf32>
    %c0_6 = arith.constant 0 : index
    %c0_7 = arith.constant 0 : index
    %8 = vector.load %arg6[%c0_6, %c0_7] : memref<1x512xf32, #tpu.memory_space<vmem>>, vector<1x512xf32>
    tpu.vector_store %arg6[%c0_6, %c0_7], %7 {strides = array<i32>} : memref<1x512xf32, #tpu.memory_space<vmem>>, vector<1x512xf32>,
    %c0_i32_8 = arith.constant 0 : i32
    %9 = arith.cmpi eq, %arg2, %c0_i32_8 : i32
    %10 = arith.extui %9 : i1 to i32
    %c0_i32_9 = arith.constant 0 : i32
    %11 = arith.cmpi ne, %10, %c0_i32_9 : i32
    scf.if %11 {
      %c0_10 = arith.constant 0 : index
      %c0_11 = arith.constant 0 : index
      %12 = vector.load %arg6[%c0_10, %c0_11] : memref<1x512xf32, #tpu.memory_space<vmem>>, vector<1x512xf32>
      %c0_12 = arith.constant 0 : index
      %c0_13 = arith.constant 0 : index
      %13 = vector.load %arg5[%c0_12, %c0_13] : memref<1x512xf32, #tpu.memory_space<vmem>>, vector<1x512xf32>
      tpu.vector_store %arg5[%c0_12, %c0_13], %12 {strides = array<i32>} : memref<1x512xf32, #tpu.memory_space<vmem>>, vector<1x512xf32>,
    } else {
    }
    return
  }
  func.func @transform_0(%arg0: i32, %arg1: i32, %arg2: i32) -> (i32, i32) {
    %c0_i32 = arith.constant 0 : i32
    return %arg0, %arg2 : i32, i32
  }
  func.func @transform_1(%arg0: i32, %arg1: i32, %arg2: i32) -> (i32, i32) {
    %c0_i32 = arith.constant 0 : i32
    return %arg2, %arg1 : i32, i32
  }
  func.func @transform_2(%arg0: i32, %arg1: i32, %arg2: i32) -> (i32, i32) {
    %c0_i32 = arith.constant 0 : i32
    return %arg0, %arg1 : i32, i32
  }
}

</mosaic_0001>

<bundles_post_ra>
// kernel: _lambda_.16
= control target key start
LH: loop header
LB: loop body
LE: loop exit
PB: predicated region body
PF: predicated region fallthrough
CT: control target
= control target key end

     0   :  { %v40_v16 = vlaneseq  ;;  %s110_s0 = inlined_call_operand.vmem [shape: bf16[16,256], index: 0, kind: input, shape index: {}]   ;;  %s111_s1 = inlined_call_operand.vmem [shape: f32[1,256], index: 1, kind: input, shape index: {}]   ;;  %s112_s2 = inlined_call_operand.vmem [shape: bf16[16,256], index: 2, kind: output, shape index: {}]  }
   0x1   :  { %v11_v0 = vld [vmem:[%s110_s0] sm:$0xff]  ;;  %v12_v1 = vld [vmem:[%s110_s0 + $0x8] sm:$0xff] }
   0x2   :  { %v13_v2 = vunpack.c.l.bf16 %v11_v0  ;;  %v14_v3 = vunpack.c.h.bf16 %v11_v0  ;;  %v15_v4 = vunpack.c.l.bf16 %v12_v1  ;;  %v16_v5 = vunpack.c.h.bf16 %v12_v1  ;;  %v38_v22 = vld [vmem:[%s111_s1] sm:$0x3] }
   0x3   :  { %v41_v19 = vshrl.u32 %v40_v16, 7 }
   0x4   :  { %v17_v6 = vmul.f32 %v13_v2, %v13_v2  ;;  %v18_v7 = vmul.f32 %v14_v3, %v14_v3  ;;  %v19_v8 = vmul.f32 %v15_v4, %v15_v4  ;;  %v20_v9 = vmul.f32 %v16_v5, %v16_v5 }
   0x5   :  { %v42_v20 = vsub.s32 0, %v41_v19  ;;  %v46_v21 = vsub.s32 1, %v41_v19 }
   0x6   :  { %v21_v10 = vadd.f32 %v18_v7, %v17_v6  ;;  %v24_v11 = vadd.f32 %v20_v9, %v19_v8 }
   0x7   :  { %v43_v23 = vrot.slane %v38_v22, %v42_v20  ;;  %v47_v24 = vrot.slane %v38_v22, %v46_v21 }
   0x8   :  { %22 = vadd.xlane.f32.xlu0 %v21_v10 }
   0xc   :  { %25 = vadd.xlane.f32.xlu0 %v24_v11 }
  0x91   :  { %v23_v12 = vpop.xlane.xlu0 %22 }
  0x92   :  { %v28_v13 = vmul.f32 0.00390625, %v23_v12 }
  0x94   :  { %v30_v14 = vadd.f32 1e-06, %v28_v13 }
  0x95   :  { %v26_v15 = vpop.xlane.xlu0 %25 }
  0x96   :  { %76 = vrsqrt.f32 %v30_v14  ;;  %v29_v17 = vmul.f32 0.00390625, %v26_v15 }
  0x98   :  { %v31_v18 = vadd.f32 1e-06, %v29_v17 }
  0x9a   :  { %78 = vrsqrt.f32 %v31_v18 }
  0xa3   :  { %v77_v25 = vpop.eup %76 }
  0xa4   :  { %v34_v26 = vmul.f32 %v77_v25, %v13_v2  ;;  %v35_v27 = vmul.f32 %v77_v25, %v14_v3 }
  0xa6   :  { %v50_v28 = vmul.f32 %v43_v23, %v34_v26  ;;  %v51_v29 = vmul.f32 %v47_v24, %v35_v27 }
  0xa7   :  { %v79_v30 = vpop.eup %78 }
  0xa8   :  { %v74_v31 = vpack.c.bf16 %v51_v29, %v50_v28  ;;  %v36_v32 = vmul.f32 %v79_v30, %v15_v4  ;;  %v37_v33 = vmul.f32 %v79_v30, %v16_v5 }
  0xaa   :  { %66 = vst [vmem:[%s112_s2] sm:$0xff] %v74_v31  ;;  %v52_v34 = vmul.f32 %v43_v23, %v36_v32  ;;  %v53_v35 = vmul.f32 %v47_v24, %v37_v33 }
  0xac   :  { %v75_v36 = vpack.c.bf16 %v53_v35, %v52_v34 }
  0xae   :  { %67 = vst [vmem:[%s112_s2 + $0x8] sm:$0xff] %v75_v36 }

// kernel: _lambda_.18
= control target key start
LH: loop header
LB: loop body
LE: loop exit
PB: predicated region body
PF: predicated region fallthrough
CT: control target
= control target key end

     0   :  { %s867_s12 = smov 0   ;;  %s869_s13 = smov 0   ;;  %s958_s0 = inlined_call_operand.vmem [shape: bf16[6,16,128], index: 0, kind: input, shape index: {}, may-alias: {0,1,2}]   ;;  %s959_s1 = inlined_call_operand.vmem [shape: bf16[6,16,128], index: 1, kind: input, shape index: {}, may-alias: {0,1,2}]   ;;  %s960_s2 = inlined_call_operand.vmem [shape: bf16[6,16,128], index: 2, kind: input, shape index: {}, may-alias: {0,1,2}]   ;;  %s961_s3 = inlined_call_operand.vmem [shape: bf16[16,256], index: 3, kind: output, shape index: {}]  }
   0x1   :  { %s871_s14 = smov 0   ;;  %s873_s15 = smov 0  }
   0x2   :  { %s875_s16 = smov 0  }
   0x3 LB: > { %s694_s17 = sadd.s32 4294967295, %s841_s16   ;;  %s32_s18 = sadd.s32 1, %s837_s15  ;;  %s841_s16 = sphi %s875_s16, %s13_s16   ;;  %s837_s15 = sphi %s873_s15, %s966_s15   ;;  %s833_s14 = sphi %s871_s14, %s965_s14   ;;  %s829_s13 = sphi %s869_s13, %s964_s13   ;;  %s825_s12 = sphi %s867_s12, %s963_s12  }
   0x4   : > { %p34_p0 = scmp.ge.s32.totalorder %s32_s18, 2  ;;  %s129_s19 = sadd.s32 1, %s829_s13 }
   0x5   : > { %p139_p1 = scmp.ne.s32.totalorder %s829_s13, %s825_s12  ;;  %p140_p2 = scmp.eq.s32.totalorder %s694_s17, 1 }
   0x6   : > { %s968_s18 = smov (%p34_p0, %s32_s18), 0  ;;  %p698_p4 = scmp.ge.s32.totalorder %s841_s16, 1 }
   0x7   : > { %p899_p3 = por %p140_p2, %p139_p1  ;;  %s125_s21 = ssub.s32 %s837_s15, %s968_s18 }
   0x8   : > { %p207_p5 = scmp.lt.s32.totalorder %s841_s16, 3  ;;  %p127_p6 = scmp.eq.s32.totalorder %s125_s21, 0 }
   0xa   : > { %p208_p7 = pnand %p698_p4, %p207_p5 }
   0xb   : > { %s908_s22 = scalar_select %p127_p6, %s829_s13, %s129_s19  }
   0xc   : > { %211 = sbr.rel (%p208_p7) target bundleno = 810 (0x32a), region = 32  ;;  %s264_s23 = sadd.s32 (!%p208_p7), 2, %s833_s14 }
   0xd   : > { %p255_p8 = scmp.lt.s32.totalorder (!%p208_p7), %s833_s14, 5  ;;  %p266_p9 = scmp.lt.s32.totalorder (!%p208_p7), %s264_s23, 5 }
   0xe   : > { %s276_s6 = sadd.s32 (!%p208_p7), 4, %s833_s14  ;;  %s251_s11 = sand.u32 (!%p208_p7), 1, %s825_s12  }
   0xf   : > { %p278_p10 = scmp.lt.s32.totalorder (!%p208_p7), %s276_s6, 5  ;;  %s699_s17 = sshll.u32 (!%p208_p7), %s251_s11, 3 }
  0x10   : > { %s253_s19 = scalar_lea.vmem (!%p208_p7), [#allocation5], %s699_s17 }
  0x11   : > { %v843_v0 = vmov 0.0   ;;  %vm844_vm0 = vmmov 0   ;;  %s256_s24 = scalar_select %p255_p8, %s833_s14, 5  ;;  %vm294_vm1 = vcmask 7168   ;;  %v845_v3 = vmov -inf  }
  0x12   : > { %730 = vmatprep.subr.bf16.mxu0 %v843_v0  ;;  %732 = vmatprep.mubr.msk.bf16.mxu0 %vm844_vm0, %v843_v0  ;;  %s970_s23 = smov (!%p266_p9, %s264_s23), 5  ;;  %295 = vst.msk [vmem:[#allocation2] sm:$0xff] %vm294_vm1, %v845_v3  ;;  %296 = vst.msk [vmem:[#allocation2 + $0x8] sm:$0xff] %vm294_vm1, %v845_v3  ;;  %v367_v4 = vlaneseq  ;;  %vm383_vm3 = vcmask 130048   ;;  %v846_v16 = vmov 0   ;;  %s972_s6 = smov (!%p278_p10, %s276_s6), 5 }
  0x13   : > { %736 = vmatprep.subr.bf16.mxu1 %v843_v0  ;;  %738 = vmatprep.mubr.msk.bf16.mxu1 %vm844_vm0, %v843_v0  ;;  %s716_s25 = sshll.u32 %s256_s24, 3  ;;  %s717_s26 = sshll.u32 %s970_s23, 3  ;;  %297 = vst.msk [vmem:[#allocation3] sm:$0xff] %vm294_vm1, %v843_v0  ;;  %298 = vst.msk [vmem:[#allocation3 + $0x8] sm:$0xff] %vm294_vm1, %v843_v0 }
  0x14   : > { %s262_s29 = scalar_lea.vmem %s958_s0, %s716_s25  ;;  %s273_s5 = scalar_lea.vmem %s959_s1, %s717_s26  ;;  %v368_v5 = vshrl.u32 %v367_v4, 7  ;;  %v374_v6 = vand.u32 127, %v367_v4  ;;  %786 = vset.pattern.permute.xlu1 %v846_v16  ;;  %787 = vset.pattern.permute.xlu0 %v846_v16 }
  0x15   : > { %v788_v1 = vld [vmem:[%s273_s5] sm:$0xff]   ;;  %s718_s7 = sshll.u32 %s972_s6, 3  ;;  %s713_s21 = sshll.u32 (%p899_p3), %s833_s14, 2 }
  0x16   : > { %731 = vmatpush3.bf16.xpose.msra.mxu0 %v788_v1  ;;  %v789_v2 = vld [vmem:[%s262_s29] sm:$0xff]   ;;  %vm377_vm2 = vcmp.le.s32.totalorder %v374_v6, %v368_v5  ;;  %v369_v7 = vadd.s32 8, %v368_v5  ;;  %s285_s10 = scalar_lea.vmem %s960_s2, %s718_s7  ;;  %s542_s24 = scalar_lea.vmem (%p899_p3), %s961_s3, %s713_s21 }
  0x17   : > { %v790_v25 = vld [vmem:[%s285_s10] sm:$0xff]  }
  0x18   : > { %vm378_vm4 = vcmp.le.s32.totalorder %v374_v6, %v369_v7  ;;  %737 = vmatpush3.bf16.msra.mxu1 %v790_v25 }
  0x19   : > { %v381_v17 = vld [vmem:[#allocation2] sm:$0xff]  ;;  %v382_v20 = vld [vmem:[#allocation2 + $0x8] sm:$0xff] }
  0x1a   : > { %v414_v41 = vld [vmem:[#allocation3] sm:$0xff]  ;;  %v415_v44 = vld [vmem:[#allocation3 + $0x8] sm:$0xff] }
  0x1d   : > { %733 = vmatmul.mubr.bf16.vlgmr.msra.gmra.mxu0 %v789_v2 }
  0xdd   : > { %v360_v8 = vpop.f32.mrf.mxu0 }
  0xde   : > { %v379_v9 = vsel %vm377_vm2, %v360_v8, -1e+30 }
  0xdf   : > { %v734_v10 = vpop.f32.mrf.mxu0  ;;  %v384_v11 = vsel %vm383_vm3, %v379_v9, -inf }
  0xe0   : > { %385 = vmax.xlane.f32.xlu0 %v384_v11 }
  0xe1   : > { %v363_v12 = vpop.f32.mrf.mxu0 }
  0xe2   : > { %v380_v13 = vsel %vm378_vm4, %v363_v12, -1e+30 }
  0xe3   : > { %v735_v14 = vpop.f32.mrf.mxu0  ;;  %v387_v15 = vsel %vm383_vm3, %v380_v13, -inf }
  0xe4   : > { %388 = vmax.xlane.f32.xlu0 %v387_v15 }
 0x169   : > { %v386_v18 = vpop.xlane.xlu0 %385 }
 0x16a   : > { %v390_v19 = vmax.f32 %v381_v17, %v386_v18 }
 0x16c   : > { %v392_v21 = vsub.f32 %v381_v17, %v390_v19  ;;  %498 = vst.msk [vmem:[#allocation2] sm:$0xff] %vm294_vm1, %v390_v19  ;;  %400 = vperm.xlu1 %786, %v390_v19  }
 0x16d   : > { %v389_v22 = vpop.xlane.xlu0 %388 }
 0x16e   : > { %v391_v23 = vmax.f32 %v382_v20, %v389_v22  ;;  %v394_v38 = vmul.f32 1.442695, %v392_v21 }
 0x170   : > { %v393_v24 = vsub.f32 %v382_v20, %v391_v23  ;;  %499 = vst.msk [vmem:[#allocation2 + $0x8] sm:$0xff] %vm294_vm1, %v391_v23  ;;  %405 = vperm.xlu1 %786, %v391_v23  }
 0x172   : > { %v396_v35 = vmul.f32 1.442695, %v393_v24 }
 0x1e7   : > { %v401_v26 = vpop.permute.xlu1 %400 }
 0x1e8   : > { %v408_v27 = vsub.f32 %v379_v9, %v401_v26 }
 0x1ea   : > { %v410_v28 = vmul.f32 1.442695, %v408_v27 }
 0x1eb   : > { %v406_v29 = vpop.permute.xlu1 %405 }
 0x1ec   : > { %791 = vpow2.f32 %v410_v28  ;;  %v409_v30 = vsub.f32 %v380_v13, %v406_v29 }
 0x1ee   : > { %v412_v31 = vmul.f32 1.442695, %v409_v30 }
 0x1f0   : > { %793 = vpow2.f32 %v412_v31 }
 0x1f1   : > { %795 = vpow2.f32 %v396_v35 }
 0x1f2   : > { %797 = vpow2.f32 %v394_v38 }
 0x1f9   : > { %v792_v32 = vpop.eup %791 }
 0x1fa   : > { %v418_v33 = vsel %vm383_vm3, %v792_v32, 0.0 }
 0x1fb   : > { %419 = vadd.xlane.f32.xlu0 %v418_v33 }
 0x1fd   : > { %v794_v34 = vpop.eup %793 }
 0x1fe   : > { %v421_v36 = vsel %vm383_vm3, %v794_v34, 0.0  ;;  %v443_v37 = vpack.c.bf16 %v794_v34, %v792_v32  ;;  %v796_v39 = vpop.eup %795 }
 0x1ff   : > { %422 = vadd.xlane.f32.xlu1 %v421_v36  ;;  %v798_v40 = vpop.eup %797  ;;  %v417_v46 = vmul.f32 %v796_v39, %v415_v44 }
 0x200   : > { %739 = vmatmul.mubr.msk.bf16.vlgmr.msra.gmra.mxu1 %vm383_vm3, %v443_v37  ;;  %v416_v42 = vmul.f32 %v798_v40, %v414_v41 }
 0x210   : > { %438 = vperm.xlu1 %786, %v796_v39  }
 0x211   : > { %433 = vperm.xlu0 %787, %v798_v40  }
 0x284   : > { %v420_v43 = vpop.xlane.xlu0 %419 }
 0x285   : > { %v424_v45 = vadd.f32 %v420_v43, %v416_v42 }
 0x287   : > { %427 = vst.msk [vmem:[#allocation3] sm:$0xff] %vm294_vm1, %v424_v45 }
 0x288   : > { %v423_v47 = vpop.xlane.xlu1 %422 }
 0x289   : > { %v425_v48 = vadd.f32 %v423_v47, %v417_v46 }
 0x28b   : > { %428 = vst.msk [vmem:[#allocation3 + $0x8] sm:$0xff] %vm294_vm1, %v425_v48 }
 0x28c   : > { %v434_v57 = vpop.permute.xlu0 %433  ;;  %v439_v58 = vpop.permute.xlu1 %438 }
 0x28d   : > { %v442_v60 = vmul.f32 0.0, %v439_v58  ;;  %v441_v61 = vmul.f32 0.0, %v434_v57 }
 0x28e   : > { %v503_v49 = vld [vmem:[#allocation3] sm:$0xff] }
 0x28f   : > { %799 = vrcp.f32 %v503_v49 }
 0x292   : > { %v504_v50 = vld [vmem:[#allocation3 + $0x8] sm:$0xff] }
 0x293   : > { %801 = vrcp.f32 %v504_v50 }
 0x29c   : > { %v800_v51 = vpop.eup %799 }
 0x29d   : > { %511 = vperm.xlu0 %787, %v800_v51  }
 0x2a0   : > { %v802_v52 = vpop.eup %801 }
 0x2a1   : > { %516 = vperm.xlu0 %787, %v802_v52  }
 0x2c0   : > { %v487_v53 = vpop.f32.mrf.mxu1 }
 0x2c1   : > { %v494_v62 = vadd.f32 %v487_v53, %v441_v61 }
 0x2c2   : > { %v740_v54 = vpop.f32.mrf.mxu1 }
 0x2c4   : > { %v490_v55 = vpop.f32.mrf.mxu1 }
 0x2c5   : > { %v495_v63 = vadd.f32 %v490_v55, %v442_v60 }
 0x2c6   : > { %v741_v56 = vpop.f32.mrf.mxu1 }
 0x318   : > { %v512_v59 = vpop.permute.xlu0 %511 }
 0x319   : > { %v519_v1 = vmul.f32 %v512_v59, %v494_v62 }
 0x31c   : > { %v517_v0 = vpop.permute.xlu0 %516 }
 0x31d   : > { %v520_v2 = vmul.f32 %v517_v0, %v495_v63  ;;  %537 = sbr.rel (!%p899_p3) target bundleno = 810 (0x32a), region = 48 }
 0x31f   : > { %v724_v3 = vpack.c.bf16 %v520_v2, %v519_v1 }
 0x321   : > { %725 = vst [vmem:[%s253_s19] sm:$0xff] %v724_v3  }
 0x328   : > { %v559_v4 = vld [vmem:[%s253_s19] sm:$0xf]  ;;  %v561_v5 = vld [vmem:[%s253_s19 + $0x4] sm:$0xf] }
 0x329   : > { %560 = vst [vmem:[%s542_s24] sm:$0xf] %v559_v4  ;;  %562 = vst [vmem:[%s542_s24 + $0x8] sm:$0xf] %v561_v5 }
 0x32a PF: > { %s13_s16 = sadd.s32 1, %s841_s16   ;;  %s963_s12 = smov %s829_s13 }
 0x32b   : > { %p10_p11 = scmp.ge.s32.totalorder %s13_s16, 4   ;;  %s964_s13 = smov %s908_s22 }
 0x32c   : > { %s965_s14 = smov %s837_s15  ;;  %s966_s15 = smov %s968_s18 }
 0x32d   :  { %12 = sbr.rel (!%p10_p11) target bundleno = 3 (0x3), region = 121 }

// kernel: _lambda_.17
= control target key start
LH: loop header
LB: loop body
LE: loop exit
PB: predicated region body
PF: predicated region fallthrough
CT: control target
= control target key end

     0   :  { %9 = vsyncpa [#allocation4], 0  ;;  %s1109_s0 = inlined_call_operand.vmem [shape: bf16[16,256], index: 0, kind: input, shape index: {}]   ;;  %s1110_s1 = inlined_call_operand.hbm [shape: bf16[256,768], index: 1, kind: input, shape index: {}]   ;;  %s1111_s2 = inlined_call_operand.vmem [shape: f32[16,128], index: 2, kind: input, shape index: {}]   ;;  %s1112_s3 = inlined_call_operand.vmem [shape: f32[16,128], index: 3, kind: input, shape index: {}]   ;;  %s1113_s4 = inlined_call_operand.vmem [shape: bf16[6,16,128], index: 4, kind: output, shape index: {}]  }
   0x1   :  { %11 = vsyncpa [#allocation4 + $0x1], 0  ;;  %s973_s15 = smov 0   ;;  %s975_s16 = smov 0  }
   0x2   :  { %s977_s17 = smov 0   ;;  %s979_s18 = smov 0  }
   0x3   :  { %s981_s19 = smov 0   ;;  %s983_s20 = smov 0  }
   0x4 LB: > { %s720_s21 = sadd.s32 4294967295, %s941_s20   ;;  %s32_s22 = sadd.s32 1, %s937_s19  ;;  %s941_s20 = sphi %s983_s20, %s17_s20   ;;  %s937_s19 = sphi %s981_s19, %s1121_s19   ;;  %s933_s18 = sphi %s979_s18, %s1120_s18   ;;  %s929_s17 = sphi %s977_s17, %s1119_s17   ;;  %s925_s16 = sphi %s975_s16, %s1118_s16   ;;  %s921_s15 = sphi %s973_s15, %s1117_s15  }
   0x5   : > { %p34_p0 = scmp.ge.s32.totalorder %s32_s22, 6  ;;  %s73_s23 = sadd.s32 1, %s929_s17 }
   0x6   : > { %p80_p1 = scmp.ne.s32.totalorder %s929_s17, %s925_s16  ;;  %p81_p2 = scmp.eq.s32.totalorder %s941_s20, 0 }
   0x7   : > { %s1123_s22 = smov (%p34_p0, %s32_s22), 0  ;;  %p86_p4 = scmp.ne.s32.totalorder %s925_s16, %s921_s15 }
   0x8   : > { %p1009_p3 = por %p81_p2, %p80_p1  ;;  %s69_s25 = ssub.s32 %s937_s19, %s1123_s22 }
   0x9   : > { %p87_p5 = scmp.eq.s32.totalorder %s720_s21, 0  ;;  %p71_p6 = scmp.eq.s32.totalorder %s69_s25, 0 }
   0xa   : > { %p791_p8 = scmp.lt.s32.totalorder %s941_s20, 6  ;;  %s223_s28 = sand.u32 1, %s929_s17  }
   0xb   : > { %p1016_p7 = por %p87_p5, %p86_p4  ;;  %s728_s29 = sshll.u32 %s937_s19, 6 }
   0xc   : > { %s1022_s27 = scalar_select %p71_p6, %s929_s17, %s73_s23  }
   0xd   : > { %s727_s30 = sshll.u32 %s223_s28, 7  ;;  %s235_s7 = scalar_lea.hbm %s1110_s1, %s728_s29 }
   0xe   : > { %s227_s8 = scalar_lea.vmem [#allocation3], %s727_s30  ;;  %p1031_p9 = pnand %p791_p8, %p1009_p3 }
   0xf   : > { %s236_s9 = sshll.u32 %s227_s8, 4  ;;  %p729_p10 = scmp.ge.s32.totalorder %s941_s20, 1  ;;  %s237_s9 = int_to_ptr.vmem [resolvable:$true] %s236_s9 }
  0x10   : > { %s224_s11 = scalar_lea.sflag [#allocation4], %s223_s28  ;;  %p865_p11 = pneg %p1031_p9 }
  0x11   : > { %s876_s12 = scalar_lea.vmem %s237_s9, 2048  ;;  %s943_s13 = smov [#allocation3]  }
  0x12   : > { %p877_p12 = scmp.ne.s32.totalorder %s237_s9, %s876_s12  ;;  %s881_s14 = sshll.u32 %s943_s13, 4  ;;  %s882_s14 = int_to_ptr.vmem [resolvable:$false] %s881_s14 }
  0x13   : > { %s883_s15 = scalar_lea.vmem %s882_s14, 4096  ;;  %p884_p1 = scmp.lt.s32.totalorder %s237_s9, %s882_s14 }
  0x14   : > { %p879_p13 = pnand %p877_p12, %p865_p11  ;;  %p885_p2 = scmp.lt.s32.totalorder %s883_s15, %s876_s12 }
  0x16   : > { %p880_p0 = pneg %p879_p13  ;;  %p886_p3 = por %p885_p2, %p884_p1 }
  0x18   : > { %p887_p4 = pnand %p886_p3, %p880_p0 }
  0x1a   : > { %890 = shalt.err (!%p887_p4)
}
  0x1b   : > { %s944_s21 = smov 384   ;;  %s945_s23 = smov 64  }
  0x1c   : > { %s946_s24 = smov 4   ;;  %p244_p5 = scmp.lt.s32.totalorder %s941_s20, 7 }
  0x1d   : > { %790 = dma.hbm_to_vmem [thread:$0]  (!%p1031_p9), %s235_s7, 2048, %s237_s9, %s224_s11, %s944_s21, %s945_s23, %s946_s24  }
  0x1e   : > { %p245_p6 = pnand %p729_p10, %p244_p5 }
  0x1f   : > { %s250_s25 = sand.u32 (!%p245_p6), 1, %s925_s16  }
  0x20   : > { %248 = sbr.rel (%p245_p6) target bundleno = 397 (0x18d), region = 36  ;;  %s730_s28 = sshll.u32 (!%p245_p6), %s250_s25, 7 }
  0x21   : > { %s251_s29 = scalar_lea.sflag (!%p245_p6), [#allocation4], %s250_s25  ;;  %s1044_s30 = scalar_lea.vmem (!%p245_p6), [#allocation3], %s730_s28 }
  0x25   : > { %916 = dma.done.wait (%p1016_p7), %s251_s29, 2048  }
  0x26   : > { %918 = vsyncadd (%p1016_p7), %s251_s29, 4294965248  ;;  %v844_v0 = vld [vmem:[%s1044_s30 + $0x78] sm:$0xff]   ;;  %v846_v2 = vld [vmem:[%s1044_s30 + $0x70] sm:$0xff]   ;;  %s947_s8 = smov 64   ;;  %p551_p7 = scmp.lt.s32.totalorder %s933_s18, 2 }
  0x27   : > { %v845_v1 = vld [vmem:[%s1044_s30 + $0x38] sm:$0xff]   ;;  %763 = vmatprep.subr.bf16.mxu0 %v844_v0  ;;  %v847_v3 = vld [vmem:[%s1044_s30 + $0x30] sm:$0xff]   ;;  %v848_v4 = vld [vmem:[%s1044_s30 + $0x68] sm:$0xff]   ;;  %p552_p8 = scmp.ge.s32.totalorder %s933_s18, 4  ;;  %p329_p9 = scmp.lt.s32.totalorder %s933_s18, 5 }
  0x28   : > { %764 = vmatpush3.bf16.msra.mxu0 %v845_v1  ;;  %v849_v5 = vld [vmem:[%s1044_s30 + $0x28] sm:$0xff]   ;;  %v850_v6 = vld [vmem:[%s1044_s30 + $0x60] sm:$0xff]   ;;  %v852_v8 = vld [vmem:[%s1044_s30 + $0x58] sm:$0xff]   ;;  %s553_s13 = scalar_select %p551_p7, 0.088388346, 1.0 }
  0x29   : > { %765 = vmatprep.subr.bf16.mxu0 %v846_v2  ;;  %v851_v7 = vld [vmem:[%s1044_s30 + $0x20] sm:$0xff]   ;;  %v853_v9 = vld [vmem:[%s1044_s30 + $0x18] sm:$0xff]   ;;  %v854_v10 = vld [vmem:[%s1044_s30 + $0x50] sm:$0xff]   ;;  %s557_s14 = scalar_select %p552_p8, 1, 0 }
  0x2a   : > { %v862_v11 = vld [vmem:[%s1109_s0 + $0x4] ss:$8 sps:$4 sm:$0xff]   ;;  %v855_v12 = vld [vmem:[%s1044_s30 + $0x10] sm:$0xff]   ;;  %v860_v17 = vld [vmem:[%s1109_s0] ss:$8 sps:$4 sm:$0xff]   ;;  %v554_v32 = vstv %s553_s13  ;;  %s1125_s18 = smov (!%p329_p9, %s933_s18), 5 }
  0x2b   : > { %519 = vmatprep.mubr.bf16.mxu0 %v862_v11  ;;  %v856_v13 = vld [vmem:[%s1044_s30 + $0x48] sm:$0xff]   ;;  %v858_v15 = vld [vmem:[%s1044_s30 + $0x40] sm:$0xff]   ;;  %v558_v34 = vstv %s557_s14  ;;  %s755_s25 = sshll.u32 %s1125_s18, 3 }
  0x2c   : > { %766 = vmatpush3.bf16.msra.mxu0 %v847_v3  ;;  %v857_v14 = vld [vmem:[%s1044_s30 + $0x8] sm:$0xff]   ;;  %v859_v16 = vld [vmem:[%s1044_s30] sm:$0xff]   ;;  %vm559_vm0 = vcmp.eq.s32.totalorder %v558_v34, 1  ;;  %s336_s30 = scalar_lea.vmem %s1113_s4, %s755_s25 }
  0x2d   : > { %767 = vmatprep.subr.bf16.mxu0 %v848_v4  ;;  %v537_v24 = vld [vmem:[%s1111_s2] sm:$0xff]  ;;  %v538_v29 = vld [vmem:[%s1111_s2 + $0x8] sm:$0xff] }
  0x2e   : > { %v545_v25 = vld [vmem:[%s1112_s3] sm:$0xff]  ;;  %v546_v30 = vld [vmem:[%s1112_s3 + $0x8] sm:$0xff] }
  0x30   : > { %768 = vmatpush3.bf16.msra.mxu0 %v849_v5 }
  0x31   : > { %769 = vmatprep.subr.bf16.mxu0 %v850_v6 }
  0x34   : > { %770 = vmatpush3.bf16.msra.mxu0 %v851_v7 }
  0x35   : > { %771 = vmatprep.subr.bf16.mxu0 %v852_v8 }
  0x38   : > { %772 = vmatpush3.bf16.msra.mxu0 %v853_v9 }
  0x39   : > { %773 = vmatprep.subr.bf16.mxu0 %v854_v10 }
  0x3c   : > { %774 = vmatpush3.bf16.msra.mxu0 %v855_v12 }
  0x3d   : > { %775 = vmatprep.subr.bf16.mxu0 %v856_v13 }
  0x40   : > { %776 = vmatpush3.bf16.msra.mxu0 %v857_v14 }
  0x41   : > { %777 = vmatprep.subr.bf16.mxu0 %v858_v15 }
  0x44   : > { %778 = vmatpush3.bf16.msra.mxu0 %v859_v16 }
  0x47   : > { %520 = vmatmul.mubr.bf16.vlgmr.msra.gmra.mxu0 %v860_v17 }
 0x107   : > { %v779_v18 = vpop.f32.mrf.mxu0 }
 0x109   : > { %v780_v19 = vpop.f32.mrf.mxu0 }
 0x10a   : > { %v781_v20 = vadd.f32 %v780_v19, %v779_v18 }
 0x10b   : > { %v782_v21 = vpop.f32.mrf.mxu0 }
 0x10c   : > { %541 = vrot.lane.b32.xlu0 %v781_v20, %s947_s8  ;;  %v539_v27 = vmul.f32 %v781_v20, %v537_v24 }
 0x10d   : > { %v783_v22 = vpop.f32.mrf.mxu0 }
 0x10e   : > { %v784_v23 = vadd.f32 %v783_v22, %v782_v21 }
 0x110   : > { %543 = vrot.lane.b32.xlu0 %v784_v23, %s947_s8  ;;  %v540_v35 = vmul.f32 %v784_v23, %v538_v29 }
 0x17e   : > { %v542_v26 = vpop.permute.xlu0 %541 }
 0x17f   : > { %v547_v28 = vmul.f32 %v545_v25, %v542_v26 }
 0x181   : > { %v549_v31 = vadd.f32 %v547_v28, %v539_v27 }
 0x182   : > { %v544_v33 = vpop.permute.xlu0 %543 }
 0x183   : > { %v548_v36 = vmul.f32 %v546_v30, %v544_v33  ;;  %v555_v37 = vmul.f32 %v554_v32, %v549_v31 }
 0x185   : > { %v550_v38 = vadd.f32 %v548_v36, %v540_v35  ;;  %v560_v40 = vsel %vm559_vm0, %v781_v20, %v555_v37 }
 0x187   : > { %v556_v39 = vmul.f32 %v554_v32, %v550_v38 }
 0x189   : > { %v561_v41 = vsel %vm559_vm0, %v784_v23, %v556_v39 }
 0x18a   : > { %v761_v42 = vpack.c.bf16 %v561_v41, %v560_v40 }
 0x18c   : > { %762 = vst [vmem:[%s336_s30] sm:$0xff] %v761_v42  }
 0x18d PF: > { %s17_s20 = sadd.s32 1, %s941_s20   ;;  %s1117_s15 = smov %s925_s16 }
 0x18e   : > { %p14_p10 = scmp.ge.s32.totalorder %s17_s20, 8   ;;  %s1118_s16 = smov %s929_s17 }
 0x18f   : > { %s1119_s17 = smov %s1022_s27  ;;  %s1120_s18 = smov %s937_s19 }
 0x190   : > { %s1121_s19 = smov %s1123_s22  ;;  %16 = sbr.rel (!%p14_p10) target bundleno = 4 (0x4), region = 93 }
 0x195   :  { %602 = vsyncpa [#allocation4], 1 }
 0x196   :  { %604 = vsyncpa [#allocation4 + $0x1], 1 }

// kernel: _lambda_.19
= control target key start
LH: loop header
LB: loop body
LE: loop exit
PB: predicated region body
PF: predicated region fallthrough
CT: control target
= control target key end

     0   :  { %s515_s1 = inlined_call_operand.vmem [shape: bf16[256,256], index: 1, kind: input, shape index: {}]   ;;  %s516_s0 = inlined_call_operand.vmem [shape: bf16[16,256], index: 0, kind: input, shape index: {}]   ;;  %s517_s2 = inlined_call_operand.vmem [shape: bf16[16,256], index: 2, kind: output, shape index: {}]  }
   0x1   :  { %v341_v0 = vld [vmem:[%s515_s1 + $0x74] ss:$8 sps:$4 sm:$0xff]   ;;  %v343_v1 = vld [vmem:[%s515_s1 + $0x70] ss:$8 sps:$4 sm:$0xff]   ;;  %v344_v2 = vld [vmem:[%s515_s1 + $0x64] ss:$8 sps:$4 sm:$0xff]  }
   0x2   :  { %227 = vmatprep.subr.bf16.mxu0 %v341_v0  ;;  %v346_v3 = vld [vmem:[%s515_s1 + $0x60] ss:$8 sps:$4 sm:$0xff]   ;;  %v347_v4 = vld [vmem:[%s515_s1 + $0x54] ss:$8 sps:$4 sm:$0xff]   ;;  %v349_v5 = vld [vmem:[%s515_s1 + $0x50] ss:$8 sps:$4 sm:$0xff]  }
   0x3   :  { %228 = vmatpush1.bf16.msra.mxu0 %v343_v1  ;;  %v350_v6 = vld [vmem:[%s515_s1 + $0x44] ss:$8 sps:$4 sm:$0xff]   ;;  %v352_v7 = vld [vmem:[%s515_s1 + $0x40] ss:$8 sps:$4 sm:$0xff]   ;;  %v353_v8 = vld [vmem:[%s515_s1 + $0x34] ss:$8 sps:$4 sm:$0xff]  }
   0x4   :  { %229 = vmatprep.subr.bf16.mxu0 %v344_v2  ;;  %v355_v9 = vld [vmem:[%s515_s1 + $0x30] ss:$8 sps:$4 sm:$0xff]   ;;  %v356_v10 = vld [vmem:[%s515_s1 + $0x24] ss:$8 sps:$4 sm:$0xff]   ;;  %v358_v11 = vld [vmem:[%s515_s1 + $0x20] ss:$8 sps:$4 sm:$0xff]  }
   0x5   :  { %v359_v12 = vld [vmem:[%s515_s1 + $0x14] ss:$8 sps:$4 sm:$0xff]   ;;  %v391_v13 = vld [vmem:[%s516_s0 + $0x4] ss:$8 sps:$4 sm:$0xff]   ;;  %v361_v14 = vld [vmem:[%s515_s1 + $0x10] ss:$8 sps:$4 sm:$0xff]  }
   0x6   :  { %v362_v15 = vld [vmem:[%s515_s1 + $0x4] ss:$8 sps:$4 sm:$0xff]   ;;  %259 = vmatprep.mubr.bf16.mxu0 %v391_v13  ;;  %v364_v16 = vld [vmem:[%s515_s1] ss:$8 sps:$4 sm:$0xff]   ;;  %v365_v17 = vld [vmem:[%s515_s1 + $0xf4] ss:$8 sps:$4 sm:$0xff]  }
   0x7   :  { %230 = vmatpush1.bf16.msra.mxu0 %v346_v3  ;;  %v367_v18 = vld [vmem:[%s515_s1 + $0xf0] ss:$8 sps:$4 sm:$0xff]   ;;  %v368_v19 = vld [vmem:[%s515_s1 + $0xe4] ss:$8 sps:$4 sm:$0xff]   ;;  %v370_v20 = vld [vmem:[%s515_s1 + $0xe0] ss:$8 sps:$4 sm:$0xff]  }
   0x8   :  { %231 = vmatprep.subr.bf16.mxu0 %v347_v4  ;;  %v371_v21 = vld [vmem:[%s515_s1 + $0xd4] ss:$8 sps:$4 sm:$0xff]   ;;  %v373_v22 = vld [vmem:[%s515_s1 + $0xd0] ss:$8 sps:$4 sm:$0xff]   ;;  %v374_v23 = vld [vmem:[%s515_s1 + $0xc4] ss:$8 sps:$4 sm:$0xff]  }
   0x9   :  { %v376_v24 = vld [vmem:[%s515_s1 + $0xc0] ss:$8 sps:$4 sm:$0xff]   ;;  %v377_v25 = vld [vmem:[%s515_s1 + $0xb4] ss:$8 sps:$4 sm:$0xff]   ;;  %v379_v26 = vld [vmem:[%s515_s1 + $0xb0] ss:$8 sps:$4 sm:$0xff]  }
   0xa   :  { %v380_v27 = vld [vmem:[%s515_s1 + $0xa4] ss:$8 sps:$4 sm:$0xff]   ;;  %v382_v28 = vld [vmem:[%s515_s1 + $0xa0] ss:$8 sps:$4 sm:$0xff]   ;;  %v383_v29 = vld [vmem:[%s515_s1 + $0x94] ss:$8 sps:$4 sm:$0xff]  }
   0xb   :  { %232 = vmatpush1.bf16.msra.mxu0 %v349_v5  ;;  %v385_v30 = vld [vmem:[%s515_s1 + $0x90] ss:$8 sps:$4 sm:$0xff]   ;;  %v386_v31 = vld [vmem:[%s515_s1 + $0x84] ss:$8 sps:$4 sm:$0xff]   ;;  %v388_v32 = vld [vmem:[%s515_s1 + $0x80] ss:$8 sps:$4 sm:$0xff]  }
   0xc   :  { %233 = vmatprep.subr.bf16.mxu0 %v350_v6  ;;  %v389_v33 = vld [vmem:[%s516_s0] ss:$8 sps:$4 sm:$0xff]  }
   0xf   :  { %234 = vmatpush1.bf16.msra.mxu0 %v352_v7 }
  0x10   :  { %235 = vmatprep.subr.bf16.mxu0 %v353_v8 }
  0x13   :  { %236 = vmatpush1.bf16.msra.mxu0 %v355_v9 }
  0x14   :  { %237 = vmatprep.subr.bf16.mxu0 %v356_v10 }
  0x17   :  { %238 = vmatpush1.bf16.msra.mxu0 %v358_v11 }
  0x18   :  { %239 = vmatprep.subr.bf16.mxu0 %v359_v12 }
  0x1b   :  { %240 = vmatpush1.bf16.msra.mxu0 %v361_v14 }
  0x1c   :  { %241 = vmatprep.subr.bf16.mxu0 %v362_v15 }
  0x1f   :  { %242 = vmatpush1.bf16.msra.mxu0 %v364_v16 }
  0x20   :  { %243 = vmatprep.subr.bf16.mxu0 %v365_v17 }
  0x23   :  { %244 = vmatpush2.bf16.msra.mxu0 %v367_v18 }
  0x24   :  { %245 = vmatprep.subr.bf16.mxu0 %v368_v19 }
  0x27   :  { %246 = vmatpush2.bf16.msra.mxu0 %v370_v20 }
  0x28   :  { %247 = vmatprep.subr.bf16.mxu0 %v371_v21 }
  0x2b   :  { %248 = vmatpush2.bf16.msra.mxu0 %v373_v22 }
  0x2c   :  { %249 = vmatprep.subr.bf16.mxu0 %v374_v23 }
  0x2f   :  { %250 = vmatpush2.bf16.msra.mxu0 %v376_v24 }
  0x30   :  { %251 = vmatprep.subr.bf16.mxu0 %v377_v25 }
  0x33   :  { %252 = vmatpush2.bf16.msra.mxu0 %v379_v26 }
  0x34   :  { %253 = vmatprep.subr.bf16.mxu0 %v380_v27 }
  0x37   :  { %254 = vmatpush2.bf16.msra.mxu0 %v382_v28 }
  0x38   :  { %255 = vmatprep.subr.bf16.mxu0 %v383_v29 }
  0x3b   :  { %256 = vmatpush2.bf16.msra.mxu0 %v385_v30 }
  0x3c   :  { %257 = vmatprep.subr.bf16.mxu0 %v386_v31 }
  0x3f   :  { %258 = vmatpush2.bf16.msra.mxu0 %v388_v32 }
  0x42   :  { %260 = vmatmul.mubr.bf16.vlgmr.msra.gmra.mxu0 %v389_v33 }
 0x102   :  { %v261_v34 = vpop.f32.mrf.mxu0 }
 0x104   :  { %v263_v35 = vpop.f32.mrf.mxu0 }
 0x105   :  { %v339_v36 = vpack.c.bf16 %v263_v35, %v261_v34 }
 0x106   :  { %v265_v37 = vpop.f32.mrf.mxu0 }
 0x107   :  { %297 = vst [vmem:[%s517_s2] sm:$0xff] %v339_v36 }
 0x108   :  { %v267_v38 = vpop.f32.mrf.mxu0 }
 0x109   :  { %v340_v39 = vpack.c.bf16 %v267_v38, %v265_v37 }
 0x10b   :  { %298 = vst [vmem:[%s517_s2 + $0x8] sm:$0xff] %v340_v39 }

// kernel: _lambda_.20
= control target key start
LH: loop header
LB: loop body
LE: loop exit
PB: predicated region body
PF: predicated region fallthrough
CT: control target
= control target key end

     0   :  { %v69_v28 = vlaneseq  ;;  %s169_s0 = inlined_call_operand.vmem [shape: bf16[16,256], index: 0, kind: input, shape index: {}]   ;;  %s170_s1 = inlined_call_operand.vmem [shape: bf16[16,256], index: 1, kind: input, shape index: {}]   ;;  %s171_s4 = inlined_call_operand.vmem [shape: bf16[16,256], index: 4, kind: output, shape index: {1}]   ;;  %s172_s2 = inlined_call_operand.vmem [shape: f32[1,256], index: 2, kind: input, shape index: {}]   ;;  %s173_s3 = inlined_call_operand.vmem [shape: bf16[16,256], index: 3, kind: output, shape index: {0}]  }
   0x1   :  { %v16_v0 = vld [vmem:[%s169_s0] sm:$0xff]  ;;  %v17_v2 = vld [vmem:[%s169_s0 + $0x8] sm:$0xff] }
   0x2   :  { %v22_v1 = vld [vmem:[%s170_s1] sm:$0xff]  ;;  %v18_v3 = vunpack.c.l.bf16 %v16_v0  ;;  %v19_v4 = vunpack.c.h.bf16 %v16_v0  ;;  %v23_v7 = vld [vmem:[%s170_s1 + $0x8] sm:$0xff]  ;;  %v20_v8 = vunpack.c.l.bf16 %v17_v2  ;;  %v21_v9 = vunpack.c.h.bf16 %v17_v2 }
   0x3   :  { %v24_v5 = vunpack.c.l.bf16 %v22_v1  ;;  %v25_v6 = vunpack.c.h.bf16 %v22_v1  ;;  %v26_v10 = vunpack.c.l.bf16 %v23_v7  ;;  %v27_v11 = vunpack.c.h.bf16 %v23_v7  ;;  %v67_v34 = vld [vmem:[%s172_s2] sm:$0x3] }
   0x4   :  { %v70_v31 = vshrl.u32 %v69_v28, 7 }
   0x5   :  { %v28_v12 = vadd.f32 %v24_v5, %v18_v3  ;;  %v29_v13 = vadd.f32 %v25_v6, %v19_v4  ;;  %v30_v14 = vadd.f32 %v26_v10, %v20_v8  ;;  %v31_v15 = vadd.f32 %v27_v11, %v21_v9 }
   0x6   :  { %v71_v32 = vsub.s32 0, %v70_v31  ;;  %v75_v33 = vsub.s32 1, %v70_v31 }
   0x7   :  { %v46_v16 = vmul.f32 %v28_v12, %v28_v12  ;;  %v47_v17 = vmul.f32 %v29_v13, %v29_v13  ;;  %v109_v18 = vpack.c.bf16 %v29_v13, %v28_v12  ;;  %v110_v19 = vpack.c.bf16 %v31_v15, %v30_v14 }
   0x8   :  { %v48_v20 = vmul.f32 %v30_v14, %v30_v14  ;;  %v49_v21 = vmul.f32 %v31_v15, %v31_v15  ;;  %v72_v35 = vrot.slane %v67_v34, %v71_v32  ;;  %v76_v36 = vrot.slane %v67_v34, %v75_v33 }
   0x9   :  { %v50_v22 = vadd.f32 %v47_v17, %v46_v16  ;;  %44 = vst [vmem:[%s171_s4] sm:$0xff] %v109_v18  ;;  %45 = vst [vmem:[%s171_s4 + $0x8] sm:$0xff] %v110_v19 }
   0xa   :  { %v53_v23 = vadd.f32 %v49_v21, %v48_v20 }
   0xb   :  { %51 = vadd.xlane.f32.xlu0 %v50_v22 }
   0xf   :  { %54 = vadd.xlane.f32.xlu0 %v53_v23 }
  0x94   :  { %v52_v24 = vpop.xlane.xlu0 %51 }
  0x95   :  { %v57_v25 = vmul.f32 0.00390625, %v52_v24 }
  0x97   :  { %v59_v26 = vadd.f32 1e-06, %v57_v25 }
  0x98   :  { %v55_v27 = vpop.xlane.xlu0 %54 }
  0x99   :  { %113 = vrsqrt.f32 %v59_v26  ;;  %v58_v29 = vmul.f32 0.00390625, %v55_v27 }
  0x9b   :  { %v60_v30 = vadd.f32 1e-06, %v58_v29 }
  0x9d   :  { %115 = vrsqrt.f32 %v60_v30 }
  0xa6   :  { %v114_v37 = vpop.eup %113 }
  0xa7   :  { %v63_v38 = vmul.f32 %v114_v37, %v28_v12  ;;  %v64_v39 = vmul.f32 %v114_v37, %v29_v13 }
  0xa9   :  { %v79_v40 = vmul.f32 %v72_v35, %v63_v38  ;;  %v80_v41 = vmul.f32 %v76_v36, %v64_v39 }
  0xaa   :  { %v116_v42 = vpop.eup %115 }
  0xab   :  { %v111_v43 = vpack.c.bf16 %v80_v41, %v79_v40  ;;  %v65_v44 = vmul.f32 %v116_v42, %v30_v14  ;;  %v66_v45 = vmul.f32 %v116_v42, %v31_v15 }
  0xad   :  { %95 = vst [vmem:[%s173_s3] sm:$0xff] %v111_v43  ;;  %v81_v46 = vmul.f32 %v72_v35, %v65_v44  ;;  %v82_v47 = vmul.f32 %v76_v36, %v66_v45 }
  0xaf   :  { %v112_v48 = vpack.c.bf16 %v82_v47, %v81_v46 }
  0xb1   :  { %96 = vst [vmem:[%s173_s3 + $0x8] sm:$0xff] %v112_v48 }

// kernel: _lambda_.24
= control target key start
LH: loop header
LB: loop body
LE: loop exit
PB: predicated region body
PF: predicated region fallthrough
CT: control target
= control target key end

     0   :  { %s1054_s15 = smov 0   ;;  %s1056_s16 = smov 0   ;;  %s1226_s0 = inlined_call_operand.vmem [shape: bf16[16,256], index: 0, kind: input, shape index: {}]   ;;  %s1227_s1 = inlined_call_operand.vmem [shape: bf16[256,768], index: 1, kind: input, shape index: {}]   ;;  %s1228_s2 = inlined_call_operand.vmem [shape: f32[16,128], index: 2, kind: input, shape index: {}]   ;;  %s1229_s3 = inlined_call_operand.vmem [shape: f32[16,128], index: 3, kind: input, shape index: {}]   ;;  %s1230_s4 = inlined_call_operand.vmem [shape: bf16[6,16,128], index: 4, kind: output, shape index: {}]  }
   0x1   :  { %s1058_s17 = smov 0   ;;  %s1060_s18 = smov 0  }
   0x2   :  { %s1062_s19 = smov 0  }
   0x3 LB: > { %s29_s20 = sadd.s32 1, %s1022_s18  ;;  %p77_p1 = scmp.ne.s32.totalorder %s1014_s16, %s1010_s15  ;;  %s1026_s19 = sphi %s1062_s19, %s14_s19   ;;  %s1022_s18 = sphi %s1060_s18, %s1234_s18   ;;  %s1018_s17 = sphi %s1058_s17, %s1233_s17   ;;  %s1014_s16 = sphi %s1056_s16, %s1232_s16   ;;  %s1010_s15 = sphi %s1054_s15, %s1231_s15  }
   0x4   : > { %p31_p0 = scmp.ge.s32.totalorder %s29_s20, 6  ;;  %p78_p2 = scmp.eq.s32.totalorder %s1026_s19, 0 }
   0x5   : > { %s70_s22 = sadd.s32 1, %s1014_s16  ;;  %p869_p5 = scmp.ge.s32.totalorder %s1026_s19, 6 }
   0x6   : > { %s1236_s20 = smov (%p31_p0, %s29_s20), 0  ;;  %p79_p3 = por %p78_p2, %p77_p1 }
   0x7   : > { %s66_s21 = ssub.s32 %s1022_s18, %s1236_s20  ;;  %216 = sbr.rel (%p869_p5) target bundleno = 37 (0x25), region = 28 }
   0x8   : > { %p68_p4 = scmp.eq.s32.totalorder %s66_s21, 0 }
   0xa   : > { %s1089_s23 = scalar_select %p68_p4, %s1014_s16, %s70_s22  }
   0xc   : > { %219 = sbr.rel (!%p79_p3) target bundleno = 37 (0x25), region = 32  ;;  %s221_s24 = sand.u32 (%p79_p3), 1, %s1014_s16  }
   0xd   : > { %s871_s25 = sshll.u32 (%p79_p3), %s1022_s18, 2  ;;  %s870_s26 = sshll.u32 (%p79_p3), %s221_s24, 7 }
   0xe   : > { %s1097_s29 = scalar_lea.vmem (%p79_p3), %s1227_s1, %s871_s25  ;;  %s1101_s30 = scalar_lea.vmem (%p79_p3), [#allocation3], %s870_s26 }
   0xf   : > { %v245_v0 = vld [vmem:[%s1097_s29] sm:$0xf] (%p79_p3)  ;;  %v247_v1 = vld [vmem:[%s1097_s29 + $0x18] sm:$0xf] (%p79_p3)  ;;  %v249_v2 = vld [vmem:[%s1097_s29 + $0x30] sm:$0xf] (%p79_p3) }
  0x10   : > { %246 = vst [vmem:[%s1101_s30] sm:$0xf] (%p79_p3), %v245_v0  ;;  %248 = vst [vmem:[%s1101_s30 + $0x4] sm:$0xf] (%p79_p3), %v247_v1  ;;  %v251_v3 = vld [vmem:[%s1097_s29 + $0x48] sm:$0xf] (%p79_p3) }
  0x11   : > { %v253_v4 = vld [vmem:[%s1097_s29 + $0x60] sm:$0xf]  ;;  %250 = vst [vmem:[%s1101_s30 + $0x8] sm:$0xf] %v249_v2  ;;  %252 = vst [vmem:[%s1101_s30 + $0xc] sm:$0xf] %v251_v3 }
  0x12   : > { %254 = vst [vmem:[%s1101_s30 + $0x10] sm:$0xf] %v253_v4  ;;  %v255_v5 = vld [vmem:[%s1097_s29 + $0x78] sm:$0xf]  ;;  %v257_v6 = vld [vmem:[%s1097_s29 + $0x90] sm:$0xf] }
  0x13   : > { %v259_v7 = vld [vmem:[%s1097_s29 + $0xa8] sm:$0xf]  ;;  %256 = vst [vmem:[%s1101_s30 + $0x14] sm:$0xf] %v255_v5  ;;  %258 = vst [vmem:[%s1101_s30 + $0x18] sm:$0xf] %v257_v6 }
  0x14   : > { %260 = vst [vmem:[%s1101_s30 + $0x1c] sm:$0xf] %v259_v7  ;;  %v261_v8 = vld [vmem:[%s1097_s29 + $0xc0] sm:$0xf]  ;;  %v263_v9 = vld [vmem:[%s1097_s29 + $0xd8] sm:$0xf] }
  0x15   : > { %v265_v10 = vld [vmem:[%s1097_s29 + $0xf0] sm:$0xf]  ;;  %262 = vst [vmem:[%s1101_s30 + $0x20] sm:$0xf] %v261_v8  ;;  %264 = vst [vmem:[%s1101_s30 + $0x24] sm:$0xf] %v263_v9 }
  0x16   : > { %266 = vst [vmem:[%s1101_s30 + $0x28] sm:$0xf] %v265_v10  ;;  %v267_v11 = vld [vmem:[%s1097_s29 + $0x108] sm:$0xf]  ;;  %v269_v12 = vld [vmem:[%s1097_s29 + $0x120] sm:$0xf] }
  0x17   : > { %v271_v13 = vld [vmem:[%s1097_s29 + $0x138] sm:$0xf]  ;;  %268 = vst [vmem:[%s1101_s30 + $0x2c] sm:$0xf] %v267_v11  ;;  %270 = vst [vmem:[%s1101_s30 + $0x30] sm:$0xf] %v269_v12 }
  0x18   : > { %272 = vst [vmem:[%s1101_s30 + $0x34] sm:$0xf] %v271_v13  ;;  %v273_v14 = vld [vmem:[%s1097_s29 + $0x150] sm:$0xf]  ;;  %v275_v15 = vld [vmem:[%s1097_s29 + $0x168] sm:$0xf] }
  0x19   : > { %v277_v16 = vld [vmem:[%s1097_s29 + $0x180] sm:$0xf]  ;;  %274 = vst [vmem:[%s1101_s30 + $0x38] sm:$0xf] %v273_v14  ;;  %276 = vst [vmem:[%s1101_s30 + $0x3c] sm:$0xf] %v275_v15 }
  0x1a   : > { %278 = vst [vmem:[%s1101_s30 + $0x40] sm:$0xf] %v277_v16  ;;  %v279_v17 = vld [vmem:[%s1097_s29 + $0x198] sm:$0xf]  ;;  %v281_v18 = vld [vmem:[%s1097_s29 + $0x1b0] sm:$0xf] }
  0x1b   : > { %v283_v19 = vld [vmem:[%s1097_s29 + $0x1c8] sm:$0xf]  ;;  %280 = vst [vmem:[%s1101_s30 + $0x44] sm:$0xf] %v279_v17  ;;  %282 = vst [vmem:[%s1101_s30 + $0x48] sm:$0xf] %v281_v18 }
  0x1c   : > { %284 = vst [vmem:[%s1101_s30 + $0x4c] sm:$0xf] %v283_v19  ;;  %v285_v20 = vld [vmem:[%s1097_s29 + $0x1e0] sm:$0xf]  ;;  %v287_v21 = vld [vmem:[%s1097_s29 + $0x1f8] sm:$0xf] }
  0x1d   : > { %v289_v22 = vld [vmem:[%s1097_s29 + $0x210] sm:$0xf]  ;;  %286 = vst [vmem:[%s1101_s30 + $0x50] sm:$0xf] %v285_v20  ;;  %288 = vst [vmem:[%s1101_s30 + $0x54] sm:$0xf] %v287_v21 }
  0x1e   : > { %290 = vst [vmem:[%s1101_s30 + $0x58] sm:$0xf] %v289_v22  ;;  %v291_v23 = vld [vmem:[%s1097_s29 + $0x228] sm:$0xf]  ;;  %v293_v24 = vld [vmem:[%s1097_s29 + $0x240] sm:$0xf] }
  0x1f   : > { %v295_v25 = vld [vmem:[%s1097_s29 + $0x258] sm:$0xf]  ;;  %292 = vst [vmem:[%s1101_s30 + $0x5c] sm:$0xf] %v291_v23  ;;  %294 = vst [vmem:[%s1101_s30 + $0x60] sm:$0xf] %v293_v24 }
  0x20   : > { %296 = vst [vmem:[%s1101_s30 + $0x64] sm:$0xf] %v295_v25  ;;  %v297_v26 = vld [vmem:[%s1097_s29 + $0x270] sm:$0xf]  ;;  %v299_v27 = vld [vmem:[%s1097_s29 + $0x288] sm:$0xf] }
  0x21   : > { %v301_v28 = vld [vmem:[%s1097_s29 + $0x2a0] sm:$0xf]  ;;  %298 = vst [vmem:[%s1101_s30 + $0x68] sm:$0xf] %v297_v26  ;;  %300 = vst [vmem:[%s1101_s30 + $0x6c] sm:$0xf] %v299_v27 }
  0x22   : > { %302 = vst [vmem:[%s1101_s30 + $0x70] sm:$0xf] %v301_v28  ;;  %v303_v29 = vld [vmem:[%s1097_s29 + $0x2b8] sm:$0xf]  ;;  %v305_v30 = vld [vmem:[%s1097_s29 + $0x2d0] sm:$0xf] }
  0x23   : > { %v307_v31 = vld [vmem:[%s1097_s29 + $0x2e8] sm:$0xf]  ;;  %304 = vst [vmem:[%s1101_s30 + $0x74] sm:$0xf] %v303_v29  ;;  %306 = vst [vmem:[%s1101_s30 + $0x78] sm:$0xf] %v305_v30 }
  0x24   : > { %308 = vst [vmem:[%s1101_s30 + $0x7c] sm:$0xf] %v307_v31 }
  0x25 PF: > { %p872_p6 = scmp.ge.s32.totalorder %s1026_s19, 1  ;;  %p395_p7 = scmp.lt.s32.totalorder %s1026_s19, 7 }
  0x27   : > { %p396_p8 = pnand %p872_p6, %p395_p7 }
  0x28   : > { %s402_s5 = sand.u32 (!%p396_p8), 1, %s1010_s15   ;;  %s1028_s12 = smov (!%p396_p8), 64  }
  0x29   : > { %399 = sbr.rel (%p396_p8) target bundleno = 405 (0x195), region = 73  ;;  %s873_s6 = sshll.u32 (!%p396_p8), %s402_s5, 7 }
  0x2a   : > { %s1171_s9 = scalar_lea.vmem (!%p396_p8), [#allocation3], %s873_s6  ;;  %p699_p9 = scmp.lt.s32.totalorder (!%p396_p8), %s1018_s17, 2 }
  0x2b   : > { %p700_p10 = scmp.ge.s32.totalorder (!%p396_p8), %s1018_s17, 4  ;;  %p477_p11 = scmp.lt.s32.totalorder (!%p396_p8), %s1018_s17, 5 }
  0x2e   : > { %v987_v32 = vld [vmem:[%s1226_s0 + $0x4] ss:$8 sps:$4 sm:$0xff]   ;;  %v969_v33 = vld [vmem:[%s1171_s9 + $0x78] sm:$0xff]   ;;  %v971_v35 = vld [vmem:[%s1171_s9 + $0x70] sm:$0xff]   ;;  %s705_s24 = scalar_select %p700_p10, 1, 0 }
  0x2f   : > { %667 = vmatprep.mubr.bf16.mxu0 %v987_v32  ;;  %v970_v34 = vld [vmem:[%s1171_s9 + $0x38] sm:$0xff]   ;;  %906 = vmatprep.subr.bf16.mxu0 %v969_v33  ;;  %v972_v36 = vld [vmem:[%s1171_s9 + $0x30] sm:$0xff]   ;;  %v973_v37 = vld [vmem:[%s1171_s9 + $0x68] sm:$0xff]   ;;  %s701_s22 = scalar_select %p699_p9, 0.088388346, 1.0 }
  0x30   : > { %907 = vmatpush3.bf16.msra.mxu0 %v970_v34  ;;  %v974_v38 = vld [vmem:[%s1171_s9 + $0x28] sm:$0xff]   ;;  %v975_v39 = vld [vmem:[%s1171_s9 + $0x60] sm:$0xff]   ;;  %v977_v41 = vld [vmem:[%s1171_s9 + $0x58] sm:$0xff]   ;;  %s1238_s17 = smov (!%p477_p11, %s1018_s17), 5  ;;  %v706_v2 = vstv %s705_s24 }
  0x31   : > { %908 = vmatprep.subr.bf16.mxu0 %v971_v35  ;;  %v976_v40 = vld [vmem:[%s1171_s9 + $0x20] sm:$0xff]   ;;  %v978_v42 = vld [vmem:[%s1171_s9 + $0x18] sm:$0xff]   ;;  %v979_v43 = vld [vmem:[%s1171_s9 + $0x50] sm:$0xff]   ;;  %v702_v0 = vstv %s701_s22  ;;  %vm707_vm0 = vcmp.eq.s32.totalorder %v706_v2, 1  ;;  %s898_s29 = sshll.u32 %s1238_s17, 3 }
  0x32   : > { %v980_v44 = vld [vmem:[%s1171_s9 + $0x10] sm:$0xff]   ;;  %v981_v45 = vld [vmem:[%s1171_s9 + $0x48] sm:$0xff]   ;;  %v983_v47 = vld [vmem:[%s1171_s9 + $0x40] sm:$0xff]   ;;  %s484_s6 = scalar_lea.vmem %s1230_s4, %s898_s29 }
  0x33   : > { %v982_v46 = vld [vmem:[%s1171_s9 + $0x8] sm:$0xff]   ;;  %v984_v48 = vld [vmem:[%s1171_s9] sm:$0xff]  }
  0x34   : > { %909 = vmatpush3.bf16.msra.mxu0 %v972_v36  ;;  %v985_v49 = vld [vmem:[%s1226_s0] ss:$8 sps:$4 sm:$0xff]  }
  0x35   : > { %910 = vmatprep.subr.bf16.mxu0 %v973_v37  ;;  %v685_v56 = vld [vmem:[%s1228_s2] sm:$0xff]  ;;  %v686_v61 = vld [vmem:[%s1228_s2 + $0x8] sm:$0xff] }
  0x36   : > { %v693_v57 = vld [vmem:[%s1229_s3] sm:$0xff]  ;;  %v694_v62 = vld [vmem:[%s1229_s3 + $0x8] sm:$0xff] }
  0x38   : > { %911 = vmatpush3.bf16.msra.mxu0 %v974_v38 }
  0x39   : > { %912 = vmatprep.subr.bf16.mxu0 %v975_v39 }
  0x3c   : > { %913 = vmatpush3.bf16.msra.mxu0 %v976_v40 }
  0x3d   : > { %914 = vmatprep.subr.bf16.mxu0 %v977_v41 }
  0x40   : > { %915 = vmatpush3.bf16.msra.mxu0 %v978_v42 }
  0x41   : > { %916 = vmatprep.subr.bf16.mxu0 %v979_v43 }
  0x44   : > { %917 = vmatpush3.bf16.msra.mxu0 %v980_v44 }
  0x45   : > { %918 = vmatprep.subr.bf16.mxu0 %v981_v45 }
  0x48   : > { %919 = vmatpush3.bf16.msra.mxu0 %v982_v46 }
  0x49   : > { %920 = vmatprep.subr.bf16.mxu0 %v983_v47 }
  0x4c   : > { %921 = vmatpush3.bf16.msra.mxu0 %v984_v48 }
  0x4f   : > { %668 = vmatmul.mubr.bf16.vlgmr.msra.gmra.mxu0 %v985_v49 }
 0x10f   : > { %v922_v50 = vpop.f32.mrf.mxu0 }
 0x111   : > { %v923_v51 = vpop.f32.mrf.mxu0 }
 0x112   : > { %v924_v52 = vadd.f32 %v923_v51, %v922_v50 }
 0x113   : > { %v925_v53 = vpop.f32.mrf.mxu0 }
 0x114   : > { %689 = vrot.lane.b32.xlu0 %v924_v52, %s1028_s12  ;;  %v687_v59 = vmul.f32 %v924_v52, %v685_v56 }
 0x115   : > { %v926_v54 = vpop.f32.mrf.mxu0 }
 0x116   : > { %v927_v55 = vadd.f32 %v926_v54, %v925_v53 }
 0x118   : > { %691 = vrot.lane.b32.xlu0 %v927_v55, %s1028_s12  ;;  %v688_v3 = vmul.f32 %v927_v55, %v686_v61 }
 0x186   : > { %v690_v58 = vpop.permute.xlu0 %689 }
 0x187   : > { %v695_v60 = vmul.f32 %v693_v57, %v690_v58 }
 0x189   : > { %v697_v63 = vadd.f32 %v695_v60, %v687_v59 }
 0x18a   : > { %v692_v1 = vpop.permute.xlu0 %691 }
 0x18b   : > { %v696_v4 = vmul.f32 %v694_v62, %v692_v1  ;;  %v703_v5 = vmul.f32 %v702_v0, %v697_v63 }
 0x18d   : > { %v698_v6 = vadd.f32 %v696_v4, %v688_v3  ;;  %v708_v8 = vsel %vm707_vm0, %v924_v52, %v703_v5 }
 0x18f   : > { %v704_v7 = vmul.f32 %v702_v0, %v698_v6 }
 0x191   : > { %v709_v9 = vsel %vm707_vm0, %v927_v55, %v704_v7 }
 0x192   : > { %v904_v10 = vpack.c.bf16 %v709_v9, %v708_v8 }
 0x194   : > { %905 = vst [vmem:[%s484_s6] sm:$0xff] %v904_v10  }
 0x195 PF: > { %s14_s19 = sadd.s32 1, %s1026_s19   ;;  %s1231_s15 = smov %s1014_s16 }
 0x196   : > { %p11_p12 = scmp.ge.s32.totalorder %s14_s19, 8   ;;  %s1232_s16 = smov %s1089_s23 }
 0x197   : > { %s1233_s17 = smov %s1022_s18  ;;  %s1234_s18 = smov %s1236_s20 }
 0x198   :  { %13 = sbr.rel (!%p11_p12) target bundleno = 3 (0x3), region = 129 }

// kernel: _lambda_.22
= control target key start
LH: loop header
LB: loop body
LE: loop exit
PB: predicated region body
PF: predicated region fallthrough
CT: control target
= control target key end

     0   :  { %s949_s1 = inlined_call_operand.vmem [shape: bf16[512,256], index: 1, kind: input, shape index: {}]   ;;  %s950_s0 = inlined_call_operand.vmem [shape: bf16[16,512], index: 0, kind: input, shape index: {}]   ;;  %s951_s2 = inlined_call_operand.vmem [shape: bf16[16,256], index: 2, kind: output, shape index: {}]  }
   0x1   :  { %v622_v0 = vld [vmem:[%s949_s1 + $0x74] ss:$8 sps:$4 sm:$0xff]   ;;  %v626_v2 = vld [vmem:[%s949_s1 + $0x70] ss:$8 sps:$4 sm:$0xff]   ;;  %v628_v4 = vld [vmem:[%s949_s1 + $0x64] ss:$8 sps:$4 sm:$0xff]  }
   0x2   :  { %v624_v1 = vld [vmem:[%s949_s1 + $0x174] ss:$8 sps:$4 sm:$0xff]   ;;  %431 = vmatprep.subr.bf16.mxu0 %v622_v0  ;;  %v627_v3 = vld [vmem:[%s949_s1 + $0x170] ss:$8 sps:$4 sm:$0xff]   ;;  %v630_v5 = vld [vmem:[%s949_s1 + $0x164] ss:$8 sps:$4 sm:$0xff]  }
   0x3   :  { %474 = vmatprep.subr.bf16.mxu1 %v624_v1  ;;  %432 = vmatpush1.bf16.msra.mxu0 %v626_v2  ;;  %v632_v6 = vld [vmem:[%s949_s1 + $0x60] ss:$8 sps:$4 sm:$0xff]   ;;  %v634_v8 = vld [vmem:[%s949_s1 + $0x54] ss:$8 sps:$4 sm:$0xff]   ;;  %v638_v10 = vld [vmem:[%s949_s1 + $0x50] ss:$8 sps:$4 sm:$0xff]  }
   0x4   :  { %475 = vmatpush1.bf16.msra.mxu1 %v627_v3  ;;  %433 = vmatprep.subr.bf16.mxu0 %v628_v4  ;;  %v633_v7 = vld [vmem:[%s949_s1 + $0x160] ss:$8 sps:$4 sm:$0xff]   ;;  %v636_v9 = vld [vmem:[%s949_s1 + $0x154] ss:$8 sps:$4 sm:$0xff]   ;;  %v639_v11 = vld [vmem:[%s949_s1 + $0x150] ss:$8 sps:$4 sm:$0xff]  }
   0x5   :  { %476 = vmatprep.subr.bf16.mxu1 %v630_v5  ;;  %v640_v12 = vld [vmem:[%s949_s1 + $0x44] ss:$8 sps:$4 sm:$0xff]   ;;  %v644_v14 = vld [vmem:[%s949_s1 + $0x40] ss:$8 sps:$4 sm:$0xff]   ;;  %v646_v16 = vld [vmem:[%s949_s1 + $0x34] ss:$8 sps:$4 sm:$0xff]  }
   0x6   :  { %v642_v13 = vld [vmem:[%s949_s1 + $0x144] ss:$8 sps:$4 sm:$0xff]   ;;  %v645_v15 = vld [vmem:[%s949_s1 + $0x140] ss:$8 sps:$4 sm:$0xff]   ;;  %v648_v17 = vld [vmem:[%s949_s1 + $0x134] ss:$8 sps:$4 sm:$0xff]  }
   0x7   :  { %434 = vmatpush1.bf16.msra.mxu0 %v632_v6  ;;  %v650_v18 = vld [vmem:[%s949_s1 + $0x30] ss:$8 sps:$4 sm:$0xff]   ;;  %v652_v20 = vld [vmem:[%s949_s1 + $0x24] ss:$8 sps:$4 sm:$0xff]   ;;  %v656_v22 = vld [vmem:[%s949_s1 + $0x20] ss:$8 sps:$4 sm:$0xff]  }
   0x8   :  { %477 = vmatpush1.bf16.msra.mxu1 %v633_v7  ;;  %435 = vmatprep.subr.bf16.mxu0 %v634_v8  ;;  %v651_v19 = vld [vmem:[%s949_s1 + $0x130] ss:$8 sps:$4 sm:$0xff]   ;;  %v654_v21 = vld [vmem:[%s949_s1 + $0x124] ss:$8 sps:$4 sm:$0xff]   ;;  %v657_v23 = vld [vmem:[%s949_s1 + $0x120] ss:$8 sps:$4 sm:$0xff]  }
   0x9   :  { %478 = vmatprep.subr.bf16.mxu1 %v636_v9  ;;  %v658_v24 = vld [vmem:[%s949_s1 + $0x14] ss:$8 sps:$4 sm:$0xff]   ;;  %v662_v26 = vld [vmem:[%s949_s1 + $0x10] ss:$8 sps:$4 sm:$0xff]   ;;  %v664_v28 = vld [vmem:[%s949_s1 + $0x4] ss:$8 sps:$4 sm:$0xff]  }
   0xa   :  { %v660_v25 = vld [vmem:[%s949_s1 + $0x114] ss:$8 sps:$4 sm:$0xff]   ;;  %v663_v27 = vld [vmem:[%s949_s1 + $0x110] ss:$8 sps:$4 sm:$0xff]   ;;  %v666_v29 = vld [vmem:[%s949_s1 + $0x104] ss:$8 sps:$4 sm:$0xff]  }
   0xb   :  { %436 = vmatpush1.bf16.msra.mxu0 %v638_v10  ;;  %v668_v30 = vld [vmem:[%s949_s1] ss:$8 sps:$4 sm:$0xff]   ;;  %v670_v32 = vld [vmem:[%s949_s1 + $0xf4] ss:$8 sps:$4 sm:$0xff]   ;;  %v674_v34 = vld [vmem:[%s949_s1 + $0xf0] ss:$8 sps:$4 sm:$0xff]  }
   0xc   :  { %479 = vmatpush1.bf16.msra.mxu1 %v639_v11  ;;  %437 = vmatprep.subr.bf16.mxu0 %v640_v12  ;;  %v669_v31 = vld [vmem:[%s949_s1 + $0x100] ss:$8 sps:$4 sm:$0xff]   ;;  %v672_v33 = vld [vmem:[%s949_s1 + $0x1f4] ss:$8 sps:$4 sm:$0xff]   ;;  %v675_v35 = vld [vmem:[%s949_s1 + $0x1f0] ss:$8 sps:$4 sm:$0xff]  }
   0xd   :  { %480 = vmatprep.subr.bf16.mxu1 %v642_v13  ;;  %v676_v36 = vld [vmem:[%s949_s1 + $0xe4] ss:$8 sps:$4 sm:$0xff]   ;;  %v680_v38 = vld [vmem:[%s949_s1 + $0xe0] ss:$8 sps:$4 sm:$0xff]   ;;  %v682_v40 = vld [vmem:[%s949_s1 + $0xd4] ss:$8 sps:$4 sm:$0xff]  }
   0xe   :  { %v678_v37 = vld [vmem:[%s949_s1 + $0x1e4] ss:$8 sps:$4 sm:$0xff]   ;;  %v681_v39 = vld [vmem:[%s949_s1 + $0x1e0] ss:$8 sps:$4 sm:$0xff]   ;;  %v684_v41 = vld [vmem:[%s949_s1 + $0x1d4] ss:$8 sps:$4 sm:$0xff]  }
   0xf   :  { %438 = vmatpush1.bf16.msra.mxu0 %v644_v14  ;;  %v686_v42 = vld [vmem:[%s949_s1 + $0xd0] ss:$8 sps:$4 sm:$0xff]   ;;  %v688_v44 = vld [vmem:[%s949_s1 + $0xc4] ss:$8 sps:$4 sm:$0xff]   ;;  %v692_v46 = vld [vmem:[%s949_s1 + $0xc0] ss:$8 sps:$4 sm:$0xff]  }
  0x10   :  { %481 = vmatpush1.bf16.msra.mxu1 %v645_v15  ;;  %439 = vmatprep.subr.bf16.mxu0 %v646_v16  ;;  %v687_v43 = vld [vmem:[%s949_s1 + $0x1d0] ss:$8 sps:$4 sm:$0xff]   ;;  %v690_v45 = vld [vmem:[%s949_s1 + $0x1c4] ss:$8 sps:$4 sm:$0xff]   ;;  %v693_v48 = vld [vmem:[%s949_s1 + $0x1c0] ss:$8 sps:$4 sm:$0xff]  }
  0x11   :  { %482 = vmatprep.subr.bf16.mxu1 %v648_v17  ;;  %v720_v47 = vld [vmem:[%s950_s0 + $0x4] ss:$16 sps:$4 sm:$0xff]   ;;  %v723_v51 = vld [vmem:[%s950_s0 + $0xc] ss:$16 sps:$4 sm:$0xff]   ;;  %v698_v52 = vld [vmem:[%s949_s1 + $0xb0] ss:$8 sps:$4 sm:$0xff]  }
  0x12   :  { %v694_v49 = vld [vmem:[%s949_s1 + $0xb4] ss:$8 sps:$4 sm:$0xff]   ;;  %463 = vmatprep.mubr.bf16.mxu0 %v720_v47  ;;  %506 = vmatprep.mubr.bf16.mxu1 %v723_v51  ;;  %v699_v53 = vld [vmem:[%s949_s1 + $0x1b0] ss:$8 sps:$4 sm:$0xff]   ;;  %v700_v54 = vld [vmem:[%s949_s1 + $0xa4] ss:$8 sps:$4 sm:$0xff]  }
  0x13   :  { %440 = vmatpush1.bf16.msra.mxu0 %v650_v18  ;;  %v696_v50 = vld [vmem:[%s949_s1 + $0x1b4] ss:$8 sps:$4 sm:$0xff]   ;;  %v702_v55 = vld [vmem:[%s949_s1 + $0x1a4] ss:$8 sps:$4 sm:$0xff]   ;;  %v704_v56 = vld [vmem:[%s949_s1 + $0xa0] ss:$8 sps:$4 sm:$0xff]  }
  0x14   :  { %483 = vmatpush1.bf16.msra.mxu1 %v651_v19  ;;  %441 = vmatprep.subr.bf16.mxu0 %v652_v20  ;;  %v705_v57 = vld [vmem:[%s949_s1 + $0x1a0] ss:$8 sps:$4 sm:$0xff]   ;;  %v706_v58 = vld [vmem:[%s949_s1 + $0x94] ss:$8 sps:$4 sm:$0xff]   ;;  %v710_v60 = vld [vmem:[%s949_s1 + $0x90] ss:$8 sps:$4 sm:$0xff]  }
  0x15   :  { %484 = vmatprep.subr.bf16.mxu1 %v654_v21  ;;  %v708_v59 = vld [vmem:[%s949_s1 + $0x194] ss:$8 sps:$4 sm:$0xff]   ;;  %v711_v61 = vld [vmem:[%s949_s1 + $0x190] ss:$8 sps:$4 sm:$0xff]   ;;  %v712_v62 = vld [vmem:[%s949_s1 + $0x84] ss:$8 sps:$4 sm:$0xff]  }
  0x16   :  { %v714_v63 = vld [vmem:[%s949_s1 + $0x184] ss:$8 sps:$4 sm:$0xff]   ;;  %v716_v0 = vld [vmem:[%s949_s1 + $0x80] ss:$8 sps:$4 sm:$0xff]  }
  0x17   :  { %442 = vmatpush1.bf16.msra.mxu0 %v656_v22  ;;  %v717_v1 = vld [vmem:[%s949_s1 + $0x180] ss:$8 sps:$4 sm:$0xff]  }
  0x18   :  { %485 = vmatpush1.bf16.msra.mxu1 %v657_v23  ;;  %443 = vmatprep.subr.bf16.mxu0 %v658_v24  ;;  %v718_v2 = vld [vmem:[%s950_s0] ss:$16 sps:$4 sm:$0xff]   ;;  %v721_v3 = vld [vmem:[%s950_s0 + $0x8] ss:$16 sps:$4 sm:$0xff]  }
  0x19   :  { %486 = vmatprep.subr.bf16.mxu1 %v660_v25 }
  0x1b   :  { %444 = vmatpush1.bf16.msra.mxu0 %v662_v26 }
  0x1c   :  { %487 = vmatpush1.bf16.msra.mxu1 %v663_v27  ;;  %445 = vmatprep.subr.bf16.mxu0 %v664_v28 }
  0x1d   :  { %488 = vmatprep.subr.bf16.mxu1 %v666_v29 }
  0x1f   :  { %446 = vmatpush1.bf16.msra.mxu0 %v668_v30 }
  0x20   :  { %489 = vmatpush1.bf16.msra.mxu1 %v669_v31  ;;  %447 = vmatprep.subr.bf16.mxu0 %v670_v32 }
  0x21   :  { %490 = vmatprep.subr.bf16.mxu1 %v672_v33 }
  0x23   :  { %448 = vmatpush2.bf16.msra.mxu0 %v674_v34 }
  0x24   :  { %491 = vmatpush2.bf16.msra.mxu1 %v675_v35  ;;  %449 = vmatprep.subr.bf16.mxu0 %v676_v36 }
  0x25   :  { %492 = vmatprep.subr.bf16.mxu1 %v678_v37 }
  0x27   :  { %450 = vmatpush2.bf16.msra.mxu0 %v680_v38 }
  0x28   :  { %493 = vmatpush2.bf16.msra.mxu1 %v681_v39  ;;  %451 = vmatprep.subr.bf16.mxu0 %v682_v40 }
  0x29   :  { %494 = vmatprep.subr.bf16.mxu1 %v684_v41 }
  0x2b   :  { %452 = vmatpush2.bf16.msra.mxu0 %v686_v42 }
  0x2c   :  { %495 = vmatpush2.bf16.msra.mxu1 %v687_v43  ;;  %453 = vmatprep.subr.bf16.mxu0 %v688_v44 }
  0x2d   :  { %496 = vmatprep.subr.bf16.mxu1 %v690_v45 }
  0x2f   :  { %454 = vmatpush2.bf16.msra.mxu0 %v692_v46 }
  0x30   :  { %497 = vmatpush2.bf16.msra.mxu1 %v693_v48  ;;  %455 = vmatprep.subr.bf16.mxu0 %v694_v49 }
  0x31   :  { %498 = vmatprep.subr.bf16.mxu1 %v696_v50 }
  0x33   :  { %456 = vmatpush2.bf16.msra.mxu0 %v698_v52 }
  0x34   :  { %499 = vmatpush2.bf16.msra.mxu1 %v699_v53  ;;  %457 = vmatprep.subr.bf16.mxu0 %v700_v54 }
  0x35   :  { %500 = vmatprep.subr.bf16.mxu1 %v702_v55 }
  0x37   :  { %458 = vmatpush2.bf16.msra.mxu0 %v704_v56 }
  0x38   :  { %501 = vmatpush2.bf16.msra.mxu1 %v705_v57  ;;  %459 = vmatprep.subr.bf16.mxu0 %v706_v58 }
  0x39   :  { %502 = vmatprep.subr.bf16.mxu1 %v708_v59 }
  0x3b   :  { %460 = vmatpush2.bf16.msra.mxu0 %v710_v60 }
  0x3c   :  { %503 = vmatpush2.bf16.msra.mxu1 %v711_v61  ;;  %461 = vmatprep.subr.bf16.mxu0 %v712_v62 }
  0x3d   :  { %504 = vmatprep.subr.bf16.mxu1 %v714_v63 }
  0x3f   :  { %462 = vmatpush2.bf16.msra.mxu0 %v716_v0 }
  0x40   :  { %505 = vmatpush2.bf16.msra.mxu1 %v717_v1 }
  0x42   :  { %464 = vmatmul.mubr.bf16.vlgmr.msra.gmra.mxu0 %v718_v2 }
  0x43   :  { %507 = vmatmul.mubr.bf16.vlgmr.msra.gmra.mxu1 %v721_v3 }
 0x102   :  { %v465_v4 = vpop.f32.mrf.mxu0 }
 0x103   :  { %v508_v5 = vpop.f32.mrf.mxu1 }
 0x104   :  { %v467_v6 = vpop.f32.mrf.mxu0  ;;  %v509_v8 = vadd.f32 %v508_v5, %v465_v4 }
 0x105   :  { %v510_v7 = vpop.f32.mrf.mxu1 }
 0x106   :  { %v511_v9 = vadd.f32 %v510_v7, %v467_v6  ;;  %v469_v10 = vpop.f32.mrf.mxu0 }
 0x107   :  { %v512_v11 = vpop.f32.mrf.mxu1 }
 0x108   :  { %v620_v12 = vpack.c.bf16 %v511_v9, %v509_v8  ;;  %v471_v13 = vpop.f32.mrf.mxu0  ;;  %v513_v15 = vadd.f32 %v512_v11, %v469_v10 }
 0x109   :  { %v514_v14 = vpop.f32.mrf.mxu1 }
 0x10a   :  { %544 = vst [vmem:[%s951_s2] sm:$0xff] %v620_v12  ;;  %v515_v16 = vadd.f32 %v514_v14, %v471_v13 }
 0x10c   :  { %v621_v17 = vpack.c.bf16 %v515_v16, %v513_v15 }
 0x10e   :  { %545 = vst [vmem:[%s951_s2 + $0x8] sm:$0xff] %v621_v17 }

// kernel: _lambda_.30
= control target key start
LH: loop header
LB: loop body
LE: loop exit
PB: predicated region body
PF: predicated region fallthrough
CT: control target
= control target key end

     0   :  { %s207_s0 = inlined_call_operand.vmem [shape: bf16[16,256], index: 0, kind: input, shape index: {}]   ;;  %s208_s1 = inlined_call_operand.vmem [shape: bf16[16,256], index: 1, kind: input, shape index: {}]   ;;  %s209_s2 = inlined_call_operand.vmem [shape: f32[1,256], index: 2, kind: input, shape index: {}]   ;;  %s210_s3 = inlined_call_operand.vmem [shape: bf16[16,256], index: 3, kind: output, shape index: {0}]   ;;  %s211_s4 = inlined_call_operand.hbm [shape: bf16[16,256], index: 4, kind: output, shape index: {1}]  }
   0x1   :  { %v17_v0 = vld [vmem:[%s207_s0] sm:$0xff]  ;;  %v18_v2 = vld [vmem:[%s207_s0 + $0x8] sm:$0xff] }
   0x2   :  { %v23_v1 = vld [vmem:[%s208_s1] sm:$0xff]  ;;  %v19_v3 = vunpack.c.l.bf16 %v17_v0  ;;  %v20_v4 = vunpack.c.h.bf16 %v17_v0  ;;  %v24_v7 = vld [vmem:[%s208_s1 + $0x8] sm:$0xff] }
   0x3   :  { %v25_v5 = vunpack.c.l.bf16 %v23_v1  ;;  %v26_v6 = vunpack.c.h.bf16 %v23_v1 }
   0x4   :  { %10 = vsyncpa [#allocation3], 0  ;;  %v21_v8 = vunpack.c.l.bf16 %v18_v2  ;;  %v22_v9 = vunpack.c.h.bf16 %v18_v2  ;;  %v27_v10 = vunpack.c.l.bf16 %v24_v7  ;;  %v28_v11 = vunpack.c.h.bf16 %v24_v7  ;;  %s155_s0 = smov [#allocation2]  }
   0x5   :  { %v29_v12 = vadd.f32 %v25_v5, %v19_v3  ;;  %v30_v13 = vadd.f32 %v26_v6, %v20_v4  ;;  %s105_s1 = sshll.u32 %s155_s0, 4  ;;  %s106_s1 = int_to_ptr.vmem [resolvable:$true] %s105_s1 }
   0x6   :  { %v31_v14 = vadd.f32 %v27_v10, %v21_v8  ;;  %v32_v15 = vadd.f32 %v28_v11, %v22_v9  ;;  %s133_s23 = scalar_lea.vmem %s106_s1, 256  ;;  %p138_p1 = scmp.lt.s32.totalorder %s106_s1, %s106_s1 }
   0x7   :  { %v47_v16 = vmul.f32 %v29_v12, %v29_v12  ;;  %v48_v17 = vmul.f32 %v30_v13, %v30_v13  ;;  %v122_v22 = vpack.c.bf16 %v30_v13, %v29_v12  ;;  %p134_p0 = scmp.ne.s32.totalorder %s106_s1, %s133_s23  ;;  %p139_p2 = scmp.lt.s32.totalorder %s133_s23, %s133_s23 }
   0x8   :  { %v49_v18 = vmul.f32 %v31_v14, %v31_v14  ;;  %v50_v19 = vmul.f32 %v32_v15, %v32_v15  ;;  %v123_v23 = vpack.c.bf16 %v32_v15, %v31_v14 }
   0x9   :  { %v51_v20 = vadd.f32 %v48_v17, %v47_v16  ;;  %45 = vst [vmem:[#allocation2] sm:$0xff] %v122_v22  ;;  %p140_p3 = por %p139_p2, %p138_p1 }
   0xa   :  { %v54_v21 = vadd.f32 %v50_v19, %v49_v18  ;;  %46 = vst [vmem:[#allocation2 + $0x8] sm:$0xff] %v123_v23 }
   0xb   :  { %52 = vadd.xlane.f32.xlu0 %v51_v20  ;;  %p141_p4 = pnand %p140_p3, %p134_p0 }
   0xf   :  { %55 = vadd.xlane.f32.xlu0 %v54_v21 }
  0x10   :  { %144 = shalt.err (!%p141_p4)
}
  0x11   :  { %s156_s24 = smov 128   ;;  %s157_s25 = smov 8   ;;  %v70_v28 = vlaneseq  ;;  %v68_v34 = vld [vmem:[%s209_s2] sm:$0x3] }
  0x12   :  { %111 = dma.vmem_to_hbm [thread:$0]  %s106_s1, 256, %s211_s4, [#allocation3], %s156_s24, %s156_s24, %s157_s25  }
  0x13   :  { %v71_v31 = vshrl.u32 %v70_v28, 7 }
  0x15   :  { %v72_v32 = vsub.s32 0, %v71_v31  ;;  %v76_v33 = vsub.s32 1, %v71_v31 }
  0x17   :  { %v73_v35 = vrot.slane %v68_v34, %v72_v32  ;;  %v77_v36 = vrot.slane %v68_v34, %v76_v33 }
  0x94   :  { %v53_v24 = vpop.xlane.xlu0 %52 }
  0x95   :  { %v58_v25 = vmul.f32 0.00390625, %v53_v24 }
  0x97   :  { %v60_v26 = vadd.f32 1e-06, %v58_v25 }
  0x98   :  { %v56_v27 = vpop.xlane.xlu0 %55 }
  0x99   :  { %129 = vrsqrt.f32 %v60_v26  ;;  %v59_v29 = vmul.f32 0.00390625, %v56_v27 }
  0x9b   :  { %v61_v30 = vadd.f32 1e-06, %v59_v29 }
  0x9d   :  { %131 = vrsqrt.f32 %v61_v30 }
  0xa6   :  { %v130_v37 = vpop.eup %129 }
  0xa7   :  { %v64_v38 = vmul.f32 %v130_v37, %v29_v12  ;;  %v65_v39 = vmul.f32 %v130_v37, %v30_v13 }
  0xa9   :  { %v80_v40 = vmul.f32 %v73_v35, %v64_v38  ;;  %v81_v41 = vmul.f32 %v77_v36, %v65_v39 }
  0xaa   :  { %v132_v42 = vpop.eup %131 }
  0xab   :  { %v124_v43 = vpack.c.bf16 %v81_v41, %v80_v40  ;;  %v66_v44 = vmul.f32 %v132_v42, %v31_v14  ;;  %v67_v45 = vmul.f32 %v132_v42, %v32_v15 }
  0xad   :  { %96 = vst [vmem:[%s210_s3] sm:$0xff] %v124_v43  ;;  %v82_v46 = vmul.f32 %v73_v35, %v66_v44  ;;  %v83_v47 = vmul.f32 %v77_v36, %v67_v45 }
  0xaf   :  { %v125_v48 = vpack.c.bf16 %v83_v47, %v82_v46 }
  0xb1   :  { %97 = vst [vmem:[%s210_s3 + $0x8] sm:$0xff] %v125_v48 }
  0xb2   :  { %153 = dma.done.wait [#allocation3], 256  }
  0xb3   :  { %154 = vsyncadd [#allocation3], 4294967040 }
  0xb4   :  { %117 = vsyncpa [#allocation3], 1 }

// kernel: _lambda_.21
= control target key start
LH: loop header
LB: loop body
LE: loop exit
PB: predicated region body
PF: predicated region fallthrough
CT: control target
= control target key end

     0   :  { %s1962_s1 = inlined_call_operand.vmem [shape: bf16[256,512], index: 1, kind: input, shape index: {}]   ;;  %s1963_s0 = inlined_call_operand.vmem [shape: bf16[16,256], index: 0, kind: input, shape index: {}]   ;;  %s1964_s2 = inlined_call_operand.vmem [shape: bf16[256,512], index: 2, kind: input, shape index: {}]   ;;  %s1965_s3 = inlined_call_operand.vmem [shape: bf16[16,512], index: 3, kind: output, shape index: {}]  }
   0x1   :  { %v1295_v0 = vld [vmem:[%s1962_s1 + $0xe4] ss:$16 sps:$4 sm:$0xff]   ;;  %v1297_v1 = vld [vmem:[%s1962_s1 + $0xec] ss:$16 sps:$4 sm:$0xff]   ;;  %v1299_v2 = vld [vmem:[%s1962_s1 + $0xe0] ss:$16 sps:$4 sm:$0xff]  }
   0x2   :  { %438 = vmatprep.subr.bf16.mxu0 %v1295_v0  ;;  %v1300_v3 = vld [vmem:[%s1962_s1 + $0xe8] ss:$16 sps:$4 sm:$0xff]   ;;  %481 = vmatprep.subr.bf16.mxu1 %v1297_v1  ;;  %v1301_v4 = vld [vmem:[%s1962_s1 + $0xc4] ss:$16 sps:$4 sm:$0xff]   ;;  %v1303_v5 = vld [vmem:[%s1962_s1 + $0xcc] ss:$16 sps:$4 sm:$0xff]  }
   0x3   :  { %439 = vmatpush1.bf16.msra.mxu0 %v1299_v2  ;;  %482 = vmatpush1.bf16.msra.mxu1 %v1300_v3  ;;  %v1305_v6 = vld [vmem:[%s1962_s1 + $0xc0] ss:$16 sps:$4 sm:$0xff]   ;;  %v1306_v7 = vld [vmem:[%s1962_s1 + $0xc8] ss:$16 sps:$4 sm:$0xff]   ;;  %v1307_v8 = vld [vmem:[%s1962_s1 + $0xa4] ss:$16 sps:$4 sm:$0xff]  }
   0x4   :  { %440 = vmatprep.subr.bf16.mxu0 %v1301_v4  ;;  %483 = vmatprep.subr.bf16.mxu1 %v1303_v5  ;;  %v1309_v9 = vld [vmem:[%s1962_s1 + $0xac] ss:$16 sps:$4 sm:$0xff]   ;;  %v1311_v10 = vld [vmem:[%s1962_s1 + $0xa0] ss:$16 sps:$4 sm:$0xff]   ;;  %v1312_v11 = vld [vmem:[%s1962_s1 + $0xa8] ss:$16 sps:$4 sm:$0xff]  }
   0x5   :  { %v1313_v12 = vld [vmem:[%s1962_s1 + $0x84] ss:$16 sps:$4 sm:$0xff]   ;;  %v1315_v13 = vld [vmem:[%s1962_s1 + $0x8c] ss:$16 sps:$4 sm:$0xff]   ;;  %v1317_v14 = vld [vmem:[%s1962_s1 + $0x80] ss:$16 sps:$4 sm:$0xff]  }
   0x6   :  { %v1318_v15 = vld [vmem:[%s1962_s1 + $0x88] ss:$16 sps:$4 sm:$0xff]   ;;  %v1319_v16 = vld [vmem:[%s1962_s1 + $0x64] ss:$16 sps:$4 sm:$0xff]   ;;  %v1321_v17 = vld [vmem:[%s1962_s1 + $0x6c] ss:$16 sps:$4 sm:$0xff]  }
   0x7   :  { %441 = vmatpush1.bf16.msra.mxu0 %v1305_v6  ;;  %484 = vmatpush1.bf16.msra.mxu1 %v1306_v7  ;;  %v1323_v18 = vld [vmem:[%s1962_s1 + $0x60] ss:$16 sps:$4 sm:$0xff]   ;;  %v1324_v19 = vld [vmem:[%s1962_s1 + $0x68] ss:$16 sps:$4 sm:$0xff]   ;;  %v1325_v20 = vld [vmem:[%s1962_s1 + $0x44] ss:$16 sps:$4 sm:$0xff]  }
   0x8   :  { %442 = vmatprep.subr.bf16.mxu0 %v1307_v8  ;;  %485 = vmatprep.subr.bf16.mxu1 %v1309_v9  ;;  %v1327_v21 = vld [vmem:[%s1962_s1 + $0x4c] ss:$16 sps:$4 sm:$0xff]   ;;  %v1329_v22 = vld [vmem:[%s1962_s1 + $0x40] ss:$16 sps:$4 sm:$0xff]   ;;  %v1330_v23 = vld [vmem:[%s1962_s1 + $0x48] ss:$16 sps:$4 sm:$0xff]  }
   0x9   :  { %v1331_v24 = vld [vmem:[%s1962_s1 + $0x24] ss:$16 sps:$4 sm:$0xff]   ;;  %v1333_v25 = vld [vmem:[%s1962_s1 + $0x2c] ss:$16 sps:$4 sm:$0xff]   ;;  %v1335_v26 = vld [vmem:[%s1962_s1 + $0x20] ss:$16 sps:$4 sm:$0xff]  }
   0xa   :  { %v1336_v27 = vld [vmem:[%s1962_s1 + $0x28] ss:$16 sps:$4 sm:$0xff]   ;;  %v1337_v28 = vld [vmem:[%s1962_s1 + $0x4] ss:$16 sps:$4 sm:$0xff]   ;;  %v1339_v29 = vld [vmem:[%s1962_s1 + $0xc] ss:$16 sps:$4 sm:$0xff]  }
   0xb   :  { %443 = vmatpush1.bf16.msra.mxu0 %v1311_v10  ;;  %486 = vmatpush1.bf16.msra.mxu1 %v1312_v11  ;;  %v1341_v30 = vld [vmem:[%s1962_s1] ss:$16 sps:$4 sm:$0xff]   ;;  %v1342_v31 = vld [vmem:[%s1962_s1 + $0x8] ss:$16 sps:$4 sm:$0xff]   ;;  %v1343_v32 = vld [vmem:[%s1962_s1 + $0x1e4] ss:$16 sps:$4 sm:$0xff]  }
   0xc   :  { %444 = vmatprep.subr.bf16.mxu0 %v1313_v12  ;;  %487 = vmatprep.subr.bf16.mxu1 %v1315_v13  ;;  %v1345_v33 = vld [vmem:[%s1962_s1 + $0x1ec] ss:$16 sps:$4 sm:$0xff]   ;;  %v1347_v34 = vld [vmem:[%s1962_s1 + $0x1e0] ss:$16 sps:$4 sm:$0xff]   ;;  %v1348_v35 = vld [vmem:[%s1962_s1 + $0x1e8] ss:$16 sps:$4 sm:$0xff]  }
   0xd   :  { %v1349_v36 = vld [vmem:[%s1962_s1 + $0x1c4] ss:$16 sps:$4 sm:$0xff]   ;;  %v1351_v37 = vld [vmem:[%s1962_s1 + $0x1cc] ss:$16 sps:$4 sm:$0xff]   ;;  %v1353_v38 = vld [vmem:[%s1962_s1 + $0x1c0] ss:$16 sps:$4 sm:$0xff]  }
   0xe   :  { %v1354_v39 = vld [vmem:[%s1962_s1 + $0x1c8] ss:$16 sps:$4 sm:$0xff]   ;;  %v1355_v40 = vld [vmem:[%s1962_s1 + $0x1a4] ss:$16 sps:$4 sm:$0xff]   ;;  %v1357_v41 = vld [vmem:[%s1962_s1 + $0x1ac] ss:$16 sps:$4 sm:$0xff]  }
   0xf   :  { %445 = vmatpush1.bf16.msra.mxu0 %v1317_v14  ;;  %488 = vmatpush1.bf16.msra.mxu1 %v1318_v15  ;;  %v1359_v42 = vld [vmem:[%s1962_s1 + $0x1a0] ss:$16 sps:$4 sm:$0xff]   ;;  %v1360_v43 = vld [vmem:[%s1962_s1 + $0x1a8] ss:$16 sps:$4 sm:$0xff]   ;;  %v1361_v44 = vld [vmem:[%s1962_s1 + $0x184] ss:$16 sps:$4 sm:$0xff]  }
  0x10   :  { %446 = vmatprep.subr.bf16.mxu0 %v1319_v16  ;;  %489 = vmatprep.subr.bf16.mxu1 %v1321_v17  ;;  %v1363_v45 = vld [vmem:[%s1962_s1 + $0x18c] ss:$16 sps:$4 sm:$0xff]   ;;  %v1365_v46 = vld [vmem:[%s1962_s1 + $0x180] ss:$16 sps:$4 sm:$0xff]   ;;  %v1366_v47 = vld [vmem:[%s1962_s1 + $0x188] ss:$16 sps:$4 sm:$0xff]  }
  0x11   :  { %v1391_v48 = vld [vmem:[%s1963_s0 + $0x4] ss:$8 sps:$4 sm:$0xff]   ;;  %v1371_v51 = vld [vmem:[%s1962_s1 + $0x160] ss:$16 sps:$4 sm:$0xff]   ;;  %v1372_v52 = vld [vmem:[%s1962_s1 + $0x168] ss:$16 sps:$4 sm:$0xff]  }
  0x12   :  { %v1367_v49 = vld [vmem:[%s1962_s1 + $0x164] ss:$16 sps:$4 sm:$0xff]   ;;  %v1369_v50 = vld [vmem:[%s1962_s1 + $0x16c] ss:$16 sps:$4 sm:$0xff]   ;;  %470 = vmatprep.mubr.bf16.mxu0 %v1391_v48  ;;  %513 = vmatprep.mubr.bf16.mxu1 %v1391_v48  ;;  %v1377_v55 = vld [vmem:[%s1962_s1 + $0x140] ss:$16 sps:$4 sm:$0xff]  }
  0x13   :  { %447 = vmatpush1.bf16.msra.mxu0 %v1323_v18  ;;  %490 = vmatpush1.bf16.msra.mxu1 %v1324_v19  ;;  %v1373_v53 = vld [vmem:[%s1962_s1 + $0x144] ss:$16 sps:$4 sm:$0xff]   ;;  %v1375_v54 = vld [vmem:[%s1962_s1 + $0x14c] ss:$16 sps:$4 sm:$0xff]   ;;  %v1378_v56 = vld [vmem:[%s1962_s1 + $0x148] ss:$16 sps:$4 sm:$0xff]  }
  0x14   :  { %448 = vmatprep.subr.bf16.mxu0 %v1325_v20  ;;  %491 = vmatprep.subr.bf16.mxu1 %v1327_v21  ;;  %v1379_v57 = vld [vmem:[%s1962_s1 + $0x124] ss:$16 sps:$4 sm:$0xff]   ;;  %v1381_v58 = vld [vmem:[%s1962_s1 + $0x12c] ss:$16 sps:$4 sm:$0xff]   ;;  %v1383_v59 = vld [vmem:[%s1962_s1 + $0x120] ss:$16 sps:$4 sm:$0xff]  }
  0x15   :  { %v1384_v60 = vld [vmem:[%s1962_s1 + $0x128] ss:$16 sps:$4 sm:$0xff]   ;;  %v1385_v61 = vld [vmem:[%s1962_s1 + $0x104] ss:$16 sps:$4 sm:$0xff]   ;;  %v1387_v62 = vld [vmem:[%s1962_s1 + $0x10c] ss:$16 sps:$4 sm:$0xff]  }
  0x16   :  { %v1389_v63 = vld [vmem:[%s1962_s1 + $0x100] ss:$16 sps:$4 sm:$0xff]   ;;  %v1390_v0 = vld [vmem:[%s1962_s1 + $0x108] ss:$16 sps:$4 sm:$0xff]   ;;  %v1396_v1 = vld [vmem:[%s1964_s2 + $0xe4] ss:$16 sps:$4 sm:$0xff]  }
  0x17   :  { %449 = vmatpush1.bf16.msra.mxu0 %v1329_v22  ;;  %492 = vmatpush1.bf16.msra.mxu1 %v1330_v23  ;;  %v1399_v2 = vld [vmem:[%s1964_s2 + $0xec] ss:$16 sps:$4 sm:$0xff]   ;;  %v1746_v3 = vld [vmem:[%s1963_s0] ss:$8 sps:$4 sm:$0xff]   ;;  %v1402_v6 = vld [vmem:[%s1964_s2 + $0xc4] ss:$16 sps:$4 sm:$0xff]  }
  0x18   :  { %450 = vmatprep.subr.bf16.mxu0 %v1331_v24  ;;  %493 = vmatprep.subr.bf16.mxu1 %v1333_v25  ;;  %v1394_v4 = vld [vmem:[%s1964_s2 + $0xe0] ss:$16 sps:$4 sm:$0xff]   ;;  %v1397_v5 = vld [vmem:[%s1964_s2 + $0xe8] ss:$16 sps:$4 sm:$0xff]   ;;  %v1405_v7 = vld [vmem:[%s1964_s2 + $0xcc] ss:$16 sps:$4 sm:$0xff]  }
  0x19   :  { %v1400_v8 = vld [vmem:[%s1964_s2 + $0xc0] ss:$16 sps:$4 sm:$0xff]   ;;  %v1403_v9 = vld [vmem:[%s1964_s2 + $0xc8] ss:$16 sps:$4 sm:$0xff]   ;;  %v1408_v10 = vld [vmem:[%s1964_s2 + $0xa4] ss:$16 sps:$4 sm:$0xff]  }
  0x1a   :  { %v1411_v11 = vld [vmem:[%s1964_s2 + $0xac] ss:$16 sps:$4 sm:$0xff]   ;;  %v1406_v12 = vld [vmem:[%s1964_s2 + $0xa0] ss:$16 sps:$4 sm:$0xff]   ;;  %v1409_v13 = vld [vmem:[%s1964_s2 + $0xa8] ss:$16 sps:$4 sm:$0xff]  }
  0x1b   :  { %451 = vmatpush1.bf16.msra.mxu0 %v1335_v26  ;;  %494 = vmatpush1.bf16.msra.mxu1 %v1336_v27  ;;  %v1414_v14 = vld [vmem:[%s1964_s2 + $0x84] ss:$16 sps:$4 sm:$0xff]   ;;  %v1417_v15 = vld [vmem:[%s1964_s2 + $0x8c] ss:$16 sps:$4 sm:$0xff]   ;;  %v1412_v16 = vld [vmem:[%s1964_s2 + $0x80] ss:$16 sps:$4 sm:$0xff]  }
  0x1c   :  { %452 = vmatprep.subr.bf16.mxu0 %v1337_v28  ;;  %495 = vmatprep.subr.bf16.mxu1 %v1339_v29  ;;  %v1415_v17 = vld [vmem:[%s1964_s2 + $0x88] ss:$16 sps:$4 sm:$0xff]   ;;  %v1420_v18 = vld [vmem:[%s1964_s2 + $0x64] ss:$16 sps:$4 sm:$0xff]   ;;  %v1423_v19 = vld [vmem:[%s1964_s2 + $0x6c] ss:$16 sps:$4 sm:$0xff]  }
  0x1d   :  { %v1418_v20 = vld [vmem:[%s1964_s2 + $0x60] ss:$16 sps:$4 sm:$0xff]   ;;  %v1421_v21 = vld [vmem:[%s1964_s2 + $0x68] ss:$16 sps:$4 sm:$0xff]   ;;  %v1426_v22 = vld [vmem:[%s1964_s2 + $0x44] ss:$16 sps:$4 sm:$0xff]  }
  0x1e   :  { %v1429_v23 = vld [vmem:[%s1964_s2 + $0x4c] ss:$16 sps:$4 sm:$0xff]   ;;  %v1424_v24 = vld [vmem:[%s1964_s2 + $0x40] ss:$16 sps:$4 sm:$0xff]   ;;  %v1427_v25 = vld [vmem:[%s1964_s2 + $0x48] ss:$16 sps:$4 sm:$0xff]  }
  0x1f   :  { %453 = vmatpush1.bf16.msra.mxu0 %v1341_v30  ;;  %496 = vmatpush1.bf16.msra.mxu1 %v1342_v31  ;;  %v1432_v26 = vld [vmem:[%s1964_s2 + $0x24] ss:$16 sps:$4 sm:$0xff]   ;;  %v1435_v27 = vld [vmem:[%s1964_s2 + $0x2c] ss:$16 sps:$4 sm:$0xff]   ;;  %v1430_v28 = vld [vmem:[%s1964_s2 + $0x20] ss:$16 sps:$4 sm:$0xff]  }
  0x20   :  { %454 = vmatprep.subr.bf16.mxu0 %v1343_v32  ;;  %497 = vmatprep.subr.bf16.mxu1 %v1345_v33  ;;  %v1433_v29 = vld [vmem:[%s1964_s2 + $0x28] ss:$16 sps:$4 sm:$0xff]   ;;  %v1438_v30 = vld [vmem:[%s1964_s2 + $0x4] ss:$16 sps:$4 sm:$0xff]   ;;  %v1441_v31 = vld [vmem:[%s1964_s2 + $0xc] ss:$16 sps:$4 sm:$0xff]  }
  0x21   :  { %v1436_v32 = vld [vmem:[%s1964_s2] ss:$16 sps:$4 sm:$0xff]   ;;  %v1439_v33 = vld [vmem:[%s1964_s2 + $0x8] ss:$16 sps:$4 sm:$0xff]  }
  0x23   :  { %455 = vmatpush2.bf16.msra.mxu0 %v1347_v34  ;;  %498 = vmatpush2.bf16.msra.mxu1 %v1348_v35  ;;  %v1444_v34 = vld [vmem:[%s1964_s2 + $0x1e4] ss:$16 sps:$4 sm:$0xff]   ;;  %v1447_v35 = vld [vmem:[%s1964_s2 + $0x1ec] ss:$16 sps:$4 sm:$0xff]  }
  0x24   :  { %456 = vmatprep.subr.bf16.mxu0 %v1349_v36  ;;  %499 = vmatprep.subr.bf16.mxu1 %v1351_v37  ;;  %v1442_v36 = vld [vmem:[%s1964_s2 + $0x1e0] ss:$16 sps:$4 sm:$0xff]   ;;  %v1445_v37 = vld [vmem:[%s1964_s2 + $0x1e8] ss:$16 sps:$4 sm:$0xff]  }
  0x27   :  { %457 = vmatpush2.bf16.msra.mxu0 %v1353_v38  ;;  %500 = vmatpush2.bf16.msra.mxu1 %v1354_v39  ;;  %v1450_v38 = vld [vmem:[%s1964_s2 + $0x1c4] ss:$16 sps:$4 sm:$0xff]   ;;  %v1453_v39 = vld [vmem:[%s1964_s2 + $0x1cc] ss:$16 sps:$4 sm:$0xff]  }
  0x28   :  { %458 = vmatprep.subr.bf16.mxu0 %v1355_v40  ;;  %501 = vmatprep.subr.bf16.mxu1 %v1357_v41  ;;  %v1448_v40 = vld [vmem:[%s1964_s2 + $0x1c0] ss:$16 sps:$4 sm:$0xff]   ;;  %v1451_v41 = vld [vmem:[%s1964_s2 + $0x1c8] ss:$16 sps:$4 sm:$0xff]  }
  0x2b   :  { %459 = vmatpush2.bf16.msra.mxu0 %v1359_v42  ;;  %502 = vmatpush2.bf16.msra.mxu1 %v1360_v43  ;;  %v1456_v42 = vld [vmem:[%s1964_s2 + $0x1a4] ss:$16 sps:$4 sm:$0xff]   ;;  %v1459_v43 = vld [vmem:[%s1964_s2 + $0x1ac] ss:$16 sps:$4 sm:$0xff]  }
  0x2c   :  { %460 = vmatprep.subr.bf16.mxu0 %v1361_v44  ;;  %503 = vmatprep.subr.bf16.mxu1 %v1363_v45  ;;  %v1454_v44 = vld [vmem:[%s1964_s2 + $0x1a0] ss:$16 sps:$4 sm:$0xff]   ;;  %v1457_v45 = vld [vmem:[%s1964_s2 + $0x1a8] ss:$16 sps:$4 sm:$0xff]  }
  0x2f   :  { %461 = vmatpush2.bf16.msra.mxu0 %v1365_v46  ;;  %504 = vmatpush2.bf16.msra.mxu1 %v1366_v47  ;;  %v1462_v46 = vld [vmem:[%s1964_s2 + $0x184] ss:$16 sps:$4 sm:$0xff]   ;;  %v1465_v47 = vld [vmem:[%s1964_s2 + $0x18c] ss:$16 sps:$4 sm:$0xff]  }
  0x30   :  { %462 = vmatprep.subr.bf16.mxu0 %v1367_v49  ;;  %505 = vmatprep.subr.bf16.mxu1 %v1369_v50  ;;  %v1463_v49 = vld [vmem:[%s1964_s2 + $0x188] ss:$16 sps:$4 sm:$0xff]   ;;  %v1468_v50 = vld [vmem:[%s1964_s2 + $0x164] ss:$16 sps:$4 sm:$0xff]  }
  0x33   :  { %463 = vmatpush2.bf16.msra.mxu0 %v1371_v51  ;;  %506 = vmatpush2.bf16.msra.mxu1 %v1372_v52  ;;  %v1471_v51 = vld [vmem:[%s1964_s2 + $0x16c] ss:$16 sps:$4 sm:$0xff]   ;;  %v1466_v52 = vld [vmem:[%s1964_s2 + $0x160] ss:$16 sps:$4 sm:$0xff]  }
  0x34   :  { %464 = vmatprep.subr.bf16.mxu0 %v1373_v53  ;;  %507 = vmatprep.subr.bf16.mxu1 %v1375_v54  ;;  %v1469_v53 = vld [vmem:[%s1964_s2 + $0x168] ss:$16 sps:$4 sm:$0xff]   ;;  %v1474_v54 = vld [vmem:[%s1964_s2 + $0x144] ss:$16 sps:$4 sm:$0xff]  }
  0x37   :  { %465 = vmatpush2.bf16.msra.mxu0 %v1377_v55  ;;  %508 = vmatpush2.bf16.msra.mxu1 %v1378_v56  ;;  %v1477_v55 = vld [vmem:[%s1964_s2 + $0x14c] ss:$16 sps:$4 sm:$0xff]   ;;  %v1472_v56 = vld [vmem:[%s1964_s2 + $0x140] ss:$16 sps:$4 sm:$0xff]  }
  0x38   :  { %466 = vmatprep.subr.bf16.mxu0 %v1379_v57  ;;  %509 = vmatprep.subr.bf16.mxu1 %v1381_v58  ;;  %v1475_v57 = vld [vmem:[%s1964_s2 + $0x148] ss:$16 sps:$4 sm:$0xff]   ;;  %v1480_v58 = vld [vmem:[%s1964_s2 + $0x124] ss:$16 sps:$4 sm:$0xff]  }
  0x3b   :  { %467 = vmatpush2.bf16.msra.mxu0 %v1383_v59  ;;  %510 = vmatpush2.bf16.msra.mxu1 %v1384_v60  ;;  %v1483_v59 = vld [vmem:[%s1964_s2 + $0x12c] ss:$16 sps:$4 sm:$0xff]   ;;  %v1478_v60 = vld [vmem:[%s1964_s2 + $0x120] ss:$16 sps:$4 sm:$0xff]  }
  0x3c   :  { %468 = vmatprep.subr.bf16.mxu0 %v1385_v61  ;;  %511 = vmatprep.subr.bf16.mxu1 %v1387_v62  ;;  %v1481_v61 = vld [vmem:[%s1964_s2 + $0x128] ss:$16 sps:$4 sm:$0xff]   ;;  %v1486_v62 = vld [vmem:[%s1964_s2 + $0x104] ss:$16 sps:$4 sm:$0xff]  }
  0x3f   :  { %469 = vmatpush2.bf16.msra.mxu0 %v1389_v63  ;;  %512 = vmatpush2.bf16.msra.mxu1 %v1390_v0  ;;  %v1489_v63 = vld [vmem:[%s1964_s2 + $0x10c] ss:$16 sps:$4 sm:$0xff]   ;;  %v1484_v0 = vld [vmem:[%s1964_s2 + $0x100] ss:$16 sps:$4 sm:$0xff]  }
  0x40   :  { %932 = vmatprep.subr.bf16.mxu0 %v1396_v1  ;;  %975 = vmatprep.subr.bf16.mxu1 %v1399_v2  ;;  %v1487_v1 = vld [vmem:[%s1964_s2 + $0x108] ss:$16 sps:$4 sm:$0xff]  }
  0x42   :  { %471 = vmatmul.mubr.bf16.vlgmr.msra.gmra.mxu0 %v1746_v3  ;;  %514 = vmatmul.mubr.bf16.vlgmr.msra.gmra.mxu1 %v1746_v3 }
  0x43   :  { %933 = vmatpush1.bf16.msra.mxu0 %v1394_v4  ;;  %976 = vmatpush1.bf16.msra.mxu1 %v1397_v5 }
  0x44   :  { %934 = vmatprep.subr.bf16.mxu0 %v1402_v6  ;;  %977 = vmatprep.subr.bf16.mxu1 %v1405_v7 }
  0x45   :  { %964 = vmatprep.mubr.bf16.mxu0 %v1391_v48  ;;  %1007 = vmatprep.mubr.bf16.mxu1 %v1391_v48  ;;  %v1460_v48 = vld [vmem:[%s1964_s2 + $0x180] ss:$16 sps:$4 sm:$0xff]  }
  0x47   :  { %935 = vmatpush1.bf16.msra.mxu0 %v1400_v8  ;;  %978 = vmatpush1.bf16.msra.mxu1 %v1403_v9 }
  0x48   :  { %936 = vmatprep.subr.bf16.mxu0 %v1408_v10  ;;  %979 = vmatprep.subr.bf16.mxu1 %v1411_v11 }
  0x4b   :  { %937 = vmatpush1.bf16.msra.mxu0 %v1406_v12  ;;  %980 = vmatpush1.bf16.msra.mxu1 %v1409_v13 }
  0x4c   :  { %938 = vmatprep.subr.bf16.mxu0 %v1414_v14  ;;  %981 = vmatprep.subr.bf16.mxu1 %v1417_v15 }
  0x4f   :  { %939 = vmatpush1.bf16.msra.mxu0 %v1412_v16  ;;  %982 = vmatpush1.bf16.msra.mxu1 %v1415_v17 }
  0x50   :  { %940 = vmatprep.subr.bf16.mxu0 %v1420_v18  ;;  %983 = vmatprep.subr.bf16.mxu1 %v1423_v19 }
  0x53   :  { %941 = vmatpush1.bf16.msra.mxu0 %v1418_v20  ;;  %984 = vmatpush1.bf16.msra.mxu1 %v1421_v21 }
  0x54   :  { %942 = vmatprep.subr.bf16.mxu0 %v1426_v22  ;;  %985 = vmatprep.subr.bf16.mxu1 %v1429_v23 }
  0x57   :  { %943 = vmatpush1.bf16.msra.mxu0 %v1424_v24  ;;  %986 = vmatpush1.bf16.msra.mxu1 %v1427_v25 }
  0x58   :  { %944 = vmatprep.subr.bf16.mxu0 %v1432_v26  ;;  %987 = vmatprep.subr.bf16.mxu1 %v1435_v27 }
  0x5b   :  { %945 = vmatpush1.bf16.msra.mxu0 %v1430_v28  ;;  %988 = vmatpush1.bf16.msra.mxu1 %v1433_v29 }
  0x5c   :  { %946 = vmatprep.subr.bf16.mxu0 %v1438_v30  ;;  %989 = vmatprep.subr.bf16.mxu1 %v1441_v31 }
  0x5f   :  { %947 = vmatpush1.bf16.msra.mxu0 %v1436_v32  ;;  %990 = vmatpush1.bf16.msra.mxu1 %v1439_v33 }
  0x60   :  { %948 = vmatprep.subr.bf16.mxu0 %v1444_v34  ;;  %991 = vmatprep.subr.bf16.mxu1 %v1447_v35 }
  0x63   :  { %949 = vmatpush2.bf16.msra.mxu0 %v1442_v36  ;;  %992 = vmatpush2.bf16.msra.mxu1 %v1445_v37 }
  0x64   :  { %950 = vmatprep.subr.bf16.mxu0 %v1450_v38  ;;  %993 = vmatprep.subr.bf16.mxu1 %v1453_v39 }
  0x67   :  { %951 = vmatpush2.bf16.msra.mxu0 %v1448_v40  ;;  %994 = vmatpush2.bf16.msra.mxu1 %v1451_v41 }
  0x68   :  { %952 = vmatprep.subr.bf16.mxu0 %v1456_v42  ;;  %995 = vmatprep.subr.bf16.mxu1 %v1459_v43 }
  0x6b   :  { %953 = vmatpush2.bf16.msra.mxu0 %v1454_v44  ;;  %996 = vmatpush2.bf16.msra.mxu1 %v1457_v45 }
  0x6c   :  { %954 = vmatprep.subr.bf16.mxu0 %v1462_v46  ;;  %997 = vmatprep.subr.bf16.mxu1 %v1465_v47 }
  0x6f   :  { %955 = vmatpush2.bf16.msra.mxu0 %v1460_v48  ;;  %998 = vmatpush2.bf16.msra.mxu1 %v1463_v49 }
  0x70   :  { %956 = vmatprep.subr.bf16.mxu0 %v1468_v50  ;;  %999 = vmatprep.subr.bf16.mxu1 %v1471_v51 }
  0x73   :  { %957 = vmatpush2.bf16.msra.mxu0 %v1466_v52  ;;  %1000 = vmatpush2.bf16.msra.mxu1 %v1469_v53 }
  0x74   :  { %958 = vmatprep.subr.bf16.mxu0 %v1474_v54  ;;  %1001 = vmatprep.subr.bf16.mxu1 %v1477_v55 }
  0x77   :  { %959 = vmatpush2.bf16.msra.mxu0 %v1472_v56  ;;  %1002 = vmatpush2.bf16.msra.mxu1 %v1475_v57 }
  0x78   :  { %960 = vmatprep.subr.bf16.mxu0 %v1480_v58  ;;  %1003 = vmatprep.subr.bf16.mxu1 %v1483_v59 }
  0x7b   :  { %961 = vmatpush2.bf16.msra.mxu0 %v1478_v60  ;;  %1004 = vmatpush2.bf16.msra.mxu1 %v1481_v61 }
  0x7c   :  { %962 = vmatprep.subr.bf16.mxu0 %v1486_v62  ;;  %1005 = vmatprep.subr.bf16.mxu1 %v1489_v63 }
  0x7f   :  { %963 = vmatpush2.bf16.msra.mxu0 %v1484_v0  ;;  %1006 = vmatpush2.bf16.msra.mxu1 %v1487_v1 }
  0x82   :  { %965 = vmatmul.mubr.bf16.vlgmr.msra.gmra.mxu0 %v1746_v3  ;;  %1008 = vmatmul.mubr.bf16.vlgmr.msra.gmra.mxu1 %v1746_v3 }
 0x102   :  { %v472_v2 = vpop.f32.mrf.mxu0  ;;  %v515_v4 = vpop.f32.mrf.mxu1 }
 0x103   :  { %v1279_v8 = vmul.f32 -1.442695, %v472_v2  ;;  %v1281_v10 = vmul.f32 -1.442695, %v515_v4 }
 0x104   :  { %v474_v5 = vpop.f32.mrf.mxu0  ;;  %v517_v6 = vpop.f32.mrf.mxu1 }
 0x105   :  { %v1280_v11 = vmul.f32 -1.442695, %v474_v5  ;;  %v1282_v12 = vmul.f32 -1.442695, %v517_v6  ;;  %1490 = vpow2.f32 %v1279_v8 }
 0x106   :  { %v1938_v7 = vpop.f32.mrf.mxu0  ;;  %v1940_v9 = vpop.f32.mrf.mxu1  ;;  %1492 = vpow2.f32 %v1281_v10 }
 0x107   :  { %v1283_v14 = vmul.f32 -1.442695, %v1938_v7  ;;  %v1285_v3 = vmul.f32 -1.442695, %v1940_v9  ;;  %1494 = vpow2.f32 %v1280_v11 }
 0x108   :  { %v1942_v13 = vpop.f32.mrf.mxu0  ;;  %v521_v15 = vpop.f32.mrf.mxu1  ;;  %1496 = vpow2.f32 %v1282_v12 }
 0x109   :  { %v1284_v16 = vmul.f32 -1.442695, %v1942_v13  ;;  %v1286_v17 = vmul.f32 -1.442695, %v521_v15  ;;  %1498 = vpow2.f32 %v1283_v14 }
 0x10a   :  { %1500 = vpow2.f32 %v1285_v3 }
 0x10b   :  { %1502 = vpow2.f32 %v1284_v16 }
 0x10c   :  { %1504 = vpow2.f32 %v1286_v17 }
 0x112   :  { %v1491_v18 = vpop.eup %1490 }
 0x113   :  { %v1493_v19 = vpop.eup %1492  ;;  %v1069_v22 = vadd.f32 1.0, %v1491_v18 }
 0x114   :  { %v1495_v20 = vpop.eup %1494  ;;  %v1071_v24 = vadd.f32 1.0, %v1493_v19 }
 0x115   :  { %v1497_v21 = vpop.eup %1496  ;;  %v1070_v26 = vadd.f32 1.0, %v1495_v20  ;;  %1506 = vrcp.f32 %v1069_v22 }
 0x116   :  { %v1499_v23 = vpop.eup %1498  ;;  %v1072_v28 = vadd.f32 1.0, %v1497_v21  ;;  %1508 = vrcp.f32 %v1071_v24 }
 0x117   :  { %v1501_v25 = vpop.eup %1500  ;;  %v1073_v30 = vadd.f32 1.0, %v1499_v23  ;;  %1510 = vrcp.f32 %v1070_v26 }
 0x118   :  { %v1503_v27 = vpop.eup %1502  ;;  %v1075_v31 = vadd.f32 1.0, %v1501_v25  ;;  %1512 = vrcp.f32 %v1072_v28 }
 0x119   :  { %v1505_v29 = vpop.eup %1504  ;;  %v1074_v32 = vadd.f32 1.0, %v1503_v27  ;;  %1514 = vrcp.f32 %v1073_v30 }
 0x11a   :  { %v1076_v33 = vadd.f32 1.0, %v1505_v29  ;;  %1516 = vrcp.f32 %v1075_v31 }
 0x11b   :  { %1518 = vrcp.f32 %v1074_v32 }
 0x11c   :  { %1520 = vrcp.f32 %v1076_v33 }
 0x122   :  { %v1507_v34 = vpop.eup %1506 }
 0x123   :  { %v1509_v35 = vpop.eup %1508  ;;  %v1093_v43 = vmul.f32 %v1507_v34, %v472_v2 }
 0x124   :  { %v1511_v36 = vpop.eup %1510  ;;  %v1095_v44 = vmul.f32 %v1509_v35, %v515_v4 }
 0x125   :  { %v1513_v37 = vpop.eup %1512  ;;  %v1094_v45 = vmul.f32 %v1511_v36, %v474_v5 }
 0x126   :  { %v1515_v38 = vpop.eup %1514  ;;  %v1096_v46 = vmul.f32 %v1513_v37, %v517_v6 }
 0x127   :  { %v1517_v39 = vpop.eup %1516  ;;  %v1097_v54 = vmul.f32 %v1515_v38, %v1938_v7 }
 0x128   :  { %v1519_v42 = vpop.eup %1518  ;;  %v1099_v55 = vmul.f32 %v1517_v39, %v1940_v9 }
 0x129   :  { %v1521_v47 = vpop.eup %1520  ;;  %v1098_v58 = vmul.f32 %v1519_v42, %v1942_v13 }
 0x12a   :  { %v1100_v59 = vmul.f32 %v1521_v47, %v521_v15 }
 0x142   :  { %v966_v40 = vpop.f32.mrf.mxu0  ;;  %v1009_v41 = vpop.f32.mrf.mxu1 }
 0x143   :  { %v1109_v50 = vmul.f32 %v1093_v43, %v966_v40  ;;  %v1111_v51 = vmul.f32 %v1095_v44, %v1009_v41 }
 0x144   :  { %v968_v48 = vpop.f32.mrf.mxu0  ;;  %v1011_v49 = vpop.f32.mrf.mxu1 }
 0x145   :  { %v1110_v52 = vmul.f32 %v1094_v45, %v968_v48  ;;  %v1112_v53 = vmul.f32 %v1096_v46, %v1011_v49 }
 0x146   :  { %v970_v56 = vpop.f32.mrf.mxu0  ;;  %v1013_v57 = vpop.f32.mrf.mxu1 }
 0x147   :  { %v1291_v60 = vpack.c.bf16 %v1110_v52, %v1109_v50  ;;  %v1292_v61 = vpack.c.bf16 %v1112_v53, %v1111_v51  ;;  %v1113_v0 = vmul.f32 %v1097_v54, %v970_v56  ;;  %v1115_v1 = vmul.f32 %v1099_v55, %v1013_v57 }
 0x148   :  { %v972_v62 = vpop.f32.mrf.mxu0  ;;  %v1015_v63 = vpop.f32.mrf.mxu1 }
 0x149   :  { %1141 = vst [vmem:[%s1965_s3] sm:$0xff] %v1291_v60  ;;  %1142 = vst [vmem:[%s1965_s3 + $0x8] sm:$0xff] %v1292_v61  ;;  %v1114_v2 = vmul.f32 %v1098_v58, %v972_v62  ;;  %v1116_v4 = vmul.f32 %v1100_v59, %v1015_v63 }
 0x14b   :  { %v1293_v5 = vpack.c.bf16 %v1114_v2, %v1113_v0  ;;  %v1294_v6 = vpack.c.bf16 %v1116_v4, %v1115_v1 }
 0x14d   :  { %1143 = vst [vmem:[%s1965_s3 + $0x10] sm:$0xff] %v1293_v5  ;;  %1144 = vst [vmem:[%s1965_s3 + $0x18] sm:$0xff] %v1294_v6 }

// kernel: _lambda_.31
= control target key start
LH: loop header
LB: loop body
LE: loop exit
PB: predicated region body
PF: predicated region fallthrough
CT: control target
= control target key end

     0   :  { %v16_v38 = vlaneseq  ;;  %v754_v39 = vmov 1966171168   ;;  %s989_s0 = inlined_call_operand.vmem [shape: bf16[1,256], index: 0, kind: input, shape index: {}]   ;;  %s990_s1 = inlined_call_operand.vmem [shape: bf16[256,512], index: 1, kind: input, shape index: {}]   ;;  %s991_s2 = inlined_call_operand.hbm [shape: f32[1,512], index: 2, kind: output, shape index: {}]  }
   0x1   :  { %v636_v0 = vld [vmem:[%s990_s1 + $0xe4] ss:$16 sps:$4 sm:$0xff]   ;;  %v638_v1 = vld [vmem:[%s990_s1 + $0xec] ss:$16 sps:$4 sm:$0xff]   ;;  %v640_v2 = vld [vmem:[%s990_s1 + $0xe0] ss:$16 sps:$4 sm:$0xff]   ;;  %v97_v40 = vunpack.c.l.s4 %v754_v39 }
   0x2   :  { %432 = vmatprep.subr.bf16.mxu0 %v636_v0  ;;  %v641_v3 = vld [vmem:[%s990_s1 + $0xe8] ss:$16 sps:$4 sm:$0xff]   ;;  %473 = vmatprep.subr.bf16.mxu1 %v638_v1  ;;  %v642_v4 = vld [vmem:[%s990_s1 + $0xc4] ss:$16 sps:$4 sm:$0xff]   ;;  %v644_v5 = vld [vmem:[%s990_s1 + $0xcc] ss:$16 sps:$4 sm:$0xff]  }
   0x3   :  { %433 = vmatpush1.bf16.msra.mxu0 %v640_v2  ;;  %474 = vmatpush1.bf16.msra.mxu1 %v641_v3  ;;  %v646_v6 = vld [vmem:[%s990_s1 + $0xc0] ss:$16 sps:$4 sm:$0xff]   ;;  %v647_v7 = vld [vmem:[%s990_s1 + $0xc8] ss:$16 sps:$4 sm:$0xff]   ;;  %v648_v8 = vld [vmem:[%s990_s1 + $0xa4] ss:$16 sps:$4 sm:$0xff]   ;;  %v98_v45 = vunpack.c.0.s8 %v97_v40 }
   0x4   :  { %434 = vmatprep.subr.bf16.mxu0 %v642_v4  ;;  %475 = vmatprep.subr.bf16.mxu1 %v644_v5  ;;  %v650_v9 = vld [vmem:[%s990_s1 + $0xac] ss:$16 sps:$4 sm:$0xff]   ;;  %v652_v10 = vld [vmem:[%s990_s1 + $0xa0] ss:$16 sps:$4 sm:$0xff]   ;;  %v653_v11 = vld [vmem:[%s990_s1 + $0xa8] ss:$16 sps:$4 sm:$0xff]  }
   0x5   :  { %v654_v12 = vld [vmem:[%s990_s1 + $0x84] ss:$16 sps:$4 sm:$0xff]   ;;  %v656_v13 = vld [vmem:[%s990_s1 + $0x8c] ss:$16 sps:$4 sm:$0xff]   ;;  %v658_v14 = vld [vmem:[%s990_s1 + $0x80] ss:$16 sps:$4 sm:$0xff]  }
   0x6   :  { %v659_v15 = vld [vmem:[%s990_s1 + $0x88] ss:$16 sps:$4 sm:$0xff]   ;;  %v660_v16 = vld [vmem:[%s990_s1 + $0x64] ss:$16 sps:$4 sm:$0xff]   ;;  %v662_v17 = vld [vmem:[%s990_s1 + $0x6c] ss:$16 sps:$4 sm:$0xff]  }
   0x7   :  { %435 = vmatpush1.bf16.msra.mxu0 %v646_v6  ;;  %476 = vmatpush1.bf16.msra.mxu1 %v647_v7  ;;  %v664_v18 = vld [vmem:[%s990_s1 + $0x60] ss:$16 sps:$4 sm:$0xff]   ;;  %v665_v19 = vld [vmem:[%s990_s1 + $0x68] ss:$16 sps:$4 sm:$0xff]   ;;  %v666_v20 = vld [vmem:[%s990_s1 + $0x44] ss:$16 sps:$4 sm:$0xff]  }
   0x8   :  { %436 = vmatprep.subr.bf16.mxu0 %v648_v8  ;;  %477 = vmatprep.subr.bf16.mxu1 %v650_v9  ;;  %v668_v21 = vld [vmem:[%s990_s1 + $0x4c] ss:$16 sps:$4 sm:$0xff]   ;;  %v670_v22 = vld [vmem:[%s990_s1 + $0x40] ss:$16 sps:$4 sm:$0xff]   ;;  %v671_v23 = vld [vmem:[%s990_s1 + $0x48] ss:$16 sps:$4 sm:$0xff]  }
   0x9   :  { %v672_v24 = vld [vmem:[%s990_s1 + $0x24] ss:$16 sps:$4 sm:$0xff]   ;;  %v674_v25 = vld [vmem:[%s990_s1 + $0x2c] ss:$16 sps:$4 sm:$0xff]   ;;  %v676_v26 = vld [vmem:[%s990_s1 + $0x20] ss:$16 sps:$4 sm:$0xff]  }
   0xa   :  { %v677_v27 = vld [vmem:[%s990_s1 + $0x28] ss:$16 sps:$4 sm:$0xff]   ;;  %v678_v28 = vld [vmem:[%s990_s1 + $0x4] ss:$16 sps:$4 sm:$0xff]   ;;  %v680_v29 = vld [vmem:[%s990_s1 + $0xc] ss:$16 sps:$4 sm:$0xff]  }
   0xb   :  { %437 = vmatpush1.bf16.msra.mxu0 %v652_v10  ;;  %478 = vmatpush1.bf16.msra.mxu1 %v653_v11  ;;  %v682_v30 = vld [vmem:[%s990_s1] ss:$16 sps:$4 sm:$0xff]   ;;  %v683_v31 = vld [vmem:[%s990_s1 + $0x8] ss:$16 sps:$4 sm:$0xff]   ;;  %v684_v32 = vld [vmem:[%s990_s1 + $0x1e4] ss:$16 sps:$4 sm:$0xff]  }
   0xc   :  { %438 = vmatprep.subr.bf16.mxu0 %v654_v12  ;;  %479 = vmatprep.subr.bf16.mxu1 %v656_v13  ;;  %v686_v33 = vld [vmem:[%s990_s1 + $0x1ec] ss:$16 sps:$4 sm:$0xff]   ;;  %v688_v34 = vld [vmem:[%s990_s1 + $0x1e0] ss:$16 sps:$4 sm:$0xff]   ;;  %v689_v35 = vld [vmem:[%s990_s1 + $0x1e8] ss:$16 sps:$4 sm:$0xff]  }
   0xd   :  { %v690_v36 = vld [vmem:[%s990_s1 + $0x1c4] ss:$16 sps:$4 sm:$0xff]   ;;  %v692_v37 = vld [vmem:[%s990_s1 + $0x1cc] ss:$16 sps:$4 sm:$0xff]   ;;  %v694_v41 = vld [vmem:[%s990_s1 + $0x1c0] ss:$16 sps:$4 sm:$0xff]  }
   0xe   :  { %v695_v42 = vld [vmem:[%s990_s1 + $0x1c8] ss:$16 sps:$4 sm:$0xff]   ;;  %v696_v43 = vld [vmem:[%s990_s1 + $0x1a4] ss:$16 sps:$4 sm:$0xff]   ;;  %v698_v44 = vld [vmem:[%s990_s1 + $0x1ac] ss:$16 sps:$4 sm:$0xff]  }
   0xf   :  { %439 = vmatpush1.bf16.msra.mxu0 %v658_v14  ;;  %480 = vmatpush1.bf16.msra.mxu1 %v659_v15  ;;  %v100_v46 = vshrl.u32 %v16_v38, 7  ;;  %v700_v47 = vld [vmem:[%s990_s1 + $0x1a0] ss:$16 sps:$4 sm:$0xff]   ;;  %v701_v48 = vld [vmem:[%s990_s1 + $0x1a8] ss:$16 sps:$4 sm:$0xff]  }
  0x10   :  { %440 = vmatprep.subr.bf16.mxu0 %v660_v16  ;;  %481 = vmatprep.subr.bf16.mxu1 %v662_v17  ;;  %v702_v49 = vld [vmem:[%s990_s1 + $0x184] ss:$16 sps:$4 sm:$0xff]   ;;  %v704_v50 = vld [vmem:[%s990_s1 + $0x18c] ss:$16 sps:$4 sm:$0xff]  }
  0x11   :  { %v911_v51 = vsub.s32 %v98_v45, %v100_v46 }
  0x13   :  { %441 = vmatpush1.bf16.msra.mxu0 %v664_v18  ;;  %482 = vmatpush1.bf16.msra.mxu1 %v665_v19 }
  0x14   :  { %442 = vmatprep.subr.bf16.mxu0 %v666_v20  ;;  %483 = vmatprep.subr.bf16.mxu1 %v668_v21 }
  0x17   :  { %443 = vmatpush1.bf16.msra.mxu0 %v670_v22  ;;  %484 = vmatpush1.bf16.msra.mxu1 %v671_v23 }
  0x18   :  { %444 = vmatprep.subr.bf16.mxu0 %v672_v24  ;;  %485 = vmatprep.subr.bf16.mxu1 %v674_v25 }
  0x1b   :  { %445 = vmatpush1.bf16.msra.mxu0 %v676_v26  ;;  %486 = vmatpush1.bf16.msra.mxu1 %v677_v27 }
  0x1c   :  { %446 = vmatprep.subr.bf16.mxu0 %v678_v28  ;;  %487 = vmatprep.subr.bf16.mxu1 %v680_v29 }
  0x1f   :  { %447 = vmatpush1.bf16.msra.mxu0 %v682_v30  ;;  %488 = vmatpush1.bf16.msra.mxu1 %v683_v31 }
  0x20   :  { %448 = vmatprep.subr.bf16.mxu0 %v684_v32  ;;  %489 = vmatprep.subr.bf16.mxu1 %v686_v33 }
  0x23   :  { %449 = vmatpush2.bf16.msra.mxu0 %v688_v34  ;;  %490 = vmatpush2.bf16.msra.mxu1 %v689_v35 }
  0x24   :  { %450 = vmatprep.subr.bf16.mxu0 %v690_v36  ;;  %491 = vmatprep.subr.bf16.mxu1 %v692_v37 }
  0x27   :  { %451 = vmatpush2.bf16.msra.mxu0 %v694_v41  ;;  %492 = vmatpush2.bf16.msra.mxu1 %v695_v42 }
  0x28   :  { %452 = vmatprep.subr.bf16.mxu0 %v696_v43  ;;  %493 = vmatprep.subr.bf16.mxu1 %v698_v44 }
  0x29   :  { %7 = vsyncpa [#allocation4], 0  ;;  %v568_v52 = vld.sshfl [vmem:[%s989_s0] sm:$0x11 pattern:$0x75316420] }
  0x2a   :  { %v706_v53 = vld [vmem:[%s990_s1 + $0x180] ss:$16 sps:$4 sm:$0xff]   ;;  %v707_v54 = vld [vmem:[%s990_s1 + $0x188] ss:$16 sps:$4 sm:$0xff]   ;;  %v95_v55 = vcombine.high %v568_v52, %v568_v52  ;;  %v708_v56 = vld [vmem:[%s990_s1 + $0x164] ss:$16 sps:$4 sm:$0xff]   ;;  %v102_v9 = vrot.slane %v568_v52, %v911_v51 }
  0x2b   :  { %453 = vmatpush2.bf16.msra.mxu0 %v700_v47  ;;  %494 = vmatpush2.bf16.msra.mxu1 %v701_v48  ;;  %v710_v57 = vld [vmem:[%s990_s1 + $0x16c] ss:$16 sps:$4 sm:$0xff]   ;;  %v712_v59 = vld [vmem:[%s990_s1 + $0x160] ss:$16 sps:$4 sm:$0xff]   ;;  %v713_v60 = vld [vmem:[%s990_s1 + $0x168] ss:$16 sps:$4 sm:$0xff]  }
  0x2c   :  { %454 = vmatprep.subr.bf16.mxu0 %v702_v49  ;;  %495 = vmatprep.subr.bf16.mxu1 %v704_v50  ;;  %v109_v58 = vrot.slane %v95_v55, %v911_v51  ;;  %v714_v61 = vld [vmem:[%s990_s1 + $0x144] ss:$16 sps:$4 sm:$0xff]   ;;  %v716_v62 = vld [vmem:[%s990_s1 + $0x14c] ss:$16 sps:$4 sm:$0xff]   ;;  %v718_v63 = vld [vmem:[%s990_s1 + $0x140] ss:$16 sps:$4 sm:$0xff]  }
  0x2d   :  { %v719_v0 = vld [vmem:[%s990_s1 + $0x148] ss:$16 sps:$4 sm:$0xff]   ;;  %v720_v1 = vld [vmem:[%s990_s1 + $0x124] ss:$16 sps:$4 sm:$0xff]   ;;  %v722_v2 = vld [vmem:[%s990_s1 + $0x12c] ss:$16 sps:$4 sm:$0xff]  }
  0x2e   :  { %464 = vmatprep.mubr.bf16.mxu0 %v109_v58  ;;  %505 = vmatprep.mubr.bf16.mxu1 %v109_v58  ;;  %v724_v3 = vld [vmem:[%s990_s1 + $0x120] ss:$16 sps:$4 sm:$0xff]   ;;  %v725_v4 = vld [vmem:[%s990_s1 + $0x128] ss:$16 sps:$4 sm:$0xff]   ;;  %v726_v5 = vld [vmem:[%s990_s1 + $0x104] ss:$16 sps:$4 sm:$0xff]  }
  0x2f   :  { %455 = vmatpush2.bf16.msra.mxu0 %v706_v53  ;;  %496 = vmatpush2.bf16.msra.mxu1 %v707_v54  ;;  %v728_v6 = vld [vmem:[%s990_s1 + $0x10c] ss:$16 sps:$4 sm:$0xff]   ;;  %v730_v7 = vld [vmem:[%s990_s1 + $0x100] ss:$16 sps:$4 sm:$0xff]   ;;  %v731_v8 = vld [vmem:[%s990_s1 + $0x108] ss:$16 sps:$4 sm:$0xff]  }
  0x30   :  { %456 = vmatprep.subr.bf16.mxu0 %v708_v56  ;;  %497 = vmatprep.subr.bf16.mxu1 %v710_v57  ;;  %vm973_vm0 = vcmp.lt.s32.totalorder %v16_v38, 512  ;;  %v755_v11 = vmov 0.0   ;;  %s756_s1 = smov [#allocation3]  }
  0x31   :  { %20 = vst.msk [vmem:[#allocation2] sm:$0xf] %vm973_vm0, %v755_v11  ;;  %s560_s26 = sshll.u32 %s756_s1, 4  ;;  %s561_s26 = int_to_ptr.vmem [resolvable:$true] %s560_s26 }
  0x32   :  { %s732_s0 = scalar_lea.vmem %s561_s26, 64  ;;  %p737_p1 = scmp.lt.s32.totalorder %s561_s26, %s561_s26 }
  0x33   :  { %457 = vmatpush2.bf16.msra.mxu0 %v712_v59  ;;  %498 = vmatpush2.bf16.msra.mxu1 %v713_v60  ;;  %p733_p0 = scmp.ne.s32.totalorder %s561_s26, %s732_s0  ;;  %p738_p2 = scmp.lt.s32.totalorder %s732_s0, %s732_s0 }
  0x34   :  { %458 = vmatprep.subr.bf16.mxu0 %v714_v61  ;;  %499 = vmatprep.subr.bf16.mxu1 %v716_v62 }
  0x35   :  { %p739_p3 = por %p738_p2, %p737_p1 }
  0x37   :  { %459 = vmatpush2.bf16.msra.mxu0 %v718_v63  ;;  %500 = vmatpush2.bf16.msra.mxu1 %v719_v0  ;;  %p740_p4 = pnand %p739_p3, %p733_p0 }
  0x38   :  { %460 = vmatprep.subr.bf16.mxu0 %v720_v1  ;;  %501 = vmatprep.subr.bf16.mxu1 %v722_v2  ;;  %v21_v25 = vld [vmem:[#allocation2] sm:$0xf] }
  0x3b   :  { %461 = vmatpush2.bf16.msra.mxu0 %v724_v3  ;;  %502 = vmatpush2.bf16.msra.mxu1 %v725_v4 }
  0x3c   :  { %462 = vmatprep.subr.bf16.mxu0 %v726_v5  ;;  %503 = vmatprep.subr.bf16.mxu1 %v728_v6 }
  0x3f   :  { %463 = vmatpush2.bf16.msra.mxu0 %v730_v7  ;;  %504 = vmatpush2.bf16.msra.mxu1 %v731_v8 }
  0x42   :  { %465 = vmatmul.mubr.bf16.vlgmr.msra.gmra.mxu0 %v102_v9  ;;  %506 = vmatmul.mubr.bf16.vlgmr.msra.gmra.mxu1 %v102_v9 }
 0x102   :  { %v466_v12 = vpop.f32.mrf.mxu0  ;;  %v507_v13 = vpop.f32.mrf.mxu1 }
 0x104   :  { %v468_v14 = vpop.f32.mrf.mxu0  ;;  %v509_v15 = vpop.f32.mrf.mxu1 }
 0x105   :  { %v518_v16 = vcombine.low %v466_v12, %v468_v14  ;;  %v519_v17 = vcombine.low %v507_v13, %v509_v15 }
 0x106   :  { %v470_v18 = vpop.f32.mrf.mxu0  ;;  %v511_v19 = vpop.f32.mrf.mxu1 }
 0x107   :  { %v526_v20 = vrot.slane %v518_v16, %v911_v51  ;;  %v533_v21 = vrot.slane %v519_v17, %v911_v51 }
 0x108   :  { %v471_v22 = vpop.f32.mrf.mxu0  ;;  %v512_v23 = vpop.f32.mrf.mxu1 }
 0x109   :  { %v534_v24 = vcombine.low %v526_v20, %v533_v21 }
 0x10b   :  { %v541_v26 = vrot.slane %v534_v24, %v911_v51 }
 0x10d   :  { %v543_v27 = vadd.f32 %v541_v26, %v21_v25 }
 0x10f   :  { %548 = vst.msk [vmem:[#allocation2] sm:$0xf] %vm973_vm0, %v543_v27 }
 0x116   :  { %v552_v28 = vld [vmem:[#allocation2] sm:$0xf] }
 0x117   :  { %553 = vst.msk [vmem:[#allocation3] sm:$0xf] %vm973_vm0, %v552_v28 }
 0x118   :  { %743 = shalt.err (!%p740_p4)
}
 0x119   :  { %563 = dma.vmem_to_hbm [thread:$0]  %s561_s26, 64, %s991_s2, [#allocation4]  }
 0x11a   :  { %752 = dma.done.wait [#allocation4], 64  }
 0x11b   :  { %753 = vsyncadd [#allocation4], 4294967232 }
 0x11c   :  { %567 = vsyncpa [#allocation4], 1 }

</bundles_post_ra>
